<compile_context>
chip_gen: v5e
topology: v5e:2x2
jax: 0.10.0
libtpu: 0.0.40
codegen_flags: <defaults>
</compile_context>

<pallas_src>
import jax
import jax.numpy as jnp
from jax.experimental import pallas as pl
from jax.experimental.pallas import tpu as pltpu


def decoder_gru_kernel(ids_ref, xtab_ref, wh_ref, bhn_ref, wout_ref, bout_ref,
                       h0_ref, out_ref, hout_ref):
    """One stream-block (BB streams) of the batched GRU decoder.

    ids_ref : (NBATCH, S) int32, scalar-prefetched into SMEM (all stream blocks)
    xtab_ref: (V, 3P)  fused input-gate lookup table (f32), gates lane-aligned
    wh_ref  : (P, 3P)  fused hidden-gate weights [Whr|Whz|Whn], lane-aligned
    bhn_ref : (1, P)   n-gate hidden bias (must stay inside r * (.))
    wout_ref: (P, Vp)  output linear weight (rows >= H zero)
    bout_ref: (1, Vp)  output linear bias
    h0_ref  : (BB, P)  initial hidden states of this stream block (lane-padded)
    out_ref : (S, BB, Vp) logits for this block (lane-dense, unmasked stores)
    hout_ref: (BB, P)  final hidden states (new context, lane-padded)
    """
    S = ids_ref.shape[1]
    BB, P = h0_ref.shape
    g = pl.program_id(0)

    # ---- Hoisted, h-independent work: gather every (stream, step) fused -----
    # input-gate row before the recurrence so it can overlap with compute.
    xg_steps = []
    for t in range(S):
        rows = [xtab_ref[pl.ds(ids_ref[g * BB + b, t], 1), :] for b in range(BB)]
        xg_steps.append(jnp.concatenate(rows, axis=0))          # (BB, 3P) f32

    # Loop-invariant weight loads hoisted out of the recurrence.
    wh = wh_ref[...]                                            # (P, 3P)
    bhn = bhn_ref[...]                                          # (1, P) f32

    # ---- Serial recurrence, fully unrolled; h carried in vregs (BB, P). -----
    # Padding lanes (>= H) of h provably stay exactly 0 (weights/biases there
    # are zero), so no per-step slicing/realignment of h is needed.
    h = h0_ref[...]
    hs = []
    for t in range(S):
        xg = xg_steps[t]
        hg = jnp.dot(h.astype(wh.dtype), wh,
                     preferred_element_type=jnp.float32)        # one MXU op/step
        rz = jax.nn.sigmoid(xg[:, :2 * P] + hg[:, :2 * P])      # packed r|z (EUP)
        r = rz[:, :P]                                           # vreg-boundary views
        z = rz[:, P:]
        n = jnp.tanh(xg[:, 2 * P:] + r * (hg[:, 2 * P:] + bhn))
        h = (1.0 - z) * n + z * h
        hs.append(h)                                            # stays in vregs

    # ---- Output projection: one lane-dense GEMM over all timesteps. ---------
    hall = jnp.concatenate(hs, axis=0)                          # (S*BB, P), free stacking
    wout = wout_ref[...]
    logits = jnp.dot(hall.astype(wout.dtype), wout,
                     preferred_element_type=jnp.float32) + bout_ref[...]
    for t in range(S):                                          # unmasked (BB, Vp) stores
        out_ref[t] = logits[t * BB:(t + 1) * BB, :]
    hout_ref[...] = h


def prepare_params(params, weights_dtype=jnp.bfloat16):
    """One-time preprocessing: gate fusion, bias folding, 128-lane gate pitch.

    weights_dtype: jnp.bfloat16 for v6e/v7x MXU (f32 accumulation kept),
                   jnp.float32 for exact parity / v5e.
    """
    E, H = params["wir"].shape
    V = params["wout"].shape[1]
    P = ((H + 127) // 128) * 128          # lane-aligned gate pitch
    Vp = ((V + 127) // 128) * 128

    def pad_lanes(mat):                    # (..., H) -> (..., P), zero padded
        return jnp.zeros(mat.shape[:-1] + (P,), jnp.float32).at[..., :H].set(mat)

    # Fused input-gate lookup table; b_ir/b_iz/b_in and the constant hidden
    # biases b_hr/b_hz fold into it.  b_hn must NOT fold (lives inside r*(.)).
    x_r = params["embedding"] @ params["wir"] + params["bir"] + params["bhr"]
    x_z = params["embedding"] @ params["wiz"] + params["biz"] + params["bhz"]
    x_n = params["embedding"] @ params["win"] + params["bin"]
    xtable = jnp.concatenate([pad_lanes(x_r), pad_lanes(x_z), pad_lanes(x_n)],
                             axis=1)                                   # (V, 3P) f32

    def pad_w(mat):                        # (H, H) -> (P, P), zero padded
        return jnp.zeros((P, P), jnp.float32).at[:H, :H].set(mat)

    wh = jnp.concatenate([pad_w(params["whr"]), pad_w(params["whz"]),
                          pad_w(params["whn"])], axis=1)               # (P, 3P)

    wout = jnp.zeros((P, Vp), jnp.float32).at[:H, :V].set(params["wout"])
    bout = jnp.zeros((1, Vp), jnp.float32).at[:, :V].set(params["bout"])

    return dict(
        xtable=xtable,                        # f32 (pure lookup, not an MXU operand)
        wh=wh.astype(weights_dtype),          # MXU operand
        bhn=pad_lanes(params["bhn"]),         # f32 (inside r*(.))
        wout=wout.astype(weights_dtype),      # MXU operand
        bout=bout,                            # f32
        hidden=H, gate_pitch=P, vocab=V, vocab_padded=Vp,
    )


def decoder_forward(x_ids, prep, context, *, block_streams=8):
    """Batched Decoder.forward over NBATCH independent decode streams.

    x_ids  : (NBATCH, S) int token ids          (NBATCH % block_streams == 0)
    context: (NBATCH, H) per-stream GRU hidden state (self.context)
    Returns (logits (S, NBATCH, Vp) lane-padded — slice [..., :V] where it fuses,
             new_context (NBATCH, P) lane-padded — feed back directly next call).
    The original single-sequence module is the NBATCH=block_streams=1-stream case
    (pad streams up to block_streams).
    """
    ids = x_ids.astype(jnp.int32)
    nbatch, S = ids.shape
    H, P = prep["hidden"], prep["gate_pitch"]
    Vp = prep["vocab_padded"]
    BB = block_streams
    assert nbatch % BB == 0, "pad the number of streams to a multiple of block_streams"
    NB = nbatch // BB

    # Lane-padded initial hidden states (padding lanes stay 0 inside the kernel).
    h0 = jnp.zeros((nbatch, P), jnp.float32).at[:, :H].set(
        context.reshape(nbatch, H).astype(jnp.float32))

    full = lambda arr: pl.BlockSpec(arr.shape, lambda g, _ids: (0,) * arr.ndim)

    grid_spec = pltpu.PrefetchScalarGridSpec(
        num_scalar_prefetch=1,                       # ids -> SMEM before the grid
        grid=(NB,),
        in_specs=[
            full(prep["xtable"]),                    # weights: resident across blocks
            full(prep["wh"]),
            full(prep["bhn"]),
            full(prep["wout"]),
            full(prep["bout"]),
            pl.BlockSpec((BB, P), lambda g, _ids: (g, 0)),       # h0 per block
        ],
        out_specs=(
            pl.BlockSpec((S, BB, Vp), lambda g, _ids: (0, g, 0)),  # logits per block
            pl.BlockSpec((BB, P), lambda g, _ids: (g, 0)),         # new context
        ),
    )

    out, hout = pl.pallas_call(
        decoder_gru_kernel,
        out_shape=(jax.ShapeDtypeStruct((S, nbatch, Vp), jnp.float32),
                   jax.ShapeDtypeStruct((nbatch, P), jnp.float32)),
        grid_spec=grid_spec,
        # "parallel": stream blocks shard across the 2 TensorCores on v7x.
        compiler_params=pltpu.CompilerParams(dimension_semantics=("parallel",)),
        # NOTE: the context round-trip could additionally be made in-place via
        # input_output_aliases (h0 <-> hout); it is a few-KiB buffer so the win
        # is marginal and it is left out here.
    )(ids, prep["xtable"], prep["wh"], prep["bhn"], prep["wout"], prep["bout"], h0)
    return out, hout


def decoder_reference(x_ids, params, context):
    """Pure-JAX reference replicating torch.nn.GRU (gate order r, z, n), batched."""
    emb = params["embedding"][x_ids]                 # (B, S, E)
    B, S, _ = emb.shape
    h = context.reshape(B, -1)
    hs = []
    for t in range(S):
        x = emb[:, t, :]
        r = jax.nn.sigmoid(x @ params["wir"] + params["bir"] + h @ params["whr"] + params["bhr"])
        z = jax.nn.sigmoid(x @ params["wiz"] + params["biz"] + h @ params["whz"] + params["bhz"])
        n = jnp.tanh(x @ params["win"] + params["bin"] + r * (h @ params["whn"] + params["bhn"]))
        h = (1.0 - z) * n + z * h
        hs.append(h)
    hall = jnp.stack(hs, axis=0)                     # (S, B, H)
    out = hall @ params["wout"] + params["bout"]     # (S, B, V)
    return out, h


if __name__ == "__main__":
    # len(vocab.stoi): 26 uppercase letters + 10 digits + '{' special = 37
    VOCAB = 37
    EMBED = 32
    HIDDEN = 32
    SEQ = 8
    STREAMS = 16          # 16 independent decode streams ...
    BLOCK_STREAMS = 8     # ... in 2 stream-blocks of 8 (one per grid step / TC)

    key = jax.random.PRNGKey(0)
    ks = jax.random.split(key, 20)

    def init(k, shape, scale=0.1):
        return scale * jax.random.normal(k, shape, dtype=jnp.float32)

    params = dict(
        embedding=init(ks[0], (VOCAB, EMBED)),
        wir=init(ks[1], (EMBED, HIDDEN)), wiz=init(ks[2], (EMBED, HIDDEN)), win=init(ks[3], (EMBED, HIDDEN)),
        whr=init(ks[4], (HIDDEN, HIDDEN)), whz=init(ks[5], (HIDDEN, HIDDEN)), whn=init(ks[6], (HIDDEN, HIDDEN)),
        bir=init(ks[7], (1, HIDDEN)), biz=init(ks[8], (1, HIDDEN)), bin=init(ks[9], (1, HIDDEN)),
        bhr=init(ks[10], (1, HIDDEN)), bhz=init(ks[11], (1, HIDDEN)), bhn=init(ks[12], (1, HIDDEN)),
        wout=init(ks[13], (HIDDEN, VOCAB)), bout=init(ks[14], (1, VOCAB)),
    )

    x_ids = jax.random.randint(ks[15], (STREAMS, SEQ), 0, VOCAB)
    # init_context: encoder's final hidden state, one per decode stream.
    context = init(ks[16], (STREAMS, HIDDEN))

    ref_out, ref_ctx = decoder_reference(x_ids, params, context)

    # --- bf16-weight path (v6e / v7x MXU), f32 accumulation --------------------
    prep_bf16 = prepare_params(params, weights_dtype=jnp.bfloat16)
    out_b, ctx_b = decoder_forward(x_ids, prep_bf16, context, block_streams=BLOCK_STREAMS)
    jax.block_until_ready((out_b, ctx_b))
    assert out_b.shape == (SEQ, STREAMS, prep_bf16["vocab_padded"])
    assert ctx_b.shape == (STREAMS, prep_bf16["gate_pitch"])
    assert jnp.allclose(out_b[:, :, :VOCAB], ref_out, atol=1e-2, rtol=1e-2)
    assert jnp.allclose(ctx_b[:, :HIDDEN], ref_ctx, atol=1e-2, rtol=1e-2)

    # --- f32-weight path (exact parity / v5e) ----------------------------------
    prep_f32 = prepare_params(params, weights_dtype=jnp.float32)
    out_f, ctx_f = decoder_forward(x_ids, prep_f32, context, block_streams=BLOCK_STREAMS)
    jax.block_until_ready((out_f, ctx_f))
    assert jnp.allclose(out_f[:, :, :VOCAB], ref_out, atol=2e-3, rtol=2e-3)
    assert jnp.allclose(ctx_f[:, :HIDDEN], ref_ctx, atol=2e-3, rtol=2e-3)

    print("KERNEL_OK")
</pallas_src>

<mosaic_0001>
module attributes {stable_mosaic.version = 11 : i64} {
  func.func @decoder_gru_kernel(%arg0: i32, %arg1: memref<16x8xi32, #tpu.memory_space<smem>>, %arg2: memref<37x384xf32, #tpu.memory_space<vmem>>, %arg3: memref<128x384xbf16, #tpu.memory_space<vmem>>, %arg4: memref<1x128xf32, #tpu.memory_space<vmem>>, %arg5: memref<128x128xbf16, #tpu.memory_space<vmem>>, %arg6: memref<1x128xf32, #tpu.memory_space<vmem>>, %arg7: memref<8x128xf32, #tpu.memory_space<vmem>>, %arg8: memref<8x8x128xf32, #tpu.memory_space<vmem>>, %arg9: memref<8x128xf32, #tpu.memory_space<vmem>>) attributes {dimension_semantics = [#tpu.dimension_semantics<parallel>], iteration_bounds = array<i64: 2>, scalar_prefetch = 1 : i64, scratch_operands = 0 : i64, tpu.core_type = #tpu.core_type<tc>, window_params = [{pipeline_mode = #tpu.pipeline_mode<synchronous>, transform_indices = @transform_0, window_bounds = array<i64: 37, 384>}, {pipeline_mode = #tpu.pipeline_mode<synchronous>, transform_indices = @transform_1, window_bounds = array<i64: 128, 384>}, {pipeline_mode = #tpu.pipeline_mode<synchronous>, transform_indices = @transform_2, window_bounds = array<i64: 1, 128>}, {pipeline_mode = #tpu.pipeline_mode<synchronous>, transform_indices = @transform_3, window_bounds = array<i64: 128, 128>}, {pipeline_mode = #tpu.pipeline_mode<synchronous>, transform_indices = @transform_4, window_bounds = array<i64: 1, 128>}, {transform_indices = @transform_5, window_bounds = array<i64: 8, 128>}, {transform_indices = @transform_6, window_bounds = array<i64: 8, 8, 128>}, {transform_indices = @transform_7, window_bounds = array<i64: 8, 128>}]} {
    %c8_i32 = arith.constant 8 : i32
    %0 = arith.muli %arg0, %c8_i32 : i32
    %c0_i32 = arith.constant 0 : i32
    %1 = arith.addi %0, %c0_i32 : i32
    %2 = arith.index_cast %1 : i32 to index
    %c0 = arith.constant 0 : index
    %3 = memref.load %arg1[%2, %c0] : memref<16x8xi32, #tpu.memory_space<smem>>
    %4 = arith.index_cast %3 : i32 to index
    %c0_0 = arith.constant 0 : index
    %5 = vector.load %arg2[%4, %c0_0] : memref<37x384xf32, #tpu.memory_space<vmem>>, vector<1x384xf32>
    %c8_i32_1 = arith.constant 8 : i32
    %6 = arith.muli %arg0, %c8_i32_1 : i32
    %c1_i32 = arith.constant 1 : i32
    %7 = arith.addi %6, %c1_i32 : i32
    %8 = arith.index_cast %7 : i32 to index
    %c0_2 = arith.constant 0 : index
    %9 = memref.load %arg1[%8, %c0_2] : memref<16x8xi32, #tpu.memory_space<smem>>
    %10 = arith.index_cast %9 : i32 to index
    %c0_3 = arith.constant 0 : index
    %11 = vector.load %arg2[%10, %c0_3] : memref<37x384xf32, #tpu.memory_space<vmem>>, vector<1x384xf32>
    %c8_i32_4 = arith.constant 8 : i32
    %12 = arith.muli %arg0, %c8_i32_4 : i32
    %c2_i32 = arith.constant 2 : i32
    %13 = arith.addi %12, %c2_i32 : i32
    %14 = arith.index_cast %13 : i32 to index
    %c0_5 = arith.constant 0 : index
    %15 = memref.load %arg1[%14, %c0_5] : memref<16x8xi32, #tpu.memory_space<smem>>
    %16 = arith.index_cast %15 : i32 to index
    %c0_6 = arith.constant 0 : index
    %17 = vector.load %arg2[%16, %c0_6] : memref<37x384xf32, #tpu.memory_space<vmem>>, vector<1x384xf32>
    %c8_i32_7 = arith.constant 8 : i32
    %18 = arith.muli %arg0, %c8_i32_7 : i32
    %c3_i32 = arith.constant 3 : i32
    %19 = arith.addi %18, %c3_i32 : i32
    %20 = arith.index_cast %19 : i32 to index
    %c0_8 = arith.constant 0 : index
    %21 = memref.load %arg1[%20, %c0_8] : memref<16x8xi32, #tpu.memory_space<smem>>
    %22 = arith.index_cast %21 : i32 to index
    %c0_9 = arith.constant 0 : index
    %23 = vector.load %arg2[%22, %c0_9] : memref<37x384xf32, #tpu.memory_space<vmem>>, vector<1x384xf32>
    %c8_i32_10 = arith.constant 8 : i32
    %24 = arith.muli %arg0, %c8_i32_10 : i32
    %c4_i32 = arith.constant 4 : i32
    %25 = arith.addi %24, %c4_i32 : i32
    %26 = arith.index_cast %25 : i32 to index
    %c0_11 = arith.constant 0 : index
    %27 = memref.load %arg1[%26, %c0_11] : memref<16x8xi32, #tpu.memory_space<smem>>
    %28 = arith.index_cast %27 : i32 to index
    %c0_12 = arith.constant 0 : index
    %29 = vector.load %arg2[%28, %c0_12] : memref<37x384xf32, #tpu.memory_space<vmem>>, vector<1x384xf32>
    %c8_i32_13 = arith.constant 8 : i32
    %30 = arith.muli %arg0, %c8_i32_13 : i32
    %c5_i32 = arith.constant 5 : i32
    %31 = arith.addi %30, %c5_i32 : i32
    %32 = arith.index_cast %31 : i32 to index
    %c0_14 = arith.constant 0 : index
    %33 = memref.load %arg1[%32, %c0_14] : memref<16x8xi32, #tpu.memory_space<smem>>
    %34 = arith.index_cast %33 : i32 to index
    %c0_15 = arith.constant 0 : index
    %35 = vector.load %arg2[%34, %c0_15] : memref<37x384xf32, #tpu.memory_space<vmem>>, vector<1x384xf32>
    %c8_i32_16 = arith.constant 8 : i32
    %36 = arith.muli %arg0, %c8_i32_16 : i32
    %c6_i32 = arith.constant 6 : i32
    %37 = arith.addi %36, %c6_i32 : i32
    %38 = arith.index_cast %37 : i32 to index
    %c0_17 = arith.constant 0 : index
    %39 = memref.load %arg1[%38, %c0_17] : memref<16x8xi32, #tpu.memory_space<smem>>
    %40 = arith.index_cast %39 : i32 to index
    %c0_18 = arith.constant 0 : index
    %41 = vector.load %arg2[%40, %c0_18] : memref<37x384xf32, #tpu.memory_space<vmem>>, vector<1x384xf32>
    %c8_i32_19 = arith.constant 8 : i32
    %42 = arith.muli %arg0, %c8_i32_19 : i32
    %c7_i32 = arith.constant 7 : i32
    %43 = arith.addi %42, %c7_i32 : i32
    %44 = arith.index_cast %43 : i32 to index
    %c0_20 = arith.constant 0 : index
    %45 = memref.load %arg1[%44, %c0_20] : memref<16x8xi32, #tpu.memory_space<smem>>
    %46 = arith.index_cast %45 : i32 to index
    %c0_21 = arith.constant 0 : index
    %47 = vector.load %arg2[%46, %c0_21] : memref<37x384xf32, #tpu.memory_space<vmem>>, vector<1x384xf32>
    %48 = tpu.concatenate %5, %11, %17, %23, %29, %35, %41, %47 in 0 : vector<1x384xf32>, vector<1x384xf32>, vector<1x384xf32>, vector<1x384xf32>, vector<1x384xf32>, vector<1x384xf32>, vector<1x384xf32>, vector<1x384xf32> -> vector<8x384xf32>
    %c8_i32_22 = arith.constant 8 : i32
    %49 = arith.muli %arg0, %c8_i32_22 : i32
    %c0_i32_23 = arith.constant 0 : i32
    %50 = arith.addi %49, %c0_i32_23 : i32
    %51 = arith.index_cast %50 : i32 to index
    %c1 = arith.constant 1 : index
    %52 = memref.load %arg1[%51, %c1] : memref<16x8xi32, #tpu.memory_space<smem>>
    %53 = arith.index_cast %52 : i32 to index
    %c0_24 = arith.constant 0 : index
    %54 = vector.load %arg2[%53, %c0_24] : memref<37x384xf32, #tpu.memory_space<vmem>>, vector<1x384xf32>
    %c8_i32_25 = arith.constant 8 : i32
    %55 = arith.muli %arg0, %c8_i32_25 : i32
    %c1_i32_26 = arith.constant 1 : i32
    %56 = arith.addi %55, %c1_i32_26 : i32
    %57 = arith.index_cast %56 : i32 to index
    %c1_27 = arith.constant 1 : index
    %58 = memref.load %arg1[%57, %c1_27] : memref<16x8xi32, #tpu.memory_space<smem>>
    %59 = arith.index_cast %58 : i32 to index
    %c0_28 = arith.constant 0 : index
    %60 = vector.load %arg2[%59, %c0_28] : memref<37x384xf32, #tpu.memory_space<vmem>>, vector<1x384xf32>
    %c8_i32_29 = arith.constant 8 : i32
    %61 = arith.muli %arg0, %c8_i32_29 : i32
    %c2_i32_30 = arith.constant 2 : i32
    %62 = arith.addi %61, %c2_i32_30 : i32
    %63 = arith.index_cast %62 : i32 to index
    %c1_31 = arith.constant 1 : index
    %64 = memref.load %arg1[%63, %c1_31] : memref<16x8xi32, #tpu.memory_space<smem>>
    %65 = arith.index_cast %64 : i32 to index
    %c0_32 = arith.constant 0 : index
    %66 = vector.load %arg2[%65, %c0_32] : memref<37x384xf32, #tpu.memory_space<vmem>>, vector<1x384xf32>
    %c8_i32_33 = arith.constant 8 : i32
    %67 = arith.muli %arg0, %c8_i32_33 : i32
    %c3_i32_34 = arith.constant 3 : i32
    %68 = arith.addi %67, %c3_i32_34 : i32
    %69 = arith.index_cast %68 : i32 to index
    %c1_35 = arith.constant 1 : index
    %70 = memref.load %arg1[%69, %c1_35] : memref<16x8xi32, #tpu.memory_space<smem>>
    %71 = arith.index_cast %70 : i32 to index
    %c0_36 = arith.constant 0 : index
    %72 = vector.load %arg2[%71, %c0_36] : memref<37x384xf32, #tpu.memory_space<vmem>>, vector<1x384xf32>
    %c8_i32_37 = arith.constant 8 : i32
    %73 = arith.muli %arg0, %c8_i32_37 : i32
    %c4_i32_38 = arith.constant 4 : i32
    %74 = arith.addi %73, %c4_i32_38 : i32
    %75 = arith.index_cast %74 : i32 to index
    %c1_39 = arith.constant 1 : index
    %76 = memref.load %arg1[%75, %c1_39] : memref<16x8xi32, #tpu.memory_space<smem>>
    %77 = arith.index_cast %76 : i32 to index
    %c0_40 = arith.constant 0 : index
    %78 = vector.load %arg2[%77, %c0_40] : memref<37x384xf32, #tpu.memory_space<vmem>>, vector<1x384xf32>
    %c8_i32_41 = arith.constant 8 : i32
    %79 = arith.muli %arg0, %c8_i32_41 : i32
    %c5_i32_42 = arith.constant 5 : i32
    %80 = arith.addi %79, %c5_i32_42 : i32
    %81 = arith.index_cast %80 : i32 to index
    %c1_43 = arith.constant 1 : index
    %82 = memref.load %arg1[%81, %c1_43] : memref<16x8xi32, #tpu.memory_space<smem>>
    %83 = arith.index_cast %82 : i32 to index
    %c0_44 = arith.constant 0 : index
    %84 = vector.load %arg2[%83, %c0_44] : memref<37x384xf32, #tpu.memory_space<vmem>>, vector<1x384xf32>
    %c8_i32_45 = arith.constant 8 : i32
    %85 = arith.muli %arg0, %c8_i32_45 : i32
    %c6_i32_46 = arith.constant 6 : i32
    %86 = arith.addi %85, %c6_i32_46 : i32
    %87 = arith.index_cast %86 : i32 to index
    %c1_47 = arith.constant 1 : index
    %88 = memref.load %arg1[%87, %c1_47] : memref<16x8xi32, #tpu.memory_space<smem>>
    %89 = arith.index_cast %88 : i32 to index
    %c0_48 = arith.constant 0 : index
    %90 = vector.load %arg2[%89, %c0_48] : memref<37x384xf32, #tpu.memory_space<vmem>>, vector<1x384xf32>
    %c8_i32_49 = arith.constant 8 : i32
    %91 = arith.muli %arg0, %c8_i32_49 : i32
    %c7_i32_50 = arith.constant 7 : i32
    %92 = arith.addi %91, %c7_i32_50 : i32
    %93 = arith.index_cast %92 : i32 to index
    %c1_51 = arith.constant 1 : index
    %94 = memref.load %arg1[%93, %c1_51] : memref<16x8xi32, #tpu.memory_space<smem>>
    %95 = arith.index_cast %94 : i32 to index
    %c0_52 = arith.constant 0 : index
    %96 = vector.load %arg2[%95, %c0_52] : memref<37x384xf32, #tpu.memory_space<vmem>>, vector<1x384xf32>
    %97 = tpu.concatenate %54, %60, %66, %72, %78, %84, %90, %96 in 0 : vector<1x384xf32>, vector<1x384xf32>, vector<1x384xf32>, vector<1x384xf32>, vector<1x384xf32>, vector<1x384xf32>, vector<1x384xf32>, vector<1x384xf32> -> vector<8x384xf32>
    %c8_i32_53 = arith.constant 8 : i32
    %98 = arith.muli %arg0, %c8_i32_53 : i32
    %c0_i32_54 = arith.constant 0 : i32
    %99 = arith.addi %98, %c0_i32_54 : i32
    %100 = arith.index_cast %99 : i32 to index
    %c2 = arith.constant 2 : index
    %101 = memref.load %arg1[%100, %c2] : memref<16x8xi32, #tpu.memory_space<smem>>
    %102 = arith.index_cast %101 : i32 to index
    %c0_55 = arith.constant 0 : index
    %103 = vector.load %arg2[%102, %c0_55] : memref<37x384xf32, #tpu.memory_space<vmem>>, vector<1x384xf32>
    %c8_i32_56 = arith.constant 8 : i32
    %104 = arith.muli %arg0, %c8_i32_56 : i32
    %c1_i32_57 = arith.constant 1 : i32
    %105 = arith.addi %104, %c1_i32_57 : i32
    %106 = arith.index_cast %105 : i32 to index
    %c2_58 = arith.constant 2 : index
    %107 = memref.load %arg1[%106, %c2_58] : memref<16x8xi32, #tpu.memory_space<smem>>
    %108 = arith.index_cast %107 : i32 to index
    %c0_59 = arith.constant 0 : index
    %109 = vector.load %arg2[%108, %c0_59] : memref<37x384xf32, #tpu.memory_space<vmem>>, vector<1x384xf32>
    %c8_i32_60 = arith.constant 8 : i32
    %110 = arith.muli %arg0, %c8_i32_60 : i32
    %c2_i32_61 = arith.constant 2 : i32
    %111 = arith.addi %110, %c2_i32_61 : i32
    %112 = arith.index_cast %111 : i32 to index
    %c2_62 = arith.constant 2 : index
    %113 = memref.load %arg1[%112, %c2_62] : memref<16x8xi32, #tpu.memory_space<smem>>
    %114 = arith.index_cast %113 : i32 to index
    %c0_63 = arith.constant 0 : index
    %115 = vector.load %arg2[%114, %c0_63] : memref<37x384xf32, #tpu.memory_space<vmem>>, vector<1x384xf32>
    %c8_i32_64 = arith.constant 8 : i32
    %116 = arith.muli %arg0, %c8_i32_64 : i32
    %c3_i32_65 = arith.constant 3 : i32
    %117 = arith.addi %116, %c3_i32_65 : i32
    %118 = arith.index_cast %117 : i32 to index
    %c2_66 = arith.constant 2 : index
    %119 = memref.load %arg1[%118, %c2_66] : memref<16x8xi32, #tpu.memory_space<smem>>
    %120 = arith.index_cast %119 : i32 to index
    %c0_67 = arith.constant 0 : index
    %121 = vector.load %arg2[%120, %c0_67] : memref<37x384xf32, #tpu.memory_space<vmem>>, vector<1x384xf32>
    %c8_i32_68 = arith.constant 8 : i32
    %122 = arith.muli %arg0, %c8_i32_68 : i32
    %c4_i32_69 = arith.constant 4 : i32
    %123 = arith.addi %122, %c4_i32_69 : i32
    %124 = arith.index_cast %123 : i32 to index
    %c2_70 = arith.constant 2 : index
    %125 = memref.load %arg1[%124, %c2_70] : memref<16x8xi32, #tpu.memory_space<smem>>
    %126 = arith.index_cast %125 : i32 to index
    %c0_71 = arith.constant 0 : index
    %127 = vector.load %arg2[%126, %c0_71] : memref<37x384xf32, #tpu.memory_space<vmem>>, vector<1x384xf32>
    %c8_i32_72 = arith.constant 8 : i32
    %128 = arith.muli %arg0, %c8_i32_72 : i32
    %c5_i32_73 = arith.constant 5 : i32
    %129 = arith.addi %128, %c5_i32_73 : i32
    %130 = arith.index_cast %129 : i32 to index
    %c2_74 = arith.constant 2 : index
    %131 = memref.load %arg1[%130, %c2_74] : memref<16x8xi32, #tpu.memory_space<smem>>
    %132 = arith.index_cast %131 : i32 to index
    %c0_75 = arith.constant 0 : index
    %133 = vector.load %arg2[%132, %c0_75] : memref<37x384xf32, #tpu.memory_space<vmem>>, vector<1x384xf32>
    %c8_i32_76 = arith.constant 8 : i32
    %134 = arith.muli %arg0, %c8_i32_76 : i32
    %c6_i32_77 = arith.constant 6 : i32
    %135 = arith.addi %134, %c6_i32_77 : i32
    %136 = arith.index_cast %135 : i32 to index
    %c2_78 = arith.constant 2 : index
    %137 = memref.load %arg1[%136, %c2_78] : memref<16x8xi32, #tpu.memory_space<smem>>
    %138 = arith.index_cast %137 : i32 to index
    %c0_79 = arith.constant 0 : index
    %139 = vector.load %arg2[%138, %c0_79] : memref<37x384xf32, #tpu.memory_space<vmem>>, vector<1x384xf32>
    %c8_i32_80 = arith.constant 8 : i32
    %140 = arith.muli %arg0, %c8_i32_80 : i32
    %c7_i32_81 = arith.constant 7 : i32
    %141 = arith.addi %140, %c7_i32_81 : i32
    %142 = arith.index_cast %141 : i32 to index
    %c2_82 = arith.constant 2 : index
    %143 = memref.load %arg1[%142, %c2_82] : memref<16x8xi32, #tpu.memory_space<smem>>
    %144 = arith.index_cast %143 : i32 to index
    %c0_83 = arith.constant 0 : index
    %145 = vector.load %arg2[%144, %c0_83] : memref<37x384xf32, #tpu.memory_space<vmem>>, vector<1x384xf32>
    %146 = tpu.concatenate %103, %109, %115, %121, %127, %133, %139, %145 in 0 : vector<1x384xf32>, vector<1x384xf32>, vector<1x384xf32>, vector<1x384xf32>, vector<1x384xf32>, vector<1x384xf32>, vector<1x384xf32>, vector<1x384xf32> -> vector<8x384xf32>
    %c8_i32_84 = arith.constant 8 : i32
    %147 = arith.muli %arg0, %c8_i32_84 : i32
    %c0_i32_85 = arith.constant 0 : i32
    %148 = arith.addi %147, %c0_i32_85 : i32
    %149 = arith.index_cast %148 : i32 to index
    %c3 = arith.constant 3 : index
    %150 = memref.load %arg1[%149, %c3] : memref<16x8xi32, #tpu.memory_space<smem>>
    %151 = arith.index_cast %150 : i32 to index
    %c0_86 = arith.constant 0 : index
    %152 = vector.load %arg2[%151, %c0_86] : memref<37x384xf32, #tpu.memory_space<vmem>>, vector<1x384xf32>
    %c8_i32_87 = arith.constant 8 : i32
    %153 = arith.muli %arg0, %c8_i32_87 : i32
    %c1_i32_88 = arith.constant 1 : i32
    %154 = arith.addi %153, %c1_i32_88 : i32
    %155 = arith.index_cast %154 : i32 to index
    %c3_89 = arith.constant 3 : index
    %156 = memref.load %arg1[%155, %c3_89] : memref<16x8xi32, #tpu.memory_space<smem>>
    %157 = arith.index_cast %156 : i32 to index
    %c0_90 = arith.constant 0 : index
    %158 = vector.load %arg2[%157, %c0_90] : memref<37x384xf32, #tpu.memory_space<vmem>>, vector<1x384xf32>
    %c8_i32_91 = arith.constant 8 : i32
    %159 = arith.muli %arg0, %c8_i32_91 : i32
    %c2_i32_92 = arith.constant 2 : i32
    %160 = arith.addi %159, %c2_i32_92 : i32
    %161 = arith.index_cast %160 : i32 to index
    %c3_93 = arith.constant 3 : index
    %162 = memref.load %arg1[%161, %c3_93] : memref<16x8xi32, #tpu.memory_space<smem>>
    %163 = arith.index_cast %162 : i32 to index
    %c0_94 = arith.constant 0 : index
    %164 = vector.load %arg2[%163, %c0_94] : memref<37x384xf32, #tpu.memory_space<vmem>>, vector<1x384xf32>
    %c8_i32_95 = arith.constant 8 : i32
    %165 = arith.muli %arg0, %c8_i32_95 : i32
    %c3_i32_96 = arith.constant 3 : i32
    %166 = arith.addi %165, %c3_i32_96 : i32
    %167 = arith.index_cast %166 : i32 to index
    %c3_97 = arith.constant 3 : index
    %168 = memref.load %arg1[%167, %c3_97] : memref<16x8xi32, #tpu.memory_space<smem>>
    %169 = arith.index_cast %168 : i32 to index
    %c0_98 = arith.constant 0 : index
    %170 = vector.load %arg2[%169, %c0_98] : memref<37x384xf32, #tpu.memory_space<vmem>>, vector<1x384xf32>
    %c8_i32_99 = arith.constant 8 : i32
    %171 = arith.muli %arg0, %c8_i32_99 : i32
    %c4_i32_100 = arith.constant 4 : i32
    %172 = arith.addi %171, %c4_i32_100 : i32
    %173 = arith.index_cast %172 : i32 to index
    %c3_101 = arith.constant 3 : index
    %174 = memref.load %arg1[%173, %c3_101] : memref<16x8xi32, #tpu.memory_space<smem>>
    %175 = arith.index_cast %174 : i32 to index
    %c0_102 = arith.constant 0 : index
    %176 = vector.load %arg2[%175, %c0_102] : memref<37x384xf32, #tpu.memory_space<vmem>>, vector<1x384xf32>
    %c8_i32_103 = arith.constant 8 : i32
    %177 = arith.muli %arg0, %c8_i32_103 : i32
    %c5_i32_104 = arith.constant 5 : i32
    %178 = arith.addi %177, %c5_i32_104 : i32
    %179 = arith.index_cast %178 : i32 to index
    %c3_105 = arith.constant 3 : index
    %180 = memref.load %arg1[%179, %c3_105] : memref<16x8xi32, #tpu.memory_space<smem>>
    %181 = arith.index_cast %180 : i32 to index
    %c0_106 = arith.constant 0 : index
    %182 = vector.load %arg2[%181, %c0_106] : memref<37x384xf32, #tpu.memory_space<vmem>>, vector<1x384xf32>
    %c8_i32_107 = arith.constant 8 : i32
    %183 = arith.muli %arg0, %c8_i32_107 : i32
    %c6_i32_108 = arith.constant 6 : i32
    %184 = arith.addi %183, %c6_i32_108 : i32
    %185 = arith.index_cast %184 : i32 to index
    %c3_109 = arith.constant 3 : index
    %186 = memref.load %arg1[%185, %c3_109] : memref<16x8xi32, #tpu.memory_space<smem>>
    %187 = arith.index_cast %186 : i32 to index
    %c0_110 = arith.constant 0 : index
    %188 = vector.load %arg2[%187, %c0_110] : memref<37x384xf32, #tpu.memory_space<vmem>>, vector<1x384xf32>
    %c8_i32_111 = arith.constant 8 : i32
    %189 = arith.muli %arg0, %c8_i32_111 : i32
    %c7_i32_112 = arith.constant 7 : i32
    %190 = arith.addi %189, %c7_i32_112 : i32
    %191 = arith.index_cast %190 : i32 to index
    %c3_113 = arith.constant 3 : index
    %192 = memref.load %arg1[%191, %c3_113] : memref<16x8xi32, #tpu.memory_space<smem>>
    %193 = arith.index_cast %192 : i32 to index
    %c0_114 = arith.constant 0 : index
    %194 = vector.load %arg2[%193, %c0_114] : memref<37x384xf32, #tpu.memory_space<vmem>>, vector<1x384xf32>
    %195 = tpu.concatenate %152, %158, %164, %170, %176, %182, %188, %194 in 0 : vector<1x384xf32>, vector<1x384xf32>, vector<1x384xf32>, vector<1x384xf32>, vector<1x384xf32>, vector<1x384xf32>, vector<1x384xf32>, vector<1x384xf32> -> vector<8x384xf32>
    %c8_i32_115 = arith.constant 8 : i32
    %196 = arith.muli %arg0, %c8_i32_115 : i32
    %c0_i32_116 = arith.constant 0 : i32
    %197 = arith.addi %196, %c0_i32_116 : i32
    %198 = arith.index_cast %197 : i32 to index
    %c4 = arith.constant 4 : index
    %199 = memref.load %arg1[%198, %c4] : memref<16x8xi32, #tpu.memory_space<smem>>
    %200 = arith.index_cast %199 : i32 to index
    %c0_117 = arith.constant 0 : index
    %201 = vector.load %arg2[%200, %c0_117] : memref<37x384xf32, #tpu.memory_space<vmem>>, vector<1x384xf32>
    %c8_i32_118 = arith.constant 8 : i32
    %202 = arith.muli %arg0, %c8_i32_118 : i32
    %c1_i32_119 = arith.constant 1 : i32
    %203 = arith.addi %202, %c1_i32_119 : i32
    %204 = arith.index_cast %203 : i32 to index
    %c4_120 = arith.constant 4 : index
    %205 = memref.load %arg1[%204, %c4_120] : memref<16x8xi32, #tpu.memory_space<smem>>
    %206 = arith.index_cast %205 : i32 to index
    %c0_121 = arith.constant 0 : index
    %207 = vector.load %arg2[%206, %c0_121] : memref<37x384xf32, #tpu.memory_space<vmem>>, vector<1x384xf32>
    %c8_i32_122 = arith.constant 8 : i32
    %208 = arith.muli %arg0, %c8_i32_122 : i32
    %c2_i32_123 = arith.constant 2 : i32
    %209 = arith.addi %208, %c2_i32_123 : i32
    %210 = arith.index_cast %209 : i32 to index
    %c4_124 = arith.constant 4 : index
    %211 = memref.load %arg1[%210, %c4_124] : memref<16x8xi32, #tpu.memory_space<smem>>
    %212 = arith.index_cast %211 : i32 to index
    %c0_125 = arith.constant 0 : index
    %213 = vector.load %arg2[%212, %c0_125] : memref<37x384xf32, #tpu.memory_space<vmem>>, vector<1x384xf32>
    %c8_i32_126 = arith.constant 8 : i32
    %214 = arith.muli %arg0, %c8_i32_126 : i32
    %c3_i32_127 = arith.constant 3 : i32
    %215 = arith.addi %214, %c3_i32_127 : i32
    %216 = arith.index_cast %215 : i32 to index
    %c4_128 = arith.constant 4 : index
    %217 = memref.load %arg1[%216, %c4_128] : memref<16x8xi32, #tpu.memory_space<smem>>
    %218 = arith.index_cast %217 : i32 to index
    %c0_129 = arith.constant 0 : index
    %219 = vector.load %arg2[%218, %c0_129] : memref<37x384xf32, #tpu.memory_space<vmem>>, vector<1x384xf32>
    %c8_i32_130 = arith.constant 8 : i32
    %220 = arith.muli %arg0, %c8_i32_130 : i32
    %c4_i32_131 = arith.constant 4 : i32
    %221 = arith.addi %220, %c4_i32_131 : i32
    %222 = arith.index_cast %221 : i32 to index
    %c4_132 = arith.constant 4 : index
    %223 = memref.load %arg1[%222, %c4_132] : memref<16x8xi32, #tpu.memory_space<smem>>
    %224 = arith.index_cast %223 : i32 to index
    %c0_133 = arith.constant 0 : index
    %225 = vector.load %arg2[%224, %c0_133] : memref<37x384xf32, #tpu.memory_space<vmem>>, vector<1x384xf32>
    %c8_i32_134 = arith.constant 8 : i32
    %226 = arith.muli %arg0, %c8_i32_134 : i32
    %c5_i32_135 = arith.constant 5 : i32
    %227 = arith.addi %226, %c5_i32_135 : i32
    %228 = arith.index_cast %227 : i32 to index
    %c4_136 = arith.constant 4 : index
    %229 = memref.load %arg1[%228, %c4_136] : memref<16x8xi32, #tpu.memory_space<smem>>
    %230 = arith.index_cast %229 : i32 to index
    %c0_137 = arith.constant 0 : index
    %231 = vector.load %arg2[%230, %c0_137] : memref<37x384xf32, #tpu.memory_space<vmem>>, vector<1x384xf32>
    %c8_i32_138 = arith.constant 8 : i32
    %232 = arith.muli %arg0, %c8_i32_138 : i32
    %c6_i32_139 = arith.constant 6 : i32
    %233 = arith.addi %232, %c6_i32_139 : i32
    %234 = arith.index_cast %233 : i32 to index
    %c4_140 = arith.constant 4 : index
    %235 = memref.load %arg1[%234, %c4_140] : memref<16x8xi32, #tpu.memory_space<smem>>
    %236 = arith.index_cast %235 : i32 to index
    %c0_141 = arith.constant 0 : index
    %237 = vector.load %arg2[%236, %c0_141] : memref<37x384xf32, #tpu.memory_space<vmem>>, vector<1x384xf32>
    %c8_i32_142 = arith.constant 8 : i32
    %238 = arith.muli %arg0, %c8_i32_142 : i32
    %c7_i32_143 = arith.constant 7 : i32
    %239 = arith.addi %238, %c7_i32_143 : i32
    %240 = arith.index_cast %239 : i32 to index
    %c4_144 = arith.constant 4 : index
    %241 = memref.load %arg1[%240, %c4_144] : memref<16x8xi32, #tpu.memory_space<smem>>
    %242 = arith.index_cast %241 : i32 to index
    %c0_145 = arith.constant 0 : index
    %243 = vector.load %arg2[%242, %c0_145] : memref<37x384xf32, #tpu.memory_space<vmem>>, vector<1x384xf32>
    %244 = tpu.concatenate %201, %207, %213, %219, %225, %231, %237, %243 in 0 : vector<1x384xf32>, vector<1x384xf32>, vector<1x384xf32>, vector<1x384xf32>, vector<1x384xf32>, vector<1x384xf32>, vector<1x384xf32>, vector<1x384xf32> -> vector<8x384xf32>
    %c8_i32_146 = arith.constant 8 : i32
    %245 = arith.muli %arg0, %c8_i32_146 : i32
    %c0_i32_147 = arith.constant 0 : i32
    %246 = arith.addi %245, %c0_i32_147 : i32
    %247 = arith.index_cast %246 : i32 to index
    %c5 = arith.constant 5 : index
    %248 = memref.load %arg1[%247, %c5] : memref<16x8xi32, #tpu.memory_space<smem>>
    %249 = arith.index_cast %248 : i32 to index
    %c0_148 = arith.constant 0 : index
    %250 = vector.load %arg2[%249, %c0_148] : memref<37x384xf32, #tpu.memory_space<vmem>>, vector<1x384xf32>
    %c8_i32_149 = arith.constant 8 : i32
    %251 = arith.muli %arg0, %c8_i32_149 : i32
    %c1_i32_150 = arith.constant 1 : i32
    %252 = arith.addi %251, %c1_i32_150 : i32
    %253 = arith.index_cast %252 : i32 to index
    %c5_151 = arith.constant 5 : index
    %254 = memref.load %arg1[%253, %c5_151] : memref<16x8xi32, #tpu.memory_space<smem>>
    %255 = arith.index_cast %254 : i32 to index
    %c0_152 = arith.constant 0 : index
    %256 = vector.load %arg2[%255, %c0_152] : memref<37x384xf32, #tpu.memory_space<vmem>>, vector<1x384xf32>
    %c8_i32_153 = arith.constant 8 : i32
    %257 = arith.muli %arg0, %c8_i32_153 : i32
    %c2_i32_154 = arith.constant 2 : i32
    %258 = arith.addi %257, %c2_i32_154 : i32
    %259 = arith.index_cast %258 : i32 to index
    %c5_155 = arith.constant 5 : index
    %260 = memref.load %arg1[%259, %c5_155] : memref<16x8xi32, #tpu.memory_space<smem>>
    %261 = arith.index_cast %260 : i32 to index
    %c0_156 = arith.constant 0 : index
    %262 = vector.load %arg2[%261, %c0_156] : memref<37x384xf32, #tpu.memory_space<vmem>>, vector<1x384xf32>
    %c8_i32_157 = arith.constant 8 : i32
    %263 = arith.muli %arg0, %c8_i32_157 : i32
    %c3_i32_158 = arith.constant 3 : i32
    %264 = arith.addi %263, %c3_i32_158 : i32
    %265 = arith.index_cast %264 : i32 to index
    %c5_159 = arith.constant 5 : index
    %266 = memref.load %arg1[%265, %c5_159] : memref<16x8xi32, #tpu.memory_space<smem>>
    %267 = arith.index_cast %266 : i32 to index
    %c0_160 = arith.constant 0 : index
    %268 = vector.load %arg2[%267, %c0_160] : memref<37x384xf32, #tpu.memory_space<vmem>>, vector<1x384xf32>
    %c8_i32_161 = arith.constant 8 : i32
    %269 = arith.muli %arg0, %c8_i32_161 : i32
    %c4_i32_162 = arith.constant 4 : i32
    %270 = arith.addi %269, %c4_i32_162 : i32
    %271 = arith.index_cast %270 : i32 to index
    %c5_163 = arith.constant 5 : index
    %272 = memref.load %arg1[%271, %c5_163] : memref<16x8xi32, #tpu.memory_space<smem>>
    %273 = arith.index_cast %272 : i32 to index
    %c0_164 = arith.constant 0 : index
    %274 = vector.load %arg2[%273, %c0_164] : memref<37x384xf32, #tpu.memory_space<vmem>>, vector<1x384xf32>
    %c8_i32_165 = arith.constant 8 : i32
    %275 = arith.muli %arg0, %c8_i32_165 : i32
    %c5_i32_166 = arith.constant 5 : i32
    %276 = arith.addi %275, %c5_i32_166 : i32
    %277 = arith.index_cast %276 : i32 to index
    %c5_167 = arith.constant 5 : index
    %278 = memref.load %arg1[%277, %c5_167] : memref<16x8xi32, #tpu.memory_space<smem>>
    %279 = arith.index_cast %278 : i32 to index
    %c0_168 = arith.constant 0 : index
    %280 = vector.load %arg2[%279, %c0_168] : memref<37x384xf32, #tpu.memory_space<vmem>>, vector<1x384xf32>
    %c8_i32_169 = arith.constant 8 : i32
    %281 = arith.muli %arg0, %c8_i32_169 : i32
    %c6_i32_170 = arith.constant 6 : i32
    %282 = arith.addi %281, %c6_i32_170 : i32
    %283 = arith.index_cast %282 : i32 to index
    %c5_171 = arith.constant 5 : index
    %284 = memref.load %arg1[%283, %c5_171] : memref<16x8xi32, #tpu.memory_space<smem>>
    %285 = arith.index_cast %284 : i32 to index
    %c0_172 = arith.constant 0 : index
    %286 = vector.load %arg2[%285, %c0_172] : memref<37x384xf32, #tpu.memory_space<vmem>>, vector<1x384xf32>
    %c8_i32_173 = arith.constant 8 : i32
    %287 = arith.muli %arg0, %c8_i32_173 : i32
    %c7_i32_174 = arith.constant 7 : i32
    %288 = arith.addi %287, %c7_i32_174 : i32
    %289 = arith.index_cast %288 : i32 to index
    %c5_175 = arith.constant 5 : index
    %290 = memref.load %arg1[%289, %c5_175] : memref<16x8xi32, #tpu.memory_space<smem>>
    %291 = arith.index_cast %290 : i32 to index
    %c0_176 = arith.constant 0 : index
    %292 = vector.load %arg2[%291, %c0_176] : memref<37x384xf32, #tpu.memory_space<vmem>>, vector<1x384xf32>
    %293 = tpu.concatenate %250, %256, %262, %268, %274, %280, %286, %292 in 0 : vector<1x384xf32>, vector<1x384xf32>, vector<1x384xf32>, vector<1x384xf32>, vector<1x384xf32>, vector<1x384xf32>, vector<1x384xf32>, vector<1x384xf32> -> vector<8x384xf32>
    %c8_i32_177 = arith.constant 8 : i32
    %294 = arith.muli %arg0, %c8_i32_177 : i32
    %c0_i32_178 = arith.constant 0 : i32
    %295 = arith.addi %294, %c0_i32_178 : i32
    %296 = arith.index_cast %295 : i32 to index
    %c6 = arith.constant 6 : index
    %297 = memref.load %arg1[%296, %c6] : memref<16x8xi32, #tpu.memory_space<smem>>
    %298 = arith.index_cast %297 : i32 to index
    %c0_179 = arith.constant 0 : index
    %299 = vector.load %arg2[%298, %c0_179] : memref<37x384xf32, #tpu.memory_space<vmem>>, vector<1x384xf32>
    %c8_i32_180 = arith.constant 8 : i32
    %300 = arith.muli %arg0, %c8_i32_180 : i32
    %c1_i32_181 = arith.constant 1 : i32
    %301 = arith.addi %300, %c1_i32_181 : i32
    %302 = arith.index_cast %301 : i32 to index
    %c6_182 = arith.constant 6 : index
    %303 = memref.load %arg1[%302, %c6_182] : memref<16x8xi32, #tpu.memory_space<smem>>
    %304 = arith.index_cast %303 : i32 to index
    %c0_183 = arith.constant 0 : index
    %305 = vector.load %arg2[%304, %c0_183] : memref<37x384xf32, #tpu.memory_space<vmem>>, vector<1x384xf32>
    %c8_i32_184 = arith.constant 8 : i32
    %306 = arith.muli %arg0, %c8_i32_184 : i32
    %c2_i32_185 = arith.constant 2 : i32
    %307 = arith.addi %306, %c2_i32_185 : i32
    %308 = arith.index_cast %307 : i32 to index
    %c6_186 = arith.constant 6 : index
    %309 = memref.load %arg1[%308, %c6_186] : memref<16x8xi32, #tpu.memory_space<smem>>
    %310 = arith.index_cast %309 : i32 to index
    %c0_187 = arith.constant 0 : index
    %311 = vector.load %arg2[%310, %c0_187] : memref<37x384xf32, #tpu.memory_space<vmem>>, vector<1x384xf32>
    %c8_i32_188 = arith.constant 8 : i32
    %312 = arith.muli %arg0, %c8_i32_188 : i32
    %c3_i32_189 = arith.constant 3 : i32
    %313 = arith.addi %312, %c3_i32_189 : i32
    %314 = arith.index_cast %313 : i32 to index
    %c6_190 = arith.constant 6 : index
    %315 = memref.load %arg1[%314, %c6_190] : memref<16x8xi32, #tpu.memory_space<smem>>
    %316 = arith.index_cast %315 : i32 to index
    %c0_191 = arith.constant 0 : index
    %317 = vector.load %arg2[%316, %c0_191] : memref<37x384xf32, #tpu.memory_space<vmem>>, vector<1x384xf32>
    %c8_i32_192 = arith.constant 8 : i32
    %318 = arith.muli %arg0, %c8_i32_192 : i32
    %c4_i32_193 = arith.constant 4 : i32
    %319 = arith.addi %318, %c4_i32_193 : i32
    %320 = arith.index_cast %319 : i32 to index
    %c6_194 = arith.constant 6 : index
    %321 = memref.load %arg1[%320, %c6_194] : memref<16x8xi32, #tpu.memory_space<smem>>
    %322 = arith.index_cast %321 : i32 to index
    %c0_195 = arith.constant 0 : index
    %323 = vector.load %arg2[%322, %c0_195] : memref<37x384xf32, #tpu.memory_space<vmem>>, vector<1x384xf32>
    %c8_i32_196 = arith.constant 8 : i32
    %324 = arith.muli %arg0, %c8_i32_196 : i32
    %c5_i32_197 = arith.constant 5 : i32
    %325 = arith.addi %324, %c5_i32_197 : i32
    %326 = arith.index_cast %325 : i32 to index
    %c6_198 = arith.constant 6 : index
    %327 = memref.load %arg1[%326, %c6_198] : memref<16x8xi32, #tpu.memory_space<smem>>
    %328 = arith.index_cast %327 : i32 to index
    %c0_199 = arith.constant 0 : index
    %329 = vector.load %arg2[%328, %c0_199] : memref<37x384xf32, #tpu.memory_space<vmem>>, vector<1x384xf32>
    %c8_i32_200 = arith.constant 8 : i32
    %330 = arith.muli %arg0, %c8_i32_200 : i32
    %c6_i32_201 = arith.constant 6 : i32
    %331 = arith.addi %330, %c6_i32_201 : i32
    %332 = arith.index_cast %331 : i32 to index
    %c6_202 = arith.constant 6 : index
    %333 = memref.load %arg1[%332, %c6_202] : memref<16x8xi32, #tpu.memory_space<smem>>
    %334 = arith.index_cast %333 : i32 to index
    %c0_203 = arith.constant 0 : index
    %335 = vector.load %arg2[%334, %c0_203] : memref<37x384xf32, #tpu.memory_space<vmem>>, vector<1x384xf32>
    %c8_i32_204 = arith.constant 8 : i32
    %336 = arith.muli %arg0, %c8_i32_204 : i32
    %c7_i32_205 = arith.constant 7 : i32
    %337 = arith.addi %336, %c7_i32_205 : i32
    %338 = arith.index_cast %337 : i32 to index
    %c6_206 = arith.constant 6 : index
    %339 = memref.load %arg1[%338, %c6_206] : memref<16x8xi32, #tpu.memory_space<smem>>
    %340 = arith.index_cast %339 : i32 to index
    %c0_207 = arith.constant 0 : index
    %341 = vector.load %arg2[%340, %c0_207] : memref<37x384xf32, #tpu.memory_space<vmem>>, vector<1x384xf32>
    %342 = tpu.concatenate %299, %305, %311, %317, %323, %329, %335, %341 in 0 : vector<1x384xf32>, vector<1x384xf32>, vector<1x384xf32>, vector<1x384xf32>, vector<1x384xf32>, vector<1x384xf32>, vector<1x384xf32>, vector<1x384xf32> -> vector<8x384xf32>
    %c8_i32_208 = arith.constant 8 : i32
    %343 = arith.muli %arg0, %c8_i32_208 : i32
    %c0_i32_209 = arith.constant 0 : i32
    %344 = arith.addi %343, %c0_i32_209 : i32
    %345 = arith.index_cast %344 : i32 to index
    %c7 = arith.constant 7 : index
    %346 = memref.load %arg1[%345, %c7] : memref<16x8xi32, #tpu.memory_space<smem>>
    %347 = arith.index_cast %346 : i32 to index
    %c0_210 = arith.constant 0 : index
    %348 = vector.load %arg2[%347, %c0_210] : memref<37x384xf32, #tpu.memory_space<vmem>>, vector<1x384xf32>
    %c8_i32_211 = arith.constant 8 : i32
    %349 = arith.muli %arg0, %c8_i32_211 : i32
    %c1_i32_212 = arith.constant 1 : i32
    %350 = arith.addi %349, %c1_i32_212 : i32
    %351 = arith.index_cast %350 : i32 to index
    %c7_213 = arith.constant 7 : index
    %352 = memref.load %arg1[%351, %c7_213] : memref<16x8xi32, #tpu.memory_space<smem>>
    %353 = arith.index_cast %352 : i32 to index
    %c0_214 = arith.constant 0 : index
    %354 = vector.load %arg2[%353, %c0_214] : memref<37x384xf32, #tpu.memory_space<vmem>>, vector<1x384xf32>
    %c8_i32_215 = arith.constant 8 : i32
    %355 = arith.muli %arg0, %c8_i32_215 : i32
    %c2_i32_216 = arith.constant 2 : i32
    %356 = arith.addi %355, %c2_i32_216 : i32
    %357 = arith.index_cast %356 : i32 to index
    %c7_217 = arith.constant 7 : index
    %358 = memref.load %arg1[%357, %c7_217] : memref<16x8xi32, #tpu.memory_space<smem>>
    %359 = arith.index_cast %358 : i32 to index
    %c0_218 = arith.constant 0 : index
    %360 = vector.load %arg2[%359, %c0_218] : memref<37x384xf32, #tpu.memory_space<vmem>>, vector<1x384xf32>
    %c8_i32_219 = arith.constant 8 : i32
    %361 = arith.muli %arg0, %c8_i32_219 : i32
    %c3_i32_220 = arith.constant 3 : i32
    %362 = arith.addi %361, %c3_i32_220 : i32
    %363 = arith.index_cast %362 : i32 to index
    %c7_221 = arith.constant 7 : index
    %364 = memref.load %arg1[%363, %c7_221] : memref<16x8xi32, #tpu.memory_space<smem>>
    %365 = arith.index_cast %364 : i32 to index
    %c0_222 = arith.constant 0 : index
    %366 = vector.load %arg2[%365, %c0_222] : memref<37x384xf32, #tpu.memory_space<vmem>>, vector<1x384xf32>
    %c8_i32_223 = arith.constant 8 : i32
    %367 = arith.muli %arg0, %c8_i32_223 : i32
    %c4_i32_224 = arith.constant 4 : i32
    %368 = arith.addi %367, %c4_i32_224 : i32
    %369 = arith.index_cast %368 : i32 to index
    %c7_225 = arith.constant 7 : index
    %370 = memref.load %arg1[%369, %c7_225] : memref<16x8xi32, #tpu.memory_space<smem>>
    %371 = arith.index_cast %370 : i32 to index
    %c0_226 = arith.constant 0 : index
    %372 = vector.load %arg2[%371, %c0_226] : memref<37x384xf32, #tpu.memory_space<vmem>>, vector<1x384xf32>
    %c8_i32_227 = arith.constant 8 : i32
    %373 = arith.muli %arg0, %c8_i32_227 : i32
    %c5_i32_228 = arith.constant 5 : i32
    %374 = arith.addi %373, %c5_i32_228 : i32
    %375 = arith.index_cast %374 : i32 to index
    %c7_229 = arith.constant 7 : index
    %376 = memref.load %arg1[%375, %c7_229] : memref<16x8xi32, #tpu.memory_space<smem>>
    %377 = arith.index_cast %376 : i32 to index
    %c0_230 = arith.constant 0 : index
    %378 = vector.load %arg2[%377, %c0_230] : memref<37x384xf32, #tpu.memory_space<vmem>>, vector<1x384xf32>
    %c8_i32_231 = arith.constant 8 : i32
    %379 = arith.muli %arg0, %c8_i32_231 : i32
    %c6_i32_232 = arith.constant 6 : i32
    %380 = arith.addi %379, %c6_i32_232 : i32
    %381 = arith.index_cast %380 : i32 to index
    %c7_233 = arith.constant 7 : index
    %382 = memref.load %arg1[%381, %c7_233] : memref<16x8xi32, #tpu.memory_space<smem>>
    %383 = arith.index_cast %382 : i32 to index
    %c0_234 = arith.constant 0 : index
    %384 = vector.load %arg2[%383, %c0_234] : memref<37x384xf32, #tpu.memory_space<vmem>>, vector<1x384xf32>
    %c8_i32_235 = arith.constant 8 : i32
    %385 = arith.muli %arg0, %c8_i32_235 : i32
    %c7_i32_236 = arith.constant 7 : i32
    %386 = arith.addi %385, %c7_i32_236 : i32
    %387 = arith.index_cast %386 : i32 to index
    %c7_237 = arith.constant 7 : index
    %388 = memref.load %arg1[%387, %c7_237] : memref<16x8xi32, #tpu.memory_space<smem>>
    %389 = arith.index_cast %388 : i32 to index
    %c0_238 = arith.constant 0 : index
    %390 = vector.load %arg2[%389, %c0_238] : memref<37x384xf32, #tpu.memory_space<vmem>>, vector<1x384xf32>
    %391 = tpu.concatenate %348, %354, %360, %366, %372, %378, %384, %390 in 0 : vector<1x384xf32>, vector<1x384xf32>, vector<1x384xf32>, vector<1x384xf32>, vector<1x384xf32>, vector<1x384xf32>, vector<1x384xf32>, vector<1x384xf32> -> vector<8x384xf32>
    %c0_239 = arith.constant 0 : index
    %c0_240 = arith.constant 0 : index
    %392 = vector.load %arg3[%c0_239, %c0_240] : memref<128x384xbf16, #tpu.memory_space<vmem>>, vector<128x384xbf16>
    %c0_241 = arith.constant 0 : index
    %c0_242 = arith.constant 0 : index
    %393 = vector.load %arg4[%c0_241, %c0_242] : memref<1x128xf32, #tpu.memory_space<vmem>>, vector<1x128xf32>
    %c0_243 = arith.constant 0 : index
    %c0_244 = arith.constant 0 : index
    %394 = vector.load %arg7[%c0_243, %c0_244] : memref<8x128xf32, #tpu.memory_space<vmem>>, vector<8x128xf32>
    %395 = arith.truncf %394 : vector<8x128xf32> to vector<8x128xbf16>
    %cst = arith.constant dense<0.000000e+00> : vector<8x384xf32>
    %396 = tpu.matmul %395, %392, %cst {dimension_numbers = #tpu.dot_dimension_numbers<[1], [0], [0], [1], [0, 0, 1, 1], [], []>} : vector<8x128xbf16>, vector<128x384xbf16>, vector<8x384xf32> -> vector<8x384xf32>
    %397 = vector.extract_strided_slice %48 {offsets = [0, 0], sizes = [8, 256], strides = [1, 1]} : vector<8x384xf32> to vector<8x256xf32>
    %398 = vector.extract_strided_slice %396 {offsets = [0, 0], sizes = [8, 256], strides = [1, 1]} : vector<8x384xf32> to vector<8x256xf32>
    %399 = arith.addf %397, %398 : vector<8x256xf32>
    %400 = arith.negf %399 : vector<8x256xf32>
    %401 = math.exp %400 : vector<8x256xf32>
    %cst_245 = arith.constant 1.000000e+00 : f32
    %402 = vector.broadcast %cst_245 : f32 to vector<8x256xf32>
    %403 = arith.addf %402, %401 : vector<8x256xf32>
    %404 = arith.divf %402, %403 : vector<8x256xf32>
    %405 = vector.extract_strided_slice %404 {offsets = [0, 0], sizes = [8, 128], strides = [1, 1]} : vector<8x256xf32> to vector<8x128xf32>
    %406 = vector.extract_strided_slice %404 {offsets = [0, 128], sizes = [8, 128], strides = [1, 1]} : vector<8x256xf32> to vector<8x128xf32>
    %407 = vector.extract_strided_slice %48 {offsets = [0, 256], sizes = [8, 128], strides = [1, 1]} : vector<8x384xf32> to vector<8x128xf32>
    %408 = vector.extract_strided_slice %396 {offsets = [0, 256], sizes = [8, 128], strides = [1, 1]} : vector<8x384xf32> to vector<8x128xf32>
    %409 = vector.broadcast %393 : vector<1x128xf32> to vector<8x128xf32>
    %410 = arith.addf %408, %409 : vector<8x128xf32>
    %411 = arith.mulf %405, %410 : vector<8x128xf32>
    %412 = arith.addf %407, %411 : vector<8x128xf32>
    %413 = math.tanh %412 : vector<8x128xf32>
    %cst_246 = arith.constant 1.000000e+00 : f32
    %414 = vector.broadcast %cst_246 : f32 to vector<8x128xf32>
    %415 = arith.subf %414, %406 : vector<8x128xf32>
    %416 = arith.mulf %415, %413 : vector<8x128xf32>
    %417 = arith.mulf %406, %394 : vector<8x128xf32>
    %418 = arith.addf %416, %417 : vector<8x128xf32>
    %419 = arith.truncf %418 : vector<8x128xf32> to vector<8x128xbf16>
    %cst_247 = arith.constant dense<0.000000e+00> : vector<8x384xf32>
    %420 = tpu.matmul %419, %392, %cst_247 {dimension_numbers = #tpu.dot_dimension_numbers<[1], [0], [0], [1], [0, 0, 1, 1], [], []>} : vector<8x128xbf16>, vector<128x384xbf16>, vector<8x384xf32> -> vector<8x384xf32>
    %421 = vector.extract_strided_slice %97 {offsets = [0, 0], sizes = [8, 256], strides = [1, 1]} : vector<8x384xf32> to vector<8x256xf32>
    %422 = vector.extract_strided_slice %420 {offsets = [0, 0], sizes = [8, 256], strides = [1, 1]} : vector<8x384xf32> to vector<8x256xf32>
    %423 = arith.addf %421, %422 : vector<8x256xf32>
    %424 = arith.negf %423 : vector<8x256xf32>
    %425 = math.exp %424 : vector<8x256xf32>
    %cst_248 = arith.constant 1.000000e+00 : f32
    %426 = vector.broadcast %cst_248 : f32 to vector<8x256xf32>
    %427 = arith.addf %426, %425 : vector<8x256xf32>
    %428 = arith.divf %426, %427 : vector<8x256xf32>
    %429 = vector.extract_strided_slice %428 {offsets = [0, 0], sizes = [8, 128], strides = [1, 1]} : vector<8x256xf32> to vector<8x128xf32>
    %430 = vector.extract_strided_slice %428 {offsets = [0, 128], sizes = [8, 128], strides = [1, 1]} : vector<8x256xf32> to vector<8x128xf32>
    %431 = vector.extract_strided_slice %97 {offsets = [0, 256], sizes = [8, 128], strides = [1, 1]} : vector<8x384xf32> to vector<8x128xf32>
    %432 = vector.extract_strided_slice %420 {offsets = [0, 256], sizes = [8, 128], strides = [1, 1]} : vector<8x384xf32> to vector<8x128xf32>
    %433 = vector.broadcast %393 : vector<1x128xf32> to vector<8x128xf32>
    %434 = arith.addf %432, %433 : vector<8x128xf32>
    %435 = arith.mulf %429, %434 : vector<8x128xf32>
    %436 = arith.addf %431, %435 : vector<8x128xf32>
    %437 = math.tanh %436 : vector<8x128xf32>
    %cst_249 = arith.constant 1.000000e+00 : f32
    %438 = vector.broadcast %cst_249 : f32 to vector<8x128xf32>
    %439 = arith.subf %438, %430 : vector<8x128xf32>
    %440 = arith.mulf %439, %437 : vector<8x128xf32>
    %441 = arith.mulf %430, %418 : vector<8x128xf32>
    %442 = arith.addf %440, %441 : vector<8x128xf32>
    %443 = arith.truncf %442 : vector<8x128xf32> to vector<8x128xbf16>
    %cst_250 = arith.constant dense<0.000000e+00> : vector<8x384xf32>
    %444 = tpu.matmul %443, %392, %cst_250 {dimension_numbers = #tpu.dot_dimension_numbers<[1], [0], [0], [1], [0, 0, 1, 1], [], []>} : vector<8x128xbf16>, vector<128x384xbf16>, vector<8x384xf32> -> vector<8x384xf32>
    %445 = vector.extract_strided_slice %146 {offsets = [0, 0], sizes = [8, 256], strides = [1, 1]} : vector<8x384xf32> to vector<8x256xf32>
    %446 = vector.extract_strided_slice %444 {offsets = [0, 0], sizes = [8, 256], strides = [1, 1]} : vector<8x384xf32> to vector<8x256xf32>
    %447 = arith.addf %445, %446 : vector<8x256xf32>
    %448 = arith.negf %447 : vector<8x256xf32>
    %449 = math.exp %448 : vector<8x256xf32>
    %cst_251 = arith.constant 1.000000e+00 : f32
    %450 = vector.broadcast %cst_251 : f32 to vector<8x256xf32>
    %451 = arith.addf %450, %449 : vector<8x256xf32>
    %452 = arith.divf %450, %451 : vector<8x256xf32>
    %453 = vector.extract_strided_slice %452 {offsets = [0, 0], sizes = [8, 128], strides = [1, 1]} : vector<8x256xf32> to vector<8x128xf32>
    %454 = vector.extract_strided_slice %452 {offsets = [0, 128], sizes = [8, 128], strides = [1, 1]} : vector<8x256xf32> to vector<8x128xf32>
    %455 = vector.extract_strided_slice %146 {offsets = [0, 256], sizes = [8, 128], strides = [1, 1]} : vector<8x384xf32> to vector<8x128xf32>
    %456 = vector.extract_strided_slice %444 {offsets = [0, 256], sizes = [8, 128], strides = [1, 1]} : vector<8x384xf32> to vector<8x128xf32>
    %457 = vector.broadcast %393 : vector<1x128xf32> to vector<8x128xf32>
    %458 = arith.addf %456, %457 : vector<8x128xf32>
    %459 = arith.mulf %453, %458 : vector<8x128xf32>
    %460 = arith.addf %455, %459 : vector<8x128xf32>
    %461 = math.tanh %460 : vector<8x128xf32>
    %cst_252 = arith.constant 1.000000e+00 : f32
    %462 = vector.broadcast %cst_252 : f32 to vector<8x128xf32>
    %463 = arith.subf %462, %454 : vector<8x128xf32>
    %464 = arith.mulf %463, %461 : vector<8x128xf32>
    %465 = arith.mulf %454, %442 : vector<8x128xf32>
    %466 = arith.addf %464, %465 : vector<8x128xf32>
    %467 = arith.truncf %466 : vector<8x128xf32> to vector<8x128xbf16>
    %cst_253 = arith.constant dense<0.000000e+00> : vector<8x384xf32>
    %468 = tpu.matmul %467, %392, %cst_253 {dimension_numbers = #tpu.dot_dimension_numbers<[1], [0], [0], [1], [0, 0, 1, 1], [], []>} : vector<8x128xbf16>, vector<128x384xbf16>, vector<8x384xf32> -> vector<8x384xf32>
    %469 = vector.extract_strided_slice %195 {offsets = [0, 0], sizes = [8, 256], strides = [1, 1]} : vector<8x384xf32> to vector<8x256xf32>
    %470 = vector.extract_strided_slice %468 {offsets = [0, 0], sizes = [8, 256], strides = [1, 1]} : vector<8x384xf32> to vector<8x256xf32>
    %471 = arith.addf %469, %470 : vector<8x256xf32>
    %472 = arith.negf %471 : vector<8x256xf32>
    %473 = math.exp %472 : vector<8x256xf32>
    %cst_254 = arith.constant 1.000000e+00 : f32
    %474 = vector.broadcast %cst_254 : f32 to vector<8x256xf32>
    %475 = arith.addf %474, %473 : vector<8x256xf32>
    %476 = arith.divf %474, %475 : vector<8x256xf32>
    %477 = vector.extract_strided_slice %476 {offsets = [0, 0], sizes = [8, 128], strides = [1, 1]} : vector<8x256xf32> to vector<8x128xf32>
    %478 = vector.extract_strided_slice %476 {offsets = [0, 128], sizes = [8, 128], strides = [1, 1]} : vector<8x256xf32> to vector<8x128xf32>
    %479 = vector.extract_strided_slice %195 {offsets = [0, 256], sizes = [8, 128], strides = [1, 1]} : vector<8x384xf32> to vector<8x128xf32>
    %480 = vector.extract_strided_slice %468 {offsets = [0, 256], sizes = [8, 128], strides = [1, 1]} : vector<8x384xf32> to vector<8x128xf32>
    %481 = vector.broadcast %393 : vector<1x128xf32> to vector<8x128xf32>
    %482 = arith.addf %480, %481 : vector<8x128xf32>
    %483 = arith.mulf %477, %482 : vector<8x128xf32>
    %484 = arith.addf %479, %483 : vector<8x128xf32>
    %485 = math.tanh %484 : vector<8x128xf32>
    %cst_255 = arith.constant 1.000000e+00 : f32
    %486 = vector.broadcast %cst_255 : f32 to vector<8x128xf32>
    %487 = arith.subf %486, %478 : vector<8x128xf32>
    %488 = arith.mulf %487, %485 : vector<8x128xf32>
    %489 = arith.mulf %478, %466 : vector<8x128xf32>
    %490 = arith.addf %488, %489 : vector<8x128xf32>
    %491 = arith.truncf %490 : vector<8x128xf32> to vector<8x128xbf16>
    %cst_256 = arith.constant dense<0.000000e+00> : vector<8x384xf32>
    %492 = tpu.matmul %491, %392, %cst_256 {dimension_numbers = #tpu.dot_dimension_numbers<[1], [0], [0], [1], [0, 0, 1, 1], [], []>} : vector<8x128xbf16>, vector<128x384xbf16>, vector<8x384xf32> -> vector<8x384xf32>
    %493 = vector.extract_strided_slice %244 {offsets = [0, 0], sizes = [8, 256], strides = [1, 1]} : vector<8x384xf32> to vector<8x256xf32>
    %494 = vector.extract_strided_slice %492 {offsets = [0, 0], sizes = [8, 256], strides = [1, 1]} : vector<8x384xf32> to vector<8x256xf32>
    %495 = arith.addf %493, %494 : vector<8x256xf32>
    %496 = arith.negf %495 : vector<8x256xf32>
    %497 = math.exp %496 : vector<8x256xf32>
    %cst_257 = arith.constant 1.000000e+00 : f32
    %498 = vector.broadcast %cst_257 : f32 to vector<8x256xf32>
    %499 = arith.addf %498, %497 : vector<8x256xf32>
    %500 = arith.divf %498, %499 : vector<8x256xf32>
    %501 = vector.extract_strided_slice %500 {offsets = [0, 0], sizes = [8, 128], strides = [1, 1]} : vector<8x256xf32> to vector<8x128xf32>
    %502 = vector.extract_strided_slice %500 {offsets = [0, 128], sizes = [8, 128], strides = [1, 1]} : vector<8x256xf32> to vector<8x128xf32>
    %503 = vector.extract_strided_slice %244 {offsets = [0, 256], sizes = [8, 128], strides = [1, 1]} : vector<8x384xf32> to vector<8x128xf32>
    %504 = vector.extract_strided_slice %492 {offsets = [0, 256], sizes = [8, 128], strides = [1, 1]} : vector<8x384xf32> to vector<8x128xf32>
    %505 = vector.broadcast %393 : vector<1x128xf32> to vector<8x128xf32>
    %506 = arith.addf %504, %505 : vector<8x128xf32>
    %507 = arith.mulf %501, %506 : vector<8x128xf32>
    %508 = arith.addf %503, %507 : vector<8x128xf32>
    %509 = math.tanh %508 : vector<8x128xf32>
    %cst_258 = arith.constant 1.000000e+00 : f32
    %510 = vector.broadcast %cst_258 : f32 to vector<8x128xf32>
    %511 = arith.subf %510, %502 : vector<8x128xf32>
    %512 = arith.mulf %511, %509 : vector<8x128xf32>
    %513 = arith.mulf %502, %490 : vector<8x128xf32>
    %514 = arith.addf %512, %513 : vector<8x128xf32>
    %515 = arith.truncf %514 : vector<8x128xf32> to vector<8x128xbf16>
    %cst_259 = arith.constant dense<0.000000e+00> : vector<8x384xf32>
    %516 = tpu.matmul %515, %392, %cst_259 {dimension_numbers = #tpu.dot_dimension_numbers<[1], [0], [0], [1], [0, 0, 1, 1], [], []>} : vector<8x128xbf16>, vector<128x384xbf16>, vector<8x384xf32> -> vector<8x384xf32>
    %517 = vector.extract_strided_slice %293 {offsets = [0, 0], sizes = [8, 256], strides = [1, 1]} : vector<8x384xf32> to vector<8x256xf32>
    %518 = vector.extract_strided_slice %516 {offsets = [0, 0], sizes = [8, 256], strides = [1, 1]} : vector<8x384xf32> to vector<8x256xf32>
    %519 = arith.addf %517, %518 : vector<8x256xf32>
    %520 = arith.negf %519 : vector<8x256xf32>
    %521 = math.exp %520 : vector<8x256xf32>
    %cst_260 = arith.constant 1.000000e+00 : f32
    %522 = vector.broadcast %cst_260 : f32 to vector<8x256xf32>
    %523 = arith.addf %522, %521 : vector<8x256xf32>
    %524 = arith.divf %522, %523 : vector<8x256xf32>
    %525 = vector.extract_strided_slice %524 {offsets = [0, 0], sizes = [8, 128], strides = [1, 1]} : vector<8x256xf32> to vector<8x128xf32>
    %526 = vector.extract_strided_slice %524 {offsets = [0, 128], sizes = [8, 128], strides = [1, 1]} : vector<8x256xf32> to vector<8x128xf32>
    %527 = vector.extract_strided_slice %293 {offsets = [0, 256], sizes = [8, 128], strides = [1, 1]} : vector<8x384xf32> to vector<8x128xf32>
    %528 = vector.extract_strided_slice %516 {offsets = [0, 256], sizes = [8, 128], strides = [1, 1]} : vector<8x384xf32> to vector<8x128xf32>
    %529 = vector.broadcast %393 : vector<1x128xf32> to vector<8x128xf32>
    %530 = arith.addf %528, %529 : vector<8x128xf32>
    %531 = arith.mulf %525, %530 : vector<8x128xf32>
    %532 = arith.addf %527, %531 : vector<8x128xf32>
    %533 = math.tanh %532 : vector<8x128xf32>
    %cst_261 = arith.constant 1.000000e+00 : f32
    %534 = vector.broadcast %cst_261 : f32 to vector<8x128xf32>
    %535 = arith.subf %534, %526 : vector<8x128xf32>
    %536 = arith.mulf %535, %533 : vector<8x128xf32>
    %537 = arith.mulf %526, %514 : vector<8x128xf32>
    %538 = arith.addf %536, %537 : vector<8x128xf32>
    %539 = arith.truncf %538 : vector<8x128xf32> to vector<8x128xbf16>
    %cst_262 = arith.constant dense<0.000000e+00> : vector<8x384xf32>
    %540 = tpu.matmul %539, %392, %cst_262 {dimension_numbers = #tpu.dot_dimension_numbers<[1], [0], [0], [1], [0, 0, 1, 1], [], []>} : vector<8x128xbf16>, vector<128x384xbf16>, vector<8x384xf32> -> vector<8x384xf32>
    %541 = vector.extract_strided_slice %342 {offsets = [0, 0], sizes = [8, 256], strides = [1, 1]} : vector<8x384xf32> to vector<8x256xf32>
    %542 = vector.extract_strided_slice %540 {offsets = [0, 0], sizes = [8, 256], strides = [1, 1]} : vector<8x384xf32> to vector<8x256xf32>
    %543 = arith.addf %541, %542 : vector<8x256xf32>
    %544 = arith.negf %543 : vector<8x256xf32>
    %545 = math.exp %544 : vector<8x256xf32>
    %cst_263 = arith.constant 1.000000e+00 : f32
    %546 = vector.broadcast %cst_263 : f32 to vector<8x256xf32>
    %547 = arith.addf %546, %545 : vector<8x256xf32>
    %548 = arith.divf %546, %547 : vector<8x256xf32>
    %549 = vector.extract_strided_slice %548 {offsets = [0, 0], sizes = [8, 128], strides = [1, 1]} : vector<8x256xf32> to vector<8x128xf32>
    %550 = vector.extract_strided_slice %548 {offsets = [0, 128], sizes = [8, 128], strides = [1, 1]} : vector<8x256xf32> to vector<8x128xf32>
    %551 = vector.extract_strided_slice %342 {offsets = [0, 256], sizes = [8, 128], strides = [1, 1]} : vector<8x384xf32> to vector<8x128xf32>
    %552 = vector.extract_strided_slice %540 {offsets = [0, 256], sizes = [8, 128], strides = [1, 1]} : vector<8x384xf32> to vector<8x128xf32>
    %553 = vector.broadcast %393 : vector<1x128xf32> to vector<8x128xf32>
    %554 = arith.addf %552, %553 : vector<8x128xf32>
    %555 = arith.mulf %549, %554 : vector<8x128xf32>
    %556 = arith.addf %551, %555 : vector<8x128xf32>
    %557 = math.tanh %556 : vector<8x128xf32>
    %cst_264 = arith.constant 1.000000e+00 : f32
    %558 = vector.broadcast %cst_264 : f32 to vector<8x128xf32>
    %559 = arith.subf %558, %550 : vector<8x128xf32>
    %560 = arith.mulf %559, %557 : vector<8x128xf32>
    %561 = arith.mulf %550, %538 : vector<8x128xf32>
    %562 = arith.addf %560, %561 : vector<8x128xf32>
    %563 = arith.truncf %562 : vector<8x128xf32> to vector<8x128xbf16>
    %cst_265 = arith.constant dense<0.000000e+00> : vector<8x384xf32>
    %564 = tpu.matmul %563, %392, %cst_265 {dimension_numbers = #tpu.dot_dimension_numbers<[1], [0], [0], [1], [0, 0, 1, 1], [], []>} : vector<8x128xbf16>, vector<128x384xbf16>, vector<8x384xf32> -> vector<8x384xf32>
    %565 = vector.extract_strided_slice %391 {offsets = [0, 0], sizes = [8, 256], strides = [1, 1]} : vector<8x384xf32> to vector<8x256xf32>
    %566 = vector.extract_strided_slice %564 {offsets = [0, 0], sizes = [8, 256], strides = [1, 1]} : vector<8x384xf32> to vector<8x256xf32>
    %567 = arith.addf %565, %566 : vector<8x256xf32>
    %568 = arith.negf %567 : vector<8x256xf32>
    %569 = math.exp %568 : vector<8x256xf32>
    %cst_266 = arith.constant 1.000000e+00 : f32
    %570 = vector.broadcast %cst_266 : f32 to vector<8x256xf32>
    %571 = arith.addf %570, %569 : vector<8x256xf32>
    %572 = arith.divf %570, %571 : vector<8x256xf32>
    %573 = vector.extract_strided_slice %572 {offsets = [0, 0], sizes = [8, 128], strides = [1, 1]} : vector<8x256xf32> to vector<8x128xf32>
    %574 = vector.extract_strided_slice %572 {offsets = [0, 128], sizes = [8, 128], strides = [1, 1]} : vector<8x256xf32> to vector<8x128xf32>
    %575 = vector.extract_strided_slice %391 {offsets = [0, 256], sizes = [8, 128], strides = [1, 1]} : vector<8x384xf32> to vector<8x128xf32>
    %576 = vector.extract_strided_slice %564 {offsets = [0, 256], sizes = [8, 128], strides = [1, 1]} : vector<8x384xf32> to vector<8x128xf32>
    %577 = vector.broadcast %393 : vector<1x128xf32> to vector<8x128xf32>
    %578 = arith.addf %576, %577 : vector<8x128xf32>
    %579 = arith.mulf %573, %578 : vector<8x128xf32>
    %580 = arith.addf %575, %579 : vector<8x128xf32>
    %581 = math.tanh %580 : vector<8x128xf32>
    %cst_267 = arith.constant 1.000000e+00 : f32
    %582 = vector.broadcast %cst_267 : f32 to vector<8x128xf32>
    %583 = arith.subf %582, %574 : vector<8x128xf32>
    %584 = arith.mulf %583, %581 : vector<8x128xf32>
    %585 = arith.mulf %574, %562 : vector<8x128xf32>
    %586 = arith.addf %584, %585 : vector<8x128xf32>
    %587 = tpu.concatenate %418, %442, %466, %490, %514, %538, %562, %586 in 0 : vector<8x128xf32>, vector<8x128xf32>, vector<8x128xf32>, vector<8x128xf32>, vector<8x128xf32>, vector<8x128xf32>, vector<8x128xf32>, vector<8x128xf32> -> vector<64x128xf32>
    %c0_268 = arith.constant 0 : index
    %c0_269 = arith.constant 0 : index
    %588 = vector.load %arg5[%c0_268, %c0_269] : memref<128x128xbf16, #tpu.memory_space<vmem>>, vector<128x128xbf16>
    %589 = arith.truncf %587 : vector<64x128xf32> to vector<64x128xbf16>
    %cst_270 = arith.constant dense<0.000000e+00> : vector<64x128xf32>
    %590 = tpu.matmul %589, %588, %cst_270 {dimension_numbers = #tpu.dot_dimension_numbers<[1], [0], [0], [1], [0, 0, 1, 1], [], []>} : vector<64x128xbf16>, vector<128x128xbf16>, vector<64x128xf32> -> vector<64x128xf32>
    %c0_271 = arith.constant 0 : index
    %c0_272 = arith.constant 0 : index
    %591 = vector.load %arg6[%c0_271, %c0_272] : memref<1x128xf32, #tpu.memory_space<vmem>>, vector<1x128xf32>
    %592 = vector.broadcast %591 : vector<1x128xf32> to vector<64x128xf32>
    %593 = arith.addf %590, %592 : vector<64x128xf32>
    %594 = vector.extract_strided_slice %593 {offsets = [0, 0], sizes = [8, 128], strides = [1, 1]} : vector<64x128xf32> to vector<8x128xf32>
    %c0_273 = arith.constant 0 : index
    %c0_274 = arith.constant 0 : index
    %c0_275 = arith.constant 0 : index
    %595 = vector.load %arg8[%c0_273, %c0_274, %c0_275] : memref<8x8x128xf32, #tpu.memory_space<vmem>>, vector<1x8x128xf32>
    %596 = vector.shape_cast %595 : vector<1x8x128xf32> to vector<8x128xf32>
    %597 = vector.shape_cast %594 : vector<8x128xf32> to vector<1x8x128xf32>
    tpu.vector_store %arg8[%c0_273, %c0_274, %c0_275], %597 {strides = array<i32>} : memref<8x8x128xf32, #tpu.memory_space<vmem>>, vector<1x8x128xf32>,
    %598 = vector.extract_strided_slice %593 {offsets = [8, 0], sizes = [8, 128], strides = [1, 1]} : vector<64x128xf32> to vector<8x128xf32>
    %c1_276 = arith.constant 1 : index
    %c0_277 = arith.constant 0 : index
    %c0_278 = arith.constant 0 : index
    %599 = vector.load %arg8[%c1_276, %c0_277, %c0_278] : memref<8x8x128xf32, #tpu.memory_space<vmem>>, vector<1x8x128xf32>
    %600 = vector.shape_cast %599 : vector<1x8x128xf32> to vector<8x128xf32>
    %601 = vector.shape_cast %598 : vector<8x128xf32> to vector<1x8x128xf32>
    tpu.vector_store %arg8[%c1_276, %c0_277, %c0_278], %601 {strides = array<i32>} : memref<8x8x128xf32, #tpu.memory_space<vmem>>, vector<1x8x128xf32>,
    %602 = vector.extract_strided_slice %593 {offsets = [16, 0], sizes = [8, 128], strides = [1, 1]} : vector<64x128xf32> to vector<8x128xf32>
    %c2_279 = arith.constant 2 : index
    %c0_280 = arith.constant 0 : index
    %c0_281 = arith.constant 0 : index
    %603 = vector.load %arg8[%c2_279, %c0_280, %c0_281] : memref<8x8x128xf32, #tpu.memory_space<vmem>>, vector<1x8x128xf32>
    %604 = vector.shape_cast %603 : vector<1x8x128xf32> to vector<8x128xf32>
    %605 = vector.shape_cast %602 : vector<8x128xf32> to vector<1x8x128xf32>
    tpu.vector_store %arg8[%c2_279, %c0_280, %c0_281], %605 {strides = array<i32>} : memref<8x8x128xf32, #tpu.memory_space<vmem>>, vector<1x8x128xf32>,
    %606 = vector.extract_strided_slice %593 {offsets = [24, 0], sizes = [8, 128], strides = [1, 1]} : vector<64x128xf32> to vector<8x128xf32>
    %c3_282 = arith.constant 3 : index
    %c0_283 = arith.constant 0 : index
    %c0_284 = arith.constant 0 : index
    %607 = vector.load %arg8[%c3_282, %c0_283, %c0_284] : memref<8x8x128xf32, #tpu.memory_space<vmem>>, vector<1x8x128xf32>
    %608 = vector.shape_cast %607 : vector<1x8x128xf32> to vector<8x128xf32>
    %609 = vector.shape_cast %606 : vector<8x128xf32> to vector<1x8x128xf32>
    tpu.vector_store %arg8[%c3_282, %c0_283, %c0_284], %609 {strides = array<i32>} : memref<8x8x128xf32, #tpu.memory_space<vmem>>, vector<1x8x128xf32>,
    %610 = vector.extract_strided_slice %593 {offsets = [32, 0], sizes = [8, 128], strides = [1, 1]} : vector<64x128xf32> to vector<8x128xf32>
    %c4_285 = arith.constant 4 : index
    %c0_286 = arith.constant 0 : index
    %c0_287 = arith.constant 0 : index
    %611 = vector.load %arg8[%c4_285, %c0_286, %c0_287] : memref<8x8x128xf32, #tpu.memory_space<vmem>>, vector<1x8x128xf32>
    %612 = vector.shape_cast %611 : vector<1x8x128xf32> to vector<8x128xf32>
    %613 = vector.shape_cast %610 : vector<8x128xf32> to vector<1x8x128xf32>
    tpu.vector_store %arg8[%c4_285, %c0_286, %c0_287], %613 {strides = array<i32>} : memref<8x8x128xf32, #tpu.memory_space<vmem>>, vector<1x8x128xf32>,
    %614 = vector.extract_strided_slice %593 {offsets = [40, 0], sizes = [8, 128], strides = [1, 1]} : vector<64x128xf32> to vector<8x128xf32>
    %c5_288 = arith.constant 5 : index
    %c0_289 = arith.constant 0 : index
    %c0_290 = arith.constant 0 : index
    %615 = vector.load %arg8[%c5_288, %c0_289, %c0_290] : memref<8x8x128xf32, #tpu.memory_space<vmem>>, vector<1x8x128xf32>
    %616 = vector.shape_cast %615 : vector<1x8x128xf32> to vector<8x128xf32>
    %617 = vector.shape_cast %614 : vector<8x128xf32> to vector<1x8x128xf32>
    tpu.vector_store %arg8[%c5_288, %c0_289, %c0_290], %617 {strides = array<i32>} : memref<8x8x128xf32, #tpu.memory_space<vmem>>, vector<1x8x128xf32>,
    %618 = vector.extract_strided_slice %593 {offsets = [48, 0], sizes = [8, 128], strides = [1, 1]} : vector<64x128xf32> to vector<8x128xf32>
    %c6_291 = arith.constant 6 : index
    %c0_292 = arith.constant 0 : index
    %c0_293 = arith.constant 0 : index
    %619 = vector.load %arg8[%c6_291, %c0_292, %c0_293] : memref<8x8x128xf32, #tpu.memory_space<vmem>>, vector<1x8x128xf32>
    %620 = vector.shape_cast %619 : vector<1x8x128xf32> to vector<8x128xf32>
    %621 = vector.shape_cast %618 : vector<8x128xf32> to vector<1x8x128xf32>
    tpu.vector_store %arg8[%c6_291, %c0_292, %c0_293], %621 {strides = array<i32>} : memref<8x8x128xf32, #tpu.memory_space<vmem>>, vector<1x8x128xf32>,
    %622 = vector.extract_strided_slice %593 {offsets = [56, 0], sizes = [8, 128], strides = [1, 1]} : vector<64x128xf32> to vector<8x128xf32>
    %c7_294 = arith.constant 7 : index
    %c0_295 = arith.constant 0 : index
    %c0_296 = arith.constant 0 : index
    %623 = vector.load %arg8[%c7_294, %c0_295, %c0_296] : memref<8x8x128xf32, #tpu.memory_space<vmem>>, vector<1x8x128xf32>
    %624 = vector.shape_cast %623 : vector<1x8x128xf32> to vector<8x128xf32>
    %625 = vector.shape_cast %622 : vector<8x128xf32> to vector<1x8x128xf32>
    tpu.vector_store %arg8[%c7_294, %c0_295, %c0_296], %625 {strides = array<i32>} : memref<8x8x128xf32, #tpu.memory_space<vmem>>, vector<1x8x128xf32>,
    %c0_297 = arith.constant 0 : index
    %c0_298 = arith.constant 0 : index
    %626 = vector.load %arg9[%c0_297, %c0_298] : memref<8x128xf32, #tpu.memory_space<vmem>>, vector<8x128xf32>
    tpu.vector_store %arg9[%c0_297, %c0_298], %586 {strides = array<i32>} : memref<8x128xf32, #tpu.memory_space<vmem>>, vector<8x128xf32>,
    return
  }
  func.func @transform_0(%arg0: i32, %arg1: memref<16x8xi32, #tpu.memory_space<smem>>) -> (i32, i32) {
    %c0_i32 = arith.constant 0 : i32
    %c0_i32_0 = arith.constant 0 : i32
    %c0_i32_1 = arith.constant 0 : i32
    return %c0_i32, %c0_i32_0 : i32, i32
  }
  func.func @transform_1(%arg0: i32, %arg1: memref<16x8xi32, #tpu.memory_space<smem>>) -> (i32, i32) {
    %c0_i32 = arith.constant 0 : i32
    %c0_i32_0 = arith.constant 0 : i32
    %c0_i32_1 = arith.constant 0 : i32
    return %c0_i32, %c0_i32_0 : i32, i32
  }
  func.func @transform_2(%arg0: i32, %arg1: memref<16x8xi32, #tpu.memory_space<smem>>) -> (i32, i32) {
    %c0_i32 = arith.constant 0 : i32
    %c0_i32_0 = arith.constant 0 : i32
    %c0_i32_1 = arith.constant 0 : i32
    return %c0_i32, %c0_i32_0 : i32, i32
  }
  func.func @transform_3(%arg0: i32, %arg1: memref<16x8xi32, #tpu.memory_space<smem>>) -> (i32, i32) {
    %c0_i32 = arith.constant 0 : i32
    %c0_i32_0 = arith.constant 0 : i32
    %c0_i32_1 = arith.constant 0 : i32
    return %c0_i32, %c0_i32_0 : i32, i32
  }
  func.func @transform_4(%arg0: i32, %arg1: memref<16x8xi32, #tpu.memory_space<smem>>) -> (i32, i32) {
    %c0_i32 = arith.constant 0 : i32
    %c0_i32_0 = arith.constant 0 : i32
    %c0_i32_1 = arith.constant 0 : i32
    return %c0_i32, %c0_i32_0 : i32, i32
  }
  func.func @transform_5(%arg0: i32, %arg1: memref<16x8xi32, #tpu.memory_space<smem>>) -> (i32, i32) {
    %c0_i32 = arith.constant 0 : i32
    %c0_i32_0 = arith.constant 0 : i32
    return %arg0, %c0_i32 : i32, i32
  }
  func.func @transform_6(%arg0: i32, %arg1: memref<16x8xi32, #tpu.memory_space<smem>>) -> (i32, i32, i32) {
    %c0_i32 = arith.constant 0 : i32
    %c0_i32_0 = arith.constant 0 : i32
    %c0_i32_1 = arith.constant 0 : i32
    return %c0_i32, %arg0, %c0_i32_0 : i32, i32, i32
  }
  func.func @transform_7(%arg0: i32, %arg1: memref<16x8xi32, #tpu.memory_space<smem>>) -> (i32, i32) {
    %c0_i32 = arith.constant 0 : i32
    %c0_i32_0 = arith.constant 0 : i32
    return %arg0, %c0_i32 : i32, i32
  }
}

</mosaic_0001>

<bundles_post_ra>
// kernel: tpu_custom_call.1
= control target key start
LH: loop header
LB: loop body
LE: loop exit
PB: predicated region body
PF: predicated region fallthrough
CT: control target
= control target key end

     0   :  { %s3691_s30 = smov [#allocation3]   ;;  %s4923_s0 = inlined_call_operand.vmem [shape: s32[16,8], index: 0, kind: input, shape index: {}]   ;;  %s4924_s1 = inlined_call_operand.hbm [shape: f32[37,384], index: 1, kind: input, shape index: {}]   ;;  %s4925_s2 = inlined_call_operand.hbm [shape: bf16[128,384], index: 2, kind: input, shape index: {}]   ;;  %s4926_s3 = inlined_call_operand.vmem [shape: f32[1,128], index: 3, kind: input, shape index: {}]   ;;  %s4927_s4 = inlined_call_operand.hbm [shape: bf16[128,128], index: 4, kind: input, shape index: {}]   ;;  %s4928_s5 = inlined_call_operand.vmem [shape: f32[1,128], index: 5, kind: input, shape index: {}]   ;;  %s4929_s6 = inlined_call_operand.vmem [shape: f32[16,128], index: 6, kind: input, shape index: {}]   ;;  %s4930_s7 = inlined_call_operand.hbm [shape: f32[8,16,128], index: 7, kind: output, shape index: {0}]   ;;  %s4931_s8 = inlined_call_operand.hbm [shape: f32[16,128], index: 8, kind: output, shape index: {1}]  }
   0x1   :  { %4953 = sst [smem:[#allocation30_spill]] %s4924_s1  ;;  %s15_s29 = sshll.u32 %s4923_s0, 4  ;;  %s16_s29 = int_to_ptr.vmem [resolvable:$true] %s15_s29 }
   0x2   :  { %4954 = sst [smem:[#allocation31_spill]] %s4925_s2 }
   0x3   :  { %4955 = sst [smem:[#allocation32_spill]] %s4926_s3 }
   0x4   :  { %4956 = sst [smem:[#allocation33_spill]] %s4927_s4 }
   0x5   :  { %4957 = sst [smem:[#allocation34_spill]] %s4928_s5 }
   0x6   :  { %4958 = sst [smem:[#allocation35_spill]] %s4929_s6 }
   0x7   :  { %4959 = sst [smem:[#allocation36_spill]] %s4930_s7 }
   0x8   :  { %4960 = sst [smem:[#allocation37_spill]] %s4931_s8 }
   0x9   :  { %18 = dma.vmem_to_smem %s16_s29, 256, %s3691_s30, [#allocation2] }
   0xa   :  { %3657 = dma.done.wait [#allocation2], 256 }
   0xb   :  { %3658 = vsyncadd [#allocation2], 4294967040 }
   0xc   :  { %21 = sfence }
   0xd   :  { %22 = vsyncpa [#allocation5], 0 }
   0xe   :  { %23 = vsyncpa [#allocation8], 0 }
   0xf   :  { %24 = vsyncpa [#allocation6], 0 }
  0x10   :  { %26 = vsyncpa [#allocation6 + $0x1], 0 }
  0x11   :  { %27 = vsyncpa [#allocation12], 0 }
  0x12   :  { %29 = vsyncpa [#allocation12 + $0x1], 0  ;;  %s3752_s9 = smov 0   ;;  %s3754_s10 = smov 0  }
  0x13   :  { %s3756_s11 = smov 0   ;;  %s3758_s12 = smov 0  }
  0x14 LB: > { %4961 = sst [smem:[#allocation18_spill]] %s3677_s9  ;;  %s3773_s0 = sadd.s32 4294967295, %s3689_s12   ;;  %s3689_s12 = sphi %s3758_s12, %s5007_s12   ;;  %s3685_s11 = sphi %s3756_s11, %s5010_s11   ;;  %s3681_s10 = sphi %s3754_s10, %s5009_s10   ;;  %s3677_s9 = sphi %s3752_s9, %s5008_s9  }
  0x15   : > { %4962 = sst [smem:[#allocation19_spill]] %s3681_s10  ;;  %s3017_s13 = sadd.s32 4294967294, %s3689_s12  }
  0x16   : > { %4963 = sst [smem:[#allocation20_spill]] %s3685_s11  ;;  %s3777_s14 = sadd.s32 1, %s3689_s12  }
  0x17   : > { %4964 = sst [smem:[#allocation21_spill]] %s3689_s12  ;;  %s173_s15 = sadd.s32 1, %s3685_s11 }
  0x18   : > { %4965 = sst [smem:[#allocation22_spill]] %s3773_s0  ;;  %s170_s16 = ssub.s32 %s3689_s12, %s3777_s14 }
  0x19   : > { %4966 = sst [smem:[#allocation23_spill]] %s3777_s14  ;;  %p183_p0 = scmp.ne.s32.totalorder %s3685_s11, %s3681_s10 }
  0x1a   : > { %p171_p1 = scmp.eq.s32.totalorder %s170_s16, 0  ;;  %p184_p2 = scmp.eq.s32.totalorder %s3773_s0, 1 }
  0x1b   : > { %p189_p3 = scmp.ne.s32.totalorder %s3681_s10, %s3677_s9  ;;  %p190_p4 = scmp.eq.s32.totalorder %s3017_s13, 1 }
  0x1c   : > { %s3788_s17 = scalar_select %p171_p1, %s3685_s11, %s173_s15  }
  0x1d   : > { %p3790_p5 = por %p184_p2, %p183_p0  ;;  %p3794_p6 = por %p190_p4, %p189_p3 }
  0x1e   : > { %4967 = sst [smem:[#allocation24_spill]] %s3788_s17  ;;  %p3018_p7 = scmp.ge.s32.totalorder %s3689_s12, 1 }
  0x1f   : > { %s4968_s18 = scalar_select %p3790_p5, 1, 0 }
  0x20   : > { %s4970_s19 = scalar_select %p3794_p6, 1, 0 }
  0x21   : > { %4969 = sst [smem:[#allocation25_spill]] %s4968_s18  ;;  %p223_p8 = scmp.lt.s32.totalorder %s3689_s12, 3 }
  0x22   : > { %4971 = sst [smem:[#allocation26_spill]] %s4970_s19  ;;  %p3347_p9 = scmp.eq.s32.totalorder %s3773_s0, 0 }
  0x23   : > { %p3801_p10 = pnand %p3018_p7, %p223_p8  ;;  %s4973_s2 = sld [smem:[#allocation31_spill]] }
  0x24   : > { %s3692_s24 = smov [#allocation7]   ;;  %s4975_s1 = sld [smem:[#allocation30_spill]] }
  0x25   : > { %p3330_p11 = pneg %p3801_p10  ;;  %s250_s25 = sshll.u32 %s3692_s24, 4  ;;  %s251_s25 = int_to_ptr.vmem [resolvable:$true] %s250_s25 }
  0x26   : > { %s3693_s30 = smov 192   ;;  %s3694_s13 = smov 12  }
  0x27   : > { %p3812_p12 = pnand %p3347_p9, %p3330_p11  ;;  %s3695_s15 = smov [#allocation4]  }
  0x28   : > { %s236_s16 = sshll.u32 %s3695_s15, 4  ;;  %s3696_s21 = smov 384   ;;  %s237_s16 = int_to_ptr.vmem [resolvable:$true] %s236_s16 }
  0x29   : > { %s248_s23 = sshll.u32 %s4973_s2, 4  ;;  %s3697_s22 = smov 24   ;;  %s249_s23 = int_to_ptr.hbm [resolvable:$true] %s248_s23 }
  0x2a   : > { %s234_s29 = sshll.u32 %s4975_s1, 4  ;;  %s4976_s4 = sld [smem:[#allocation33_spill]]  ;;  %s235_s29 = int_to_ptr.hbm [resolvable:$true] %s234_s29 }
  0x2b   : > { %3336 = dma.hbm_to_vmem [thread:$0]  (!%p3812_p12), %s249_s23, 3072, %s251_s25, [#allocation8], %s3693_s30, %s3693_s30, %s3694_s13  }
  0x2c   : > { %3333 = dma.hbm_to_vmem [thread:$0]  (!%p3812_p12), %s235_s29, 1920, %s237_s16, [#allocation5], %s3696_s21, %s3696_s21, %s3697_s22  }
  0x2d   : > { %s3698_s28 = smov [#allocation9]   ;;  %s3699_s17 = smov 64  }
  0x2e   : > { %s267_s1 = sshll.u32 %s3698_s28, 4  ;;  %s3700_s11 = smov 4   ;;  %s268_s1 = int_to_ptr.vmem [resolvable:$true] %s267_s1 }
  0x2f   : > { %293 = sbr.rel (%p3801_p10) target bundleno = 1661 (0x67d), region = 44 }
  0x30   : > { %s265_s27 = sshll.u32 %s4976_s4, 4  ;;  %s266_s27 = int_to_ptr.hbm [resolvable:$true] %s265_s27 }
  0x31   : > { %3339 = dma.hbm_to_vmem [thread:$0]  (!%p3812_p12), %s266_s27, 1024, %s268_s1, [#allocation8], %s3699_s17, %s3699_s17, %s3700_s11  }
  0x34   : > { %3660 = dma.done.wait (%p3347_p9), [#allocation5], 1920  }
  0x35   : > { %3662 = vsyncadd (%p3347_p9), [#allocation5], 4294965376 }
  0x36   : > { %3664 = dma.done.wait (%p3347_p9), [#allocation8], 4096  }
  0x37   : > { %3666 = vsyncadd (%p3347_p9), [#allocation8], 4294963200  ;;  %v3189_v0 = vld [vmem:[#allocation7 + $0xa8] sm:$0xf]  ;;  %v3297_v1 = vld [vmem:[#allocation7 + $0xb0] sm:$0xf0] }
  0x38   : > { %v3177_v2 = vld [vmem:[#allocation7 + $0x90] sm:$0xf]  ;;  %v3838_v3 = vor.u32 %v3297_v1, %v3189_v0  ;;  %v3294_v4 = vld [vmem:[#allocation7 + $0x98] sm:$0xf0]  ;;  %v3165_v6 = vld [vmem:[#allocation7 + $0x78] sm:$0xf] }
  0x39   : > { %v3841_v5 = vor.u32 %v3294_v4, %v3177_v2  ;;  %v3291_v7 = vld [vmem:[#allocation7 + $0x80] sm:$0xf0]  ;;  %v3197_v8 = vld [vmem:[#allocation7 + $0xb0] sm:$0xf]  ;;  %v3298_v9 = vld [vmem:[#allocation7 + $0xb8] sm:$0xf0] }
  0x3a   : > { %1842 = vmatpush.bf16.msra.mxu1 %v3838_v3  ;;  %1933 = vmatpush.bf16.msra.mxu3 %v3838_v3  ;;  %v3844_v10 = vor.u32 %v3298_v9, %v3197_v8  ;;  %v3185_v11 = vld [vmem:[#allocation7 + $0x98] sm:$0xf]  ;;  %v3295_v12 = vld [vmem:[#allocation7 + $0xa0] sm:$0xf0]  ;;  %v3847_v13 = vor.u32 %v3291_v7, %v3165_v6  ;;  %v3153_v14 = vld [vmem:[#allocation7 + $0x60] sm:$0xf] }
  0x3b   : > { %v3850_v15 = vor.u32 %v3295_v12, %v3185_v11  ;;  %v3288_v16 = vld [vmem:[#allocation7 + $0x68] sm:$0xf0]  ;;  %v3173_v17 = vld [vmem:[#allocation7 + $0x80] sm:$0xf]  ;;  %v3141_v20 = vld [vmem:[#allocation7 + $0x48] sm:$0xf] }
  0x3c   : > { %1868 = vmatpush.bf16.msra.mxu2 %v3844_v10  ;;  %v3292_v18 = vld [vmem:[#allocation7 + $0x88] sm:$0xf0]  ;;  %2047 = vmatpush.bf16.msra.mxu0 %v3844_v10  ;;  %v3855_v19 = vor.u32 %v3288_v16, %v3153_v14  ;;  %v3285_v22 = vld [vmem:[#allocation7 + $0x50] sm:$0xf0]  ;;  %v3161_v23 = vld [vmem:[#allocation7 + $0x68] sm:$0xf] }
  0x3d   : > { %v3858_v21 = vor.u32 %v3292_v18, %v3173_v17  ;;  %v3289_v24 = vld [vmem:[#allocation7 + $0x70] sm:$0xf0]  ;;  %p340_p13 = scmp.lt.s32.totalorder %s3773_s0, 1  ;;  %v3864_v25 = vor.u32 %v3285_v22, %v3141_v20  ;;  %v3129_v26 = vld [vmem:[#allocation7 + $0x30] sm:$0xf]  ;;  %s4977_s6 = sld [smem:[#allocation35_spill]] }
  0x3e   : > { %1843 = vmatpush.bf16.msra.mxu1 %v3841_v5  ;;  %1934 = vmatpush.bf16.msra.mxu3 %v3841_v5  ;;  %v3867_v27 = vor.u32 %v3289_v24, %v3161_v23  ;;  %v3282_v28 = vld [vmem:[#allocation7 + $0x38] sm:$0xf0]  ;;  %v3149_v29 = vld [vmem:[#allocation7 + $0x50] sm:$0xf]  ;;  %v3117_v32 = vld [vmem:[#allocation7 + $0x18] sm:$0xf] }
  0x3f   : > { %v3286_v30 = vld [vmem:[#allocation7 + $0x58] sm:$0xf0]  ;;  %s341_s1 = scalar_select %p340_p13, %s3773_s0, 1  ;;  %v3873_v31 = vor.u32 %v3282_v28, %v3129_v26  ;;  %v3279_v34 = vld [vmem:[#allocation7 + $0x20] sm:$0xf0]  ;;  %vm496_vm0 = vcmask 1040384  }
  0x40   : > { %1869 = vmatpush.bf16.msra.mxu2 %v3850_v15  ;;  %2048 = vmatpush.bf16.msra.mxu0 %v3850_v15  ;;  %v3876_v33 = vor.u32 %v3286_v30, %v3149_v29  ;;  %v3137_v35 = vld [vmem:[#allocation7 + $0x38] sm:$0xf]  ;;  %v3283_v36 = vld [vmem:[#allocation7 + $0x40] sm:$0xf0]  ;;  %v3881_v37 = vor.u32 %v3279_v34, %v3117_v32  ;;  %v3105_v38 = vld [vmem:[#allocation7] sm:$0xf] }
  0x41   : > { %s3029_s2 = sshll.u32 %s341_s1, 3  ;;  %v3884_v39 = vor.u32 %v3283_v36, %v3137_v35  ;;  %v3276_v40 = vld [vmem:[#allocation7 + $0x8] sm:$0xf0]  ;;  %v3125_v41 = vld [vmem:[#allocation7 + $0x20] sm:$0xf]  ;;  %s3979_s23 = sshll.u32 %s3773_s0, 10 }
  0x42   : > { %1844 = vmatpush.bf16.msra.mxu1 %v3847_v13  ;;  %1935 = vmatpush.bf16.msra.mxu3 %v3847_v13  ;;  %v3280_v42 = vld [vmem:[#allocation7 + $0x28] sm:$0xf0]  ;;  %v3191_v44 = vld [vmem:[#allocation7 + $0xb4] sm:$0xf0]  ;;  %v3892_v45 = vor.u32 %v3276_v40, %v3105_v38  ;;  %v3113_v49 = vld [vmem:[#allocation7 + $0x8] sm:$0xf] }
  0x43   : > { %s343_s20 = scalar_lea.vmem %s4977_s6, %s3029_s2  ;;  %v3296_v43 = vld [vmem:[#allocation7 + $0xac] sm:$0xf]  ;;  %v3897_v47 = vor.u32 %v3280_v42, %v3125_v41  ;;  %v3277_v50 = vld [vmem:[#allocation7 + $0x10] sm:$0xf0]  ;;  %v3179_v52 = vld [vmem:[#allocation7 + $0x9c] sm:$0xf0] }
  0x44   : > { %1870 = vmatpush.bf16.msra.mxu2 %v3858_v21  ;;  %2049 = vmatpush.bf16.msra.mxu0 %v3858_v21  ;;  %v3894_v46 = vld [vmem:[%s343_s20] sm:$0xff]  ;;  %v3899_v48 = vor.u32 %v3296_v43, %v3191_v44  ;;  %v3293_v51 = vld [vmem:[#allocation7 + $0x94] sm:$0xf]  ;;  %v3907_v54 = vor.u32 %v3277_v50, %v3113_v49  ;;  %v3290_v56 = vld [vmem:[#allocation7 + $0x7c] sm:$0xf]  ;;  %s3983_s25 = sadd.s32 128, %s3979_s23 }
  0x45   : > { %v1713_v53 = vpack.c.bf16 %v3894_v46, %v3894_v46  ;;  %v3910_v55 = vor.u32 %v3293_v51, %v3179_v52  ;;  %v3167_v57 = vld [vmem:[#allocation7 + $0x84] sm:$0xf0]  ;;  %v3287_v59 = vld [vmem:[#allocation7 + $0x64] sm:$0xf]  ;;  %v3155_v60 = vld [vmem:[#allocation7 + $0x6c] sm:$0xf0] }
  0x46   : > { %1845 = vmatpush.bf16.msra.mxu1 %v3855_v19  ;;  %1936 = vmatpush.bf16.msra.mxu3 %v3855_v19  ;;  %v3917_v58 = vor.u32 %v3290_v56, %v3167_v57  ;;  %v3924_v61 = vor.u32 %v3287_v59, %v3155_v60  ;;  %v3284_v62 = vld [vmem:[#allocation7 + $0x4c] sm:$0xf]  ;;  %v3143_v63 = vld [vmem:[#allocation7 + $0x54] sm:$0xf0]  ;;  %v3281_v1 = vld [vmem:[#allocation7 + $0x34] sm:$0xf] }
  0x47   : > { %v3930_v0 = vor.u32 %v3284_v62, %v3143_v63  ;;  %v3131_v2 = vld [vmem:[#allocation7 + $0x3c] sm:$0xf0]  ;;  %v3278_v6 = vld [vmem:[#allocation7 + $0x1c] sm:$0xf]  ;;  %v3119_v7 = vld [vmem:[#allocation7 + $0x24] sm:$0xf0] }
  0x48   : > { %1871 = vmatpush.bf16.msra.mxu2 %v3867_v27  ;;  %2050 = vmatpush.bf16.msra.mxu0 %v3867_v27  ;;  %v3936_v4 = vor.u32 %v3281_v1, %v3131_v2  ;;  %v3942_v8 = vor.u32 %v3278_v6, %v3119_v7  ;;  %v3275_v9 = vld [vmem:[#allocation7 + $0x4] sm:$0xf]  ;;  %v3107_v11 = vld [vmem:[#allocation7 + $0xc] sm:$0xf0]  ;;  %s346_s26 = sld [smem:[#allocation3 + %s3979_s23]]  ;;  %s3989_s30 = sadd.s32 256, %s3979_s23 }
  0x49   : > { %v3948_v12 = vor.u32 %v3275_v9, %v3107_v11  ;;  %s358_s29 = sld [smem:[#allocation3 + %s3983_s25]]  ;;  %s3994_s15 = sadd.s32 384, %s3979_s23  ;;  %vm500_vm1 = vcmask 1041408   ;;  %vm504_vm2 = vcmask 1042432   ;;  %vm508_vm3 = vcmask 1043456  }
  0x4a   : > { %1846 = vmatpush.bf16.msra.mxu1 %v3864_v25  ;;  %1937 = vmatpush.bf16.msra.mxu3 %v3864_v25  ;;  %s370_s13 = sld [smem:[#allocation3 + %s3989_s30]]  ;;  %s4001_s24 = sadd.s32 512, %s3979_s23  ;;  %vm512_vm4 = vcmask 1044480   ;;  %vm516_vm5 = vcmask 1045504   ;;  %vm520_vm6 = vcmask 1046528  }
  0x4b   : > { %s3998_s22 = sld [smem:[#allocation3 + %s3994_s15]]  ;;  %s4004_s28 = sadd.s32 640, %s3979_s23 }
  0x4c   : > { %1872 = vmatpush.bf16.msra.mxu2 %v3876_v33  ;;  %2051 = vmatpush.bf16.msra.mxu0 %v3876_v33  ;;  %4978 = sst [smem:[#allocation27_spill]] %s4001_s24  ;;  %s4014_s19 = sadd.s32 768, %s3979_s23 }
  0x4d   : > { %4979 = sst [smem:[#allocation28_spill]] %s4004_s28 }
  0x4e   : > { %1847 = vmatpush.bf16.msra.mxu1 %v3873_v31  ;;  %1938 = vmatpush.bf16.msra.mxu3 %v3873_v31  ;;  %s347_s16 = sshra.s32 %s346_s26, 3  ;;  %s350_s1 = sand.u32 7, %s346_s26 }
  0x4f   : > { %s359_s21 = sshra.s32 %s358_s29, 3  ;;  %s3032_s27 = smul.u32 24, %s347_s16 }
  0x50   : > { %1873 = vmatpush.bf16.msra.mxu2 %v3884_v39  ;;  %2052 = vmatpush.bf16.msra.mxu0 %v3884_v39  ;;  %s3034_s2 = smul.u32 24, %s359_s21  ;;  %s362_s11 = sand.u32 7, %s358_s29 }
  0x51   : > { %s4008_s17 = sld [smem:[#allocation3 + %s4001_s24]]  ;;  %s371_s20 = sshra.s32 %s370_s13, 3 }
  0x52   : > { %1848 = vmatpush.bf16.msra.mxu1 %v3881_v37  ;;  %1939 = vmatpush.bf16.msra.mxu3 %v3881_v37  ;;  %s4011_s4 = sld [smem:[#allocation3 + %s4004_s28]]  ;;  %s353_s6 = sadd.s32 %s3032_s27, %s350_s1 }
  0x53   : > { %s365_s16 = sadd.s32 %s3034_s2, %s362_s11  ;;  %s3036_s14 = smul.u32 24, %s371_s20 }
  0x54   : > { %1874 = vmatpush.bf16.msra.mxu2 %v3897_v47  ;;  %2053 = vmatpush.bf16.msra.mxu0 %v3897_v47  ;;  %4980 = sst [smem:[#allocation29_spill]] %s4014_s19  ;;  %s374_s26 = sand.u32 7, %s370_s13 }
  0x55   : > { %s383_s21 = sshra.s32 %s3998_s22, 3  ;;  %s4018_s9 = sld [smem:[#allocation3 + %s4014_s19]] }
  0x56   : > { %1849 = vmatpush.bf16.msra.mxu1 %v3892_v45  ;;  %1940 = vmatpush.bf16.msra.mxu3 %v3892_v45  ;;  %s4021_s29 = sadd.s32 896, %s3979_s23  ;;  %s377_s12 = sadd.s32 %s3036_s14, %s374_s26 }
  0x57   : > { %s395_s7 = sshra.s32 %s4008_s17, 3  ;;  %s3038_s8 = smul.u32 24, %s383_s21 }
  0x58   : > { %1875 = vmatpush.bf16.msra.mxu2 %v3907_v54  ;;  %2054 = vmatpush.bf16.msra.mxu0 %v3907_v54  ;;  %s407_s18 = sshra.s32 %s4011_s4, 3  ;;  %s386_s0 = sand.u32 7, %s3998_s22 }
  0x59   : > { %1850 = vmatmul.bf16.vlgmr.msra.gmra.mxu1 %v1713_v53  ;;  %s4027_s27 = sld [smem:[#allocation3 + %s4021_s29]]  ;;  %s3040_s1 = smul.u32 24, %s395_s7 }
  0x5a   : > { %1855 = vmatpush.bf16.msrb.mxu1 %v3899_v48  ;;  %2034 = vmatpush.bf16.msrb.mxu3 %v3899_v48  ;;  %s398_s2 = sand.u32 7, %s4008_s17  ;;  %s3042_s11 = smul.u32 24, %s407_s18 }
  0x5b   : > { %1876 = vmatmul.bf16.vlgmr.msra.gmra.mxu2 %v1713_v53  ;;  %s354_s13 = scalar_lea.vmem [#allocation4], %s353_s6  ;;  %s366_s20 = scalar_lea.vmem [#allocation4], %s365_s16 }
  0x5c   : > { %1946 = vmatpush.bf16.msrb.mxu2 %v3899_v48  ;;  %2197 = vmatpush.bf16.msrb.mxu0 %v3838_v3  ;;  %v4030_v14 = vld [vmem:[%s354_s13] ss:$8 sm:$0x7]  ;;  %s389_s5 = sadd.s32 %s3038_s8, %s386_s0  ;;  %s410_s10 = sand.u32 7, %s4011_s4 }
  0x5d   : > { %v4032_v16 = vld [vmem:[%s366_s20] ss:$8 sm:$0x7]  ;;  %s419_s14 = sshra.s32 %s4018_s9, 3  ;;  %s378_s26 = scalar_lea.vmem [#allocation4], %s377_s12  ;;  %v441_v18 = vperm.slane %v4030_v14, 0 }
  0x5e   : > { %1856 = vmatpush.bf16.msrb.mxu1 %v3910_v55  ;;  %2035 = vmatpush.bf16.msrb.mxu3 %v3910_v55  ;;  %v4036_v17 = vld [vmem:[%s378_s26] ss:$8 sm:$0x7]  ;;  %s401_s22 = sadd.s32 %s3040_s1, %s398_s2  ;;  %v448_v20 = vperm.slane %v4032_v16, 0  ;;  %s413_s7 = sadd.s32 %s3042_s11, %s410_s10  ;;  %v449_v56 = vperm.slane %v4032_v16, 1 }
  0x5f   : > { %s3044_s6 = smul.u32 24, %s419_s14  ;;  %s431_s18 = sshra.s32 %s4027_s27, 3  ;;  %v455_v23 = vperm.slane %v4036_v17, 0  ;;  %v456_v59 = vperm.slane %v4036_v17, 1 }
  0x60   : > { %1947 = vmatpush.bf16.msrb.mxu2 %v3910_v55  ;;  %2198 = vmatpush.bf16.msrb.mxu0 %v3841_v5  ;;  %s390_s17 = scalar_lea.vmem [#allocation4], %s389_s5  ;;  %s422_s16 = sand.u32 7, %s4018_s9  ;;  %v497_v24 = vsel %vm496_vm0, %v441_v18, %v448_v20 }
  0x61   : > { %v4041_v22 = vld [vmem:[%s390_s17] ss:$8 sm:$0x7]  ;;  %s3046_s4 = smul.u32 24, %s431_s18  ;;  %s402_s8 = scalar_lea.vmem [#allocation4], %s401_s22  ;;  %v501_v29 = vsel %vm500_vm1, %v497_v24, %v455_v23 }
  0x62   : > { %1857 = vmatpush.bf16.msrb.mxu1 %v3917_v58  ;;  %2036 = vmatpush.bf16.msrb.mxu3 %v3917_v58  ;;  %v4046_v26 = vld [vmem:[%s402_s8] ss:$8 sm:$0x7]  ;;  %s425_s12 = sadd.s32 %s3044_s6, %s422_s16  ;;  %s434_s0 = sand.u32 7, %s4027_s27  ;;  %v462_v28 = vperm.slane %v4041_v22, 0  ;;  %v463_v1 = vperm.slane %v4041_v22, 1 }
  0x63   : > { %s414_s5 = scalar_lea.vmem [#allocation4], %s413_s7  ;;  %s437_s9 = sadd.s32 %s3046_s4, %s434_s0  ;;  %v469_v32 = vperm.slane %v4046_v26, 0  ;;  %v470_v7 = vperm.slane %v4046_v26, 1 }
  0x64   : > { %1948 = vmatpush.bf16.msrb.mxu2 %v3917_v58  ;;  %2199 = vmatpush.bf16.msrb.mxu0 %v3847_v13  ;;  %v4051_v30 = vld [vmem:[%s414_s5] ss:$8 sm:$0x7]  ;;  %v505_v34 = vsel %vm504_vm2, %v501_v29, %v462_v28  ;;  %s426_s10 = scalar_lea.vmem [#allocation4], %s425_s12  ;;  %s438_s21 = scalar_lea.vmem [#allocation4], %s437_s9 }
  0x65   : > { %v4055_v35 = vld [vmem:[%s426_s10] ss:$8 sm:$0x7]  ;;  %v476_v36 = vperm.slane %v4051_v30, 0  ;;  %v509_v38 = vsel %vm508_vm3, %v505_v34, %v469_v32  ;;  %v477_v11 = vperm.slane %v4051_v30, 1  ;;  %s4981_s3 = sld [smem:[#allocation32_spill]] }
  0x66   : > { %1858 = vmatpush.bf16.msrb.mxu1 %v3924_v61  ;;  %2037 = vmatpush.bf16.msrb.mxu3 %v3924_v61  ;;  %v4059_v40 = vld [vmem:[%s438_s21] ss:$8 sm:$0x7]  ;;  %v483_v41 = vperm.slane %v4055_v35, 0  ;;  %v484_v23 = vperm.slane %v4055_v35, 1  ;;  %s524_s2 = sadd.s32 1, %s3979_s23 }
  0x67   : > { %v513_v42 = vsel %vm512_vm4, %v509_v38, %v476_v36  ;;  %v490_v43 = vperm.slane %v4059_v40, 0  ;;  %v491_v29 = vperm.slane %v4059_v40, 1  ;;  %v443_v36 = vperm.slane %v4030_v14, 2  ;;  %s535_s11 = sadd.s32 1, %s3983_s25  ;;  %s525_s13 = sld [smem:[#allocation3 + %s524_s2]] }
  0x68   : > { %1949 = vmatpush.bf16.msrb.mxu2 %v3924_v61  ;;  %2200 = vmatpush.bf16.msrb.mxu0 %v3855_v19  ;;  %v517_v44 = vsel %vm516_vm5, %v513_v42, %v483_v41  ;;  %v450_v38 = vperm.slane %v4032_v16, 2  ;;  %v457_v42 = vperm.slane %v4036_v17, 2  ;;  %s536_s20 = sld [smem:[#allocation3 + %s535_s11]]  ;;  %s546_s14 = sadd.s32 1, %s3989_s30 }
  0x69   : > { %v521_v49 = vsel %vm520_vm6, %v517_v44, %v490_v43  ;;  %s547_s26 = sld [smem:[#allocation3 + %s546_s14]]  ;;  %s557_s22 = sadd.s32 1, %s3994_s15 }
  0x6a   : > { %1859 = vmatpush.bf16.msrb.mxu1 %v3930_v0  ;;  %2038 = vmatpush.bf16.msrb.mxu3 %v3930_v0  ;;  %s568_s7 = sadd.s32 1, %s4001_s24  ;;  %s579_s18 = sadd.s32 1, %s4004_s28 }
  0x6b   : > { %s4137_s16 = sld [smem:[#allocation3 + %s557_s22]]  ;;  %s590_s21 = sadd.s32 1, %s4014_s19 }
  0x6c   : > { %1950 = vmatpush.bf16.msrb.mxu2 %v3930_v0  ;;  %2201 = vmatpush.bf16.msrb.mxu0 %v3864_v25  ;;  %s4139_s4 = sld [smem:[#allocation3 + %s568_s7]]  ;;  %s601_s1 = sadd.s32 1, %s4021_s29 }
  0x6d   : > { %s526_s6 = sshra.s32 %s525_s13, 3  ;;  %s4141_s12 = sld [smem:[#allocation3 + %s579_s18]] }
  0x6e   : > { %1860 = vmatpush.bf16.msrb.mxu1 %v3936_v4  ;;  %2039 = vmatpush.bf16.msrb.mxu3 %v3936_v4  ;;  %s537_s17 = sshra.s32 %s536_s20, 3  ;;  %s3047_s8 = smul.u32 24, %s526_s6 }
  0x6f   : > { %s529_s0 = sand.u32 7, %s525_s13  ;;  %s3048_s5 = smul.u32 24, %s537_s17 }
  0x70   : > { %1951 = vmatpush.bf16.msrb.mxu2 %v3936_v4  ;;  %2202 = vmatpush.bf16.msrb.mxu0 %v3873_v31  ;;  %s540_s9 = sand.u32 7, %s536_s20  ;;  %s548_s10 = sshra.s32 %s547_s26, 3 }
  0x71   : > { %s532_s27 = sadd.s32 %s3047_s8, %s529_s0  ;;  %s543_s2 = sadd.s32 %s3048_s5, %s540_s9 }
  0x72   : > { %1861 = vmatpush.bf16.msrb.mxu1 %v3942_v8  ;;  %2040 = vmatpush.bf16.msrb.mxu3 %v3942_v8  ;;  %s3049_s11 = smul.u32 24, %s548_s10  ;;  %s551_s14 = sand.u32 7, %s547_s26 }
  0x73   : > { %s4145_s22 = sld [smem:[#allocation3 + %s590_s21]]  ;;  %s559_s7 = sshra.s32 %s4137_s16, 3 }
  0x74   : > { %1952 = vmatpush.bf16.msrb.mxu2 %v3942_v8  ;;  %2203 = vmatpush.bf16.msrb.mxu0 %v3881_v37  ;;  %s570_s6 = sshra.s32 %s4139_s4, 3  ;;  %s562_s18 = sand.u32 7, %s4137_s16 }
  0x75   : > { %s3050_s13 = smul.u32 24, %s559_s7  ;;  %s581_s28 = sshra.s32 %s4141_s12, 3 }
  0x76   : > { %1862 = vmatpush.bf16.msrb.mxu1 %v3948_v12  ;;  %2041 = vmatpush.bf16.msrb.mxu3 %v3948_v12  ;;  %s3051_s17 = smul.u32 24, %s570_s6  ;;  %s4151_s20 = sld [smem:[#allocation3 + %s601_s1]] }
  0x77   : > { %s573_s24 = sand.u32 7, %s4139_s4  ;;  %s3052_s19 = smul.u32 24, %s581_s28 }
  0x78   : > { %1953 = vmatpush.bf16.msrb.mxu2 %v3948_v12  ;;  %2204 = vmatpush.bf16.msrb.mxu0 %v3892_v45  ;;  %s533_s8 = scalar_lea.vmem [#allocation4], %s532_s27  ;;  %s544_s26 = scalar_lea.vmem [#allocation4], %s543_s2 }
  0x79   : > { %1863 = vmatmul.bf16.vlgmr.msrb.gmra.mxu1 %v1713_v53  ;;  %v442_v53 = vperm.slane %v4030_v14, 1  ;;  %v471_v14 = vperm.slane %v4046_v26, 2  ;;  %s565_s0 = sadd.s32 %s3050_s13, %s562_s18  ;;  %s576_s5 = sadd.s32 %s3051_s17, %s573_s24 }
  0x7a   : > { %1959 = vmatpush.bf16.msra.mxu1 %v3844_v10  ;;  %s584_s9 = sand.u32 7, %s4141_s12  ;;  %s592_s10 = sshra.s32 %s4145_s22, 3 }
  0x7b   : > { %v498_v60 = vsel %vm496_vm0, %v442_v53, %v449_v56  ;;  %s587_s28 = sadd.s32 %s3052_s19, %s584_s9  ;;  %s3053_s4 = smul.u32 24, %s592_s10 }
  0x7c   : > { %2021 = vmatpush.bf16.msra.mxu2 %v3838_v3  ;;  %v502_v6 = vsel %vm500_vm1, %v498_v60, %v456_v59  ;;  %s603_s21 = sshra.s32 %s4151_s20, 3  ;;  %s566_s27 = scalar_lea.vmem [#allocation4], %s565_s0 }
  0x7d   : > { %v506_v9 = vsel %vm504_vm2, %v502_v6, %v463_v1  ;;  %v4094_v1 = vld [vmem:[%s4981_s3] ss:$0 sm:$0xff]  ;;  %s554_s3 = sadd.s32 %s3049_s11, %s551_s14  ;;  %s595_s24 = sand.u32 7, %s4145_s22 }
  0x7e   : > { %1960 = vmatpush.bf16.msra.mxu1 %v3850_v15  ;;  %v510_v18 = vsel %vm508_vm3, %v506_v9, %v470_v7  ;;  %v485_v7 = vperm.slane %v4055_v35, 2  ;;  %s555_s16 = scalar_lea.vmem [#allocation4], %s554_s3  ;;  %s3054_s3 = smul.u32 24, %s603_s21 }
  0x7f   : > { %v514_v24 = vsel %vm512_vm4, %v510_v18, %v477_v11  ;;  %s577_s12 = scalar_lea.vmem [#allocation4], %s576_s5  ;;  %s598_s1 = sadd.s32 %s3053_s4, %s595_s24 }
  0x80   : > { %2022 = vmatpush.bf16.msra.mxu2 %v3841_v5  ;;  %v518_v32 = vsel %vm516_vm5, %v514_v24, %v484_v23  ;;  %s606_s19 = sand.u32 7, %s4151_s20  ;;  %s588_s2 = scalar_lea.vmem [#allocation4], %s587_s28 }
  0x81   : > { %v522_v41 = vsel %vm520_vm6, %v518_v32, %v491_v29  ;;  %s609_s11 = sadd.s32 %s3054_s3, %s606_s19  ;;  %s599_s14 = scalar_lea.vmem [#allocation4], %s598_s1 }
  0x82   : > { %1961 = vmatpush.bf16.msra.mxu1 %v3858_v21  ;;  %s610_s22 = scalar_lea.vmem [#allocation4], %s609_s11  ;;  %s4982_s7 = sld [smem:[#allocation27_spill]] }
  0x83   : > { %s4983_s6 = sld [smem:[#allocation28_spill]]  ;;  %s689_s18 = sadd.s32 2, %s3979_s23 }
  0x84   : > { %2023 = vmatpush.bf16.msra.mxu2 %v3847_v13  ;;  %s700_s13 = sadd.s32 2, %s3983_s25  ;;  %s690_s17 = sld [smem:[#allocation3 + %s689_s18]] }
  0x85   : > { %s701_s20 = sld [smem:[#allocation3 + %s700_s13]]  ;;  %s722_s5 = sadd.s32 2, %s3994_s15 }
  0x86   : > { %1962 = vmatpush.bf16.msra.mxu1 %v3867_v27  ;;  %s4246_s4 = sld [smem:[#allocation3 + %s722_s5]] }
  0x88   : > { %2024 = vmatpush.bf16.msra.mxu2 %v3855_v19  ;;  %s733_s9 = sadd.s32 2, %s4982_s7 }
  0x89   : > { %s744_s10 = sadd.s32 2, %s4983_s6  ;;  %s4248_s21 = sld [smem:[#allocation3 + %s733_s9]] }
  0x8a   : > { %1963 = vmatpush.bf16.msra.mxu1 %v3876_v33  ;;  %s4250_s24 = sld [smem:[#allocation3 + %s744_s10]]  ;;  %s694_s3 = sand.u32 7, %s690_s17 }
  0x8b   : > { %s702_s28 = sshra.s32 %s701_s20, 3  ;;  %s705_s1 = sand.u32 7, %s701_s20 }
  0x8c   : > { %2025 = vmatpush.bf16.msra.mxu2 %v3864_v25  ;;  %s724_s5 = sshra.s32 %s4246_s4, 3  ;;  %s727_s10 = sand.u32 7, %s4246_s4 }
  0x8e   : > { %1964 = vmatpush.bf16.msra.mxu1 %v3884_v39 }
  0x8f   : > { %s735_s9 = sshra.s32 %s4248_s21, 3  ;;  %s738_s7 = sand.u32 7, %s4248_s21 }
  0x90   : > { %2026 = vmatpush.bf16.msra.mxu2 %v3873_v31  ;;  %s746_s6 = sshra.s32 %s4250_s24, 3 }
  0x92   : > { %1965 = vmatpush.bf16.msra.mxu1 %v3897_v47 }
  0x94   : > { %2027 = vmatpush.bf16.msra.mxu2 %v3881_v37 }
  0x96   : > { %1966 = vmatpush.bf16.msra.mxu1 %v3907_v54 }
  0x98   : > { %2028 = vmatpush.bf16.msra.mxu2 %v3892_v45 }
  0x9a   : > { %2109 = vmatpush.bf16.msrb.mxu1 %v3838_v3 }
  0x9e   : > { %2110 = vmatpush.bf16.msrb.mxu1 %v3841_v5 }
  0xa2   : > { %2111 = vmatpush.bf16.msrb.mxu1 %v3847_v13 }
  0xa6   : > { %2112 = vmatpush.bf16.msrb.mxu1 %v3855_v19 }
  0xaa   : > { %2113 = vmatpush.bf16.msrb.mxu1 %v3864_v25 }
  0xae   : > { %2114 = vmatpush.bf16.msrb.mxu1 %v3873_v31 }
  0xb2   : > { %2115 = vmatpush.bf16.msrb.mxu1 %v3881_v37 }
  0xb6   : > { %2116 = vmatpush.bf16.msrb.mxu1 %v3892_v45 }
  0xd6   : > { %v1851_v50 = vpop.f32.mrf.mxu1 }
  0xd7   : > { %v1881_v51 = vadd.f32 %v1851_v50, %v521_v49  ;;  %v499_v49 = vsel %vm496_vm0, %v443_v36, %v450_v38 }
  0xd8   : > { %v503_v53 = vsel %vm500_vm1, %v499_v49, %v457_v42 }
  0xd9   : > { %v3199_v52 = vmul.f32 -1.442695, %v1881_v51  ;;  %v464_v51 = vperm.slane %v4041_v22, 2 }
  0xdb   : > { %3401 = vpow2.f32 %v3199_v52  ;;  %v507_v16 = vsel %vm504_vm2, %v503_v53, %v464_v51 }
  0xdc   : > { %v511_v22 = vsel %vm508_vm3, %v507_v16, %v471_v14  ;;  %v4159_v14 = vld [vmem:[%s555_s16] ss:$8 sm:$0x7]  ;;  %s691_s16 = sshra.s32 %s690_s17, 3  ;;  %s3058_s17 = smul.u32 24, %s724_s5 }
  0xde   : > { %v1853_v57 = vpop.f32.mrf.mxu1  ;;  %v1877_v62 = vpop.f32.mrf.mxu2 }
  0xdf   : > { %v1924_v18 = vadd.f32 %v4094_v1, %v1877_v62 }
  0xe1   : > { %v3402_v63 = vpop.eup %3401 }
  0xe2   : > { %v1889_v2 = vadd.f32 1.0, %v3402_v63  ;;  %v478_v63 = vperm.slane %v4051_v30, 2  ;;  %v492_v30 = vperm.slane %v4059_v40, 2 }
  0xe4   : > { %3403 = vrcp.f32 %v1889_v2  ;;  %vm1896_vm7 = vweird.f32 %v1889_v2  ;;  %v1902_v57 = vand.u32 2147483648, %v1889_v2  ;;  %v1900_v59 = vand.u32 2147483647, %v1889_v2 }
  0xe6   : > { %v1879_v20 = vpop.f32.mrf.mxu2  ;;  %v1903_v26 = vor.u32 1.1754944e-38, %v1902_v57  ;;  %vm1901_vm10 = vcmp.eq.f32.partialorder %v1900_v59, 8.507059e+37 }
  0xea   : > { %v3404_v28 = vpop.eup %3403 }
  0xeb   : > { %v1892_v34 = vmul.f32 %v3404_v28, %v1889_v2  ;;  %vm1897_vm8 = vweird.f32 %v3404_v28  ;;  %v515_v2 = vsel %vm512_vm4, %v511_v22, %v478_v63  ;;  %v627_v63 = vperm.slane %v4159_v14, 0 }
  0xec   : > { %vm1898_vm9 = vmor %vm1896_vm7, %vm1897_vm8  ;;  %v519_v23 = vsel %vm516_vm5, %v515_v2, %v485_v7  ;;  %v628_v22 = vperm.slane %v4159_v14, 1  ;;  %v4174_v7 = vld [vmem:[%s577_s12] ss:$8 sm:$0x7]  ;;  %s3056_s12 = smul.u32 24, %s702_s28 }
  0xed   : > { %v1893_v43 = vsub.f32 1.0, %v1892_v34  ;;  %v523_v29 = vsel %vm520_vm6, %v519_v23, %v492_v30  ;;  %v589_v30 = vld [vmem:[%s588_s2] ss:$8 sm:$0x7]  ;;  %v642_v23 = vperm.slane %v4174_v7, 1  ;;  %s3059_s28 = smul.u32 24, %s735_s9 }
  0xee   : > { %s4985_s9 = sld [smem:[#allocation27_spill]] }
  0xef   : > { %v1894_v56 = vmul.f32 %v3404_v28, %v1893_v43 }
  0xf1   : > { %v1895_v17 = vadd.f32 %v3404_v28, %v1894_v56  ;;  %v4156_v56 = vld [vmem:[%s544_s26] ss:$8 sm:$0x7]  ;;  %s711_s26 = sadd.s32 2, %s3989_s30 }
  0xf2   : > { %v620_v57 = vperm.slane %v4156_v56, 0  ;;  %v621_v59 = vperm.slane %v4156_v56, 1  ;;  %s712_s0 = sld [smem:[#allocation3 + %s711_s26]] }
  0xf3   : > { %v1899_v9 = vsel %vm1898_vm9, %v3404_v28, %v1895_v17 }
  0xf4   : > { %v1904_v20 = vsel %vm1901_vm10, %v1903_v26, %v1899_v9 }
  0xf5   : > { %v1925_v24 = vmul.f32 %v1924_v18, %v1904_v20  ;;  %v641_v20 = vperm.slane %v4174_v7, 0 }
  0xf6   : > { %v1864_v44 = vpop.f32.mrf.mxu1 }
  0xf7   : > { %v1882_v50 = vadd.f32 %v1864_v44, %v522_v41  ;;  %v1926_v36 = vadd.f32 %v1925_v24, %v523_v29 }
  0xf8   : > { %s713_s19 = sshra.s32 %s712_s0, 3  ;;  %s716_s13 = sand.u32 7, %s712_s0 }
  0xf9   : > { %v3200_v52 = vmul.f32 -1.442695, %v1882_v50  ;;  %s3057_s18 = smul.u32 24, %s713_s19 }
  0xfb   : > { %3405 = vpow2.f32 %v3200_v52 }
  0xfe   : > { %v1866_v60 = vpop.f32.mrf.mxu1 }
  0xff   : > { %v4167_v60 = vld [vmem:[%s566_s27] ss:$8 sm:$0x7]  ;;  %s3055_s27 = smul.u32 24, %s691_s16  ;;  %s719_s16 = sadd.s32 %s3057_s18, %s716_s13 }
 0x100   : > { %v634_v9 = vperm.slane %v4167_v60, 0  ;;  %s720_s4 = scalar_lea.vmem [#allocation4], %s719_s16  ;;  %s4986_s16 = sld [smem:[#allocation28_spill]] }
 0x101   : > { %v3406_v6 = vpop.eup %3405  ;;  %s697_s11 = sadd.s32 %s3055_s27, %s694_s3  ;;  %s730_s3 = sadd.s32 %s3058_s17, %s727_s10 }
 0x102   : > { %v1890_v11 = vadd.f32 1.0, %v3406_v6  ;;  %s698_s27 = scalar_lea.vmem [#allocation4], %s697_s11  ;;  %s731_s11 = scalar_lea.vmem [#allocation4], %s730_s3 }
 0x103   : > { %s854_s10 = sadd.s32 3, %s3979_s23  ;;  %s865_s17 = sadd.s32 3, %s3983_s25 }
 0x104   : > { %3407 = vrcp.f32 %v1890_v11  ;;  %v1917_v28 = vand.u32 2147483648, %v1890_v11  ;;  %v1915_v41 = vand.u32 2147483647, %v1890_v11  ;;  %vm1911_vm12 = vweird.f32 %v1890_v11 }
 0x105   : > { %3409 = vtanh.f32 %v1926_v36  ;;  %v649_v36 = vperm.slane %v589_v30, 1 }
 0x106   : > { %v1918_v42 = vor.u32 1.1754944e-38, %v1917_v28  ;;  %vm1916_vm14 = vcmp.eq.f32.partialorder %v1915_v41, 8.507059e+37 }
 0x10a   : > { %v3408_v32 = vpop.eup %3407 }
 0x10b   : > { %v1907_v34 = vmul.f32 %v3408_v32, %v1890_v11  ;;  %vm1912_vm11 = vweird.f32 %v3408_v32  ;;  %v3410_v49 = vpop.eup %3409  ;;  %v635_v11 = vperm.slane %v4167_v60, 1 }
 0x10c   : > { %vm1913_vm13 = vmor %vm1911_vm12, %vm1912_vm11 }
 0x10d   : > { %v1908_v35 = vsub.f32 1.0, %v1907_v34  ;;  %v648_v34 = vperm.slane %v589_v30, 0 }
 0x10f   : > { %v1909_v38 = vmul.f32 %v3408_v32, %v1908_v35 }
 0x111   : > { %v1910_v62 = vadd.f32 %v3408_v32, %v1909_v38  ;;  %v4187_v38 = vld [vmem:[%s610_s22] ss:$8 sm:$0x7]  ;;  %s708_s22 = sadd.s32 %s3056_s12, %s705_s1  ;;  %s741_s12 = sadd.s32 %s3059_s28, %s738_s7 }
 0x112   : > { %s709_s0 = scalar_lea.vmem [#allocation4], %s708_s22  ;;  %s749_s1 = sand.u32 7, %s4250_s24 }
 0x113   : > { %v1914_v40 = vsel %vm1913_vm13, %v3408_v32, %v1910_v62  ;;  %v600_v32 = vld [vmem:[%s599_s14] ss:$8 sm:$0x7]  ;;  %s766_s14 = sadd.s32 2, %s4021_s29  ;;  %s855_s28 = sld [smem:[#allocation3 + %s854_s10]] }
 0x114   : > { %v1919_v43 = vsel %vm1916_vm14, %v1918_v42, %v1914_v40  ;;  %v655_v41 = vperm.slane %v600_v32, 0  ;;  %v656_v62 = vperm.slane %v600_v32, 1  ;;  %s4260_s20 = sld [smem:[#allocation3 + %s766_s14]]  ;;  %s742_s14 = scalar_lea.vmem [#allocation4], %s741_s12 }
 0x115   : > { %v1928_v44 = vsub.f32 1.0, %v1919_v43  ;;  %v1930_v51 = vmul.f32 %v1919_v43, %v3894_v46  ;;  %v4154_v46 = vld [vmem:[%s533_s8] ss:$8 sm:$0x7]  ;;  %v662_v43 = vperm.slane %v4187_v38, 0  ;;  %s4984_s8 = sld [smem:[#allocation29_spill]] }
 0x116   : > { %v613_v16 = vperm.slane %v4154_v46, 0  ;;  %v614_v17 = vperm.slane %v4154_v46, 1  ;;  %s887_s12 = sadd.s32 3, %s3994_s15 }
 0x117   : > { %v1929_v50 = vmul.f32 %v3410_v49, %v1928_v44  ;;  %v663_v44 = vperm.slane %v4187_v38, 1 }
 0x118   : > { %v668_v6 = vsel %vm496_vm0, %v613_v16, %v620_v57  ;;  %v669_v26 = vsel %vm496_vm0, %v614_v17, %v621_v59 }
 0x119   : > { %v4103_v52 = vadd.f32 %v1930_v51, %v1929_v50  ;;  %v671_v2 = vsel %vm500_vm1, %v668_v6, %v627_v63  ;;  %v672_v18 = vsel %vm500_vm1, %v669_v26, %v628_v22 }
 0x11a   : > { %v674_v24 = vsel %vm504_vm2, %v671_v2, %v634_v9  ;;  %v675_v29 = vsel %vm504_vm2, %v672_v18, %v635_v11  ;;  %v615_v9 = vperm.slane %v4154_v46, 2  ;;  %v622_v11 = vperm.slane %v4156_v56, 2 }
 0x11b   : > { %v1932_v53 = vpack.c.bf16 %v4103_v52, %v4103_v52  ;;  %v677_v35 = vsel %vm508_vm3, %v674_v24, %v641_v20  ;;  %v678_v28 = vsel %vm508_vm3, %v675_v29, %v642_v23  ;;  %v629_v23 = vperm.slane %v4159_v14, 2  ;;  %s755_s2 = sadd.s32 2, %s4984_s8  ;;  %s3060_s8 = smul.u32 24, %s746_s6 }
 0x11c   : > { %v680_v42 = vsel %vm512_vm4, %v677_v35, %v648_v34  ;;  %v681_v40 = vsel %vm512_vm4, %v678_v28, %v649_v36  ;;  %v670_v29 = vsel %vm496_vm0, %v615_v9, %v622_v11  ;;  %v636_v35 = vperm.slane %v4167_v60, 2  ;;  %s4254_s26 = sld [smem:[#allocation3 + %s755_s2]]  ;;  %s768_s2 = sshra.s32 %s4260_s20, 3 }
 0x11d   : > { %1941 = vmatmul.bf16.vlgmr.msra.gmra.mxu3 %v1932_v53  ;;  %1954 = vmatmul.bf16.vlgmr.msrb.gmra.mxu2 %v1932_v53  ;;  %v683_v50 = vsel %vm516_vm5, %v680_v42, %v655_v41  ;;  %v684_v51 = vsel %vm516_vm5, %v681_v40, %v656_v62  ;;  %v673_v28 = vsel %vm500_vm1, %v670_v29, %v629_v23  ;;  %v643_v46 = vperm.slane %v4174_v7, 2  ;;  %s752_s6 = sadd.s32 %s3060_s8, %s749_s1  ;;  %s3062_s24 = smul.u32 24, %s768_s2 }
 0x11e   : > { %1967 = vmatmul.bf16.vlgmr.msra.gmra.mxu1 %v1932_v53  ;;  %2122 = vmatpush.bf16.msrb.mxu2 %v3899_v48  ;;  %v686_v53 = vsel %vm520_vm6, %v683_v50, %v662_v43  ;;  %v687_v16 = vsel %vm520_vm6, %v684_v51, %v663_v44  ;;  %v676_v56 = vsel %vm504_vm2, %v673_v28, %v636_v35  ;;  %v650_v62 = vperm.slane %v589_v30, 2  ;;  %s771_s8 = sand.u32 7, %s4260_s20  ;;  %s753_s18 = scalar_lea.vmem [#allocation4], %s752_s6 }
 0x11f   : > { %2135 = vmatpush.bf16.msra.mxu3 %v3844_v10  ;;  %2210 = vmatpush.bf16.msra.mxu1 %v3899_v48  ;;  %v679_v14 = vsel %vm508_vm3, %v676_v56, %v643_v46  ;;  %v657_v44 = vperm.slane %v600_v32, 2  ;;  %v664_v7 = vperm.slane %v4187_v38, 2  ;;  %v4265_v56 = vld [vmem:[%s709_s0] ss:$8 sm:$0x7]  ;;  %s774_s13 = sadd.s32 %s3062_s24, %s771_s8  ;;  %s866_s20 = sld [smem:[#allocation3 + %s865_s17]] }
 0x120   : > { %v682_v51 = vsel %vm512_vm4, %v679_v14, %v650_v62  ;;  %s775_s5 = scalar_lea.vmem [#allocation4], %s774_s13  ;;  %s4987_s0 = sld [smem:[#allocation29_spill]] }
 0x121   : > { %s898_s1 = sadd.s32 3, %s4985_s9  ;;  %s859_s24 = sand.u32 7, %s855_s28 }
 0x122   : > { %2123 = vmatpush.bf16.msrb.mxu2 %v3910_v55  ;;  %s757_s19 = sshra.s32 %s4254_s26, 3  ;;  %s760_s7 = sand.u32 7, %s4254_s26 }
 0x123   : > { %2136 = vmatpush.bf16.msra.mxu3 %v3850_v15  ;;  %2211 = vmatpush.bf16.msra.mxu1 %v3910_v55  ;;  %s3061_s21 = smul.u32 24, %s757_s19  ;;  %s909_s19 = sadd.s32 3, %s4986_s16 }
 0x124   : > { %s4357_s2 = sld [smem:[#allocation3 + %s898_s1]]  ;;  %s931_s17 = sadd.s32 3, %s4021_s29 }
 0x125   : > { %s763_s22 = sadd.s32 %s3061_s21, %s760_s7  ;;  %s867_s6 = sshra.s32 %s866_s20, 3 }
 0x126   : > { %2124 = vmatpush.bf16.msrb.mxu2 %v3917_v58  ;;  %s764_s26 = scalar_lea.vmem [#allocation4], %s763_s22  ;;  %s4355_s21 = sld [smem:[#allocation3 + %s887_s12]] }
 0x127   : > { %2137 = vmatpush.bf16.msra.mxu3 %v3858_v21  ;;  %2212 = vmatpush.bf16.msra.mxu1 %v3917_v58  ;;  %s4359_s7 = sld [smem:[#allocation3 + %s909_s19]]  ;;  %s870_s22 = sand.u32 7, %s866_s20 }
 0x128   : > { %s920_s13 = sadd.s32 3, %s4987_s0 }
 0x129   : > { %s4364_s12 = sld [smem:[#allocation3 + %s920_s13]] }
 0x12a   : > { %2125 = vmatpush.bf16.msrb.mxu2 %v3924_v61  ;;  %s903_s9 = sand.u32 7, %s4357_s2 }
 0x12b   : > { %2138 = vmatpush.bf16.msra.mxu3 %v3867_v27  ;;  %2213 = vmatpush.bf16.msra.mxu1 %v3924_v61 }
 0x12c   : > { %s892_s16 = sand.u32 7, %s4355_s21 }
 0x12e   : > { %2126 = vmatpush.bf16.msrb.mxu2 %v3930_v0 }
 0x12f   : > { %2139 = vmatpush.bf16.msra.mxu3 %v3876_v33  ;;  %2214 = vmatpush.bf16.msra.mxu1 %v3930_v0 }
 0x132   : > { %2127 = vmatpush.bf16.msrb.mxu2 %v3936_v4 }
 0x133   : > { %2140 = vmatpush.bf16.msra.mxu3 %v3884_v39  ;;  %2215 = vmatpush.bf16.msra.mxu1 %v3936_v4 }
 0x136   : > { %2128 = vmatpush.bf16.msrb.mxu2 %v3942_v8 }
 0x137   : > { %2141 = vmatpush.bf16.msra.mxu3 %v3897_v47  ;;  %2216 = vmatpush.bf16.msra.mxu1 %v3942_v8 }
 0x13a   : > { %2129 = vmatpush.bf16.msrb.mxu2 %v3948_v12 }
 0x13b   : > { %2142 = vmatpush.bf16.msra.mxu3 %v3907_v54  ;;  %2217 = vmatpush.bf16.msra.mxu1 %v3948_v12 }
 0x19b   : > { %v1968_v49 = vpop.f32.mrf.mxu1 }
 0x1a0   : > { %v1942_v57 = vpop.f32.mrf.mxu3  ;;  %v1955_v17 = vpop.f32.mrf.mxu2 }
 0x1a1   : > { %v1972_v59 = vadd.f32 %v1942_v57, %v686_v53  ;;  %v1973_v63 = vadd.f32 %v1955_v17, %v687_v16 }
 0x1a3   : > { %v3201_v22 = vmul.f32 -1.442695, %v1972_v59  ;;  %v3202_v6 = vmul.f32 -1.442695, %v1973_v63  ;;  %v1970_v26 = vpop.f32.mrf.mxu1  ;;  %v685_v59 = vsel %vm516_vm5, %v682_v51, %v657_v44 }
 0x1a5   : > { %3411 = vpow2.f32 %v3201_v22  ;;  %v2012_v22 = vadd.f32 %v4094_v1, %v1968_v49 }
 0x1a6   : > { %3413 = vpow2.f32 %v3202_v6  ;;  %v688_v6 = vsel %vm520_vm6, %v685_v59, %v664_v7  ;;  %v754_v59 = vld [vmem:[%s753_s18] ss:$8 sm:$0x7] }
 0x1a8   : > { %v1944_v2 = vpop.f32.mrf.mxu3  ;;  %v1957_v18 = vpop.f32.mrf.mxu2 }
 0x1ab   : > { %v3412_v20 = vpop.eup %3411 }
 0x1ac   : > { %v3414_v24 = vpop.eup %3413  ;;  %v1980_v34 = vadd.f32 1.0, %v3412_v20 }
 0x1ad   : > { %v1981_v36 = vadd.f32 1.0, %v3414_v24 }
 0x1ae   : > { %3415 = vrcp.f32 %v1980_v34  ;;  %v1993_v60 = vand.u32 2147483648, %v1980_v34  ;;  %v1991_v57 = vand.u32 2147483647, %v1980_v34  ;;  %vm1987_vm7 = vweird.f32 %v1980_v34 }
 0x1af   : > { %3417 = vrcp.f32 %v1981_v36  ;;  %v2008_v2 = vand.u32 2147483648, %v1981_v36  ;;  %vm2002_vm11 = vweird.f32 %v1981_v36  ;;  %v2006_v38 = vand.u32 2147483647, %v1981_v36 }
 0x1b0   : > { %v1994_v63 = vor.u32 1.1754944e-38, %v1993_v60  ;;  %vm1992_vm9 = vcmp.eq.f32.partialorder %v1991_v57, 8.507059e+37 }
 0x1b1   : > { %v2009_v23 = vor.u32 1.1754944e-38, %v2008_v2  ;;  %vm2007_vm13 = vcmp.eq.f32.partialorder %v2006_v38, 8.507059e+37  ;;  %v4296_v38 = vld [vmem:[%s775_s5] ss:$8 sm:$0x7] }
 0x1b4   : > { %v3416_v41 = vpop.eup %3415 }
 0x1b5   : > { %v3418_v42 = vpop.eup %3417  ;;  %v1983_v40 = vmul.f32 %v3416_v41, %v1980_v34  ;;  %vm1988_vm15 = vweird.f32 %v3416_v41 }
 0x1b6   : > { %v1998_v43 = vmul.f32 %v3418_v42, %v1981_v36  ;;  %vm1989_vm8 = vmor %vm1987_vm7, %vm1988_vm15  ;;  %vm2003_vm10 = vweird.f32 %v3418_v42  ;;  %v4263_v36 = vld [vmem:[%s698_s27] ss:$8 sm:$0x7]  ;;  %s876_s27 = sadd.s32 3, %s3989_s30 }
 0x1b7   : > { %v1984_v50 = vsub.f32 1.0, %v1983_v40  ;;  %vm2004_vm12 = vmor %vm2002_vm11, %vm2003_vm10  ;;  %v778_v62 = vperm.slane %v4263_v36, 0  ;;  %v779_v14 = vperm.slane %v4263_v36, 1  ;;  %v786_v40 = vperm.slane %v4265_v56, 1  ;;  %s877_s3 = sld [smem:[#allocation3 + %s876_s27]]  ;;  %s889_s27 = sshra.s32 %s4355_s21, 3 }
 0x1b8   : > { %v1999_v53 = vsub.f32 1.0, %v1998_v43  ;;  %v4276_v43 = vld [vmem:[%s731_s11] ss:$8 sm:$0x7]  ;;  %s3066_s19 = smul.u32 24, %s889_s27 }
 0x1b9   : > { %v1985_v16 = vmul.f32 %v3416_v41, %v1984_v50  ;;  %v834_v60 = vsel %vm496_vm0, %v779_v14, %v786_v40  ;;  %v800_v57 = vperm.slane %v4276_v43, 1 }
 0x1ba   : > { %v2000_v17 = vmul.f32 %v3418_v42, %v1999_v53  ;;  %v4283_v53 = vld [vmem:[%s742_s14] ss:$8 sm:$0x7]  ;;  %s3064_s14 = smul.u32 24, %s867_s6  ;;  %s4369_s6 = sld [smem:[#allocation3 + %s931_s17]] }
 0x1bb   : > { %v1986_v30 = vadd.f32 %v3416_v41, %v1985_v16  ;;  %v799_v16 = vperm.slane %v4276_v43, 0 }
 0x1bc   : > { %v2001_v9 = vadd.f32 %v3418_v42, %v2000_v17 }
 0x1bd   : > { %v1990_v32 = vsel %vm1989_vm8, %v3416_v41, %v1986_v30  ;;  %v4268_v41 = vld [vmem:[%s720_s4] ss:$8 sm:$0x7]  ;;  %v806_v30 = vperm.slane %v4283_v53, 0  ;;  %s856_s4 = sshra.s32 %s855_s28, 3  ;;  %s878_s8 = sshra.s32 %s877_s3, 3 }
 0x1be   : > { %v1995_v26 = vsel %vm1992_vm9, %v1994_v63, %v1990_v32  ;;  %v2005_v20 = vsel %vm2004_vm12, %v3418_v42, %v2001_v9  ;;  %v785_v42 = vperm.slane %v4265_v56, 0  ;;  %v792_v44 = vperm.slane %v4268_v41, 0  ;;  %s3063_s11 = smul.u32 24, %s856_s4  ;;  %s881_s10 = sand.u32 7, %s877_s3 }
 0x1bf   : > { %v2013_v11 = vmul.f32 %v2012_v22, %v1995_v26  ;;  %v2010_v24 = vsel %vm2007_vm13, %v2009_v23, %v2005_v20  ;;  %v793_v50 = vperm.slane %v4268_v41, 1  ;;  %v807_v63 = vperm.slane %v4283_v53, 1  ;;  %s3065_s5 = smul.u32 24, %s878_s8  ;;  %s900_s4 = sshra.s32 %s4357_s2, 3 }
 0x1c0   : > { %v2016_v29 = vsub.f32 1.0, %v2010_v24  ;;  %v2018_v35 = vmul.f32 %v2010_v24, %v4103_v52  ;;  %v833_v51 = vsel %vm496_vm0, %v778_v62, %v785_v42  ;;  %v813_v26 = vperm.slane %v754_v59, 0  ;;  %s862_s18 = sadd.s32 %s3063_s11, %s859_s24  ;;  %s911_s28 = sshra.s32 %s4359_s7, 3 }
 0x1c1   : > { %v2014_v18 = vadd.f32 %v2013_v11, %v688_v6  ;;  %v836_v7 = vsel %vm500_vm1, %v833_v51, %v792_v44  ;;  %v837_v17 = vsel %vm500_vm1, %v834_v60, %v793_v50  ;;  %v765_v6 = vld [vmem:[%s764_s26] ss:$8 sm:$0x7]  ;;  %v814_v9 = vperm.slane %v754_v59, 1  ;;  %s873_s26 = sadd.s32 %s3064_s14, %s870_s22  ;;  %s884_s1 = sadd.s32 %s3065_s5, %s881_s10 }
 0x1c2   : > { %v839_v22 = vsel %vm504_vm2, %v836_v7, %v799_v16  ;;  %v840_v32 = vsel %vm504_vm2, %v837_v17, %v800_v57  ;;  %v821_v20 = vperm.slane %v765_v6, 1  ;;  %v780_v57 = vperm.slane %v4263_v36, 2  ;;  %s3067_s20 = smul.u32 24, %s900_s4  ;;  %s863_s24 = scalar_lea.vmem [#allocation4], %s862_s18 }
 0x1c3   : > { %3419 = vtanh.f32 %v2014_v18  ;;  %v842_v11 = vsel %vm508_vm3, %v839_v22, %v806_v30  ;;  %v843_v2 = vsel %vm508_vm3, %v840_v32, %v807_v63  ;;  %v820_v18 = vperm.slane %v765_v6, 0  ;;  %s3068_s11 = smul.u32 24, %s911_s28  ;;  %s874_s3 = scalar_lea.vmem [#allocation4], %s873_s26 }
 0x1c4   : > { %v845_v23 = vsel %vm512_vm4, %v842_v11, %v813_v26  ;;  %v846_v24 = vsel %vm512_vm4, %v843_v2, %v814_v9  ;;  %v787_v7 = vperm.slane %v4265_v56, 2  ;;  %v794_v22 = vperm.slane %v4268_v41, 2  ;;  %s895_s14 = sadd.s32 %s3066_s19, %s892_s16  ;;  %s914_s22 = sand.u32 7, %s4359_s7 }
 0x1c5   : > { %v801_v2 = vperm.slane %v4276_v43, 2  ;;  %v808_v36 = vperm.slane %v4283_v53, 2  ;;  %v829_v53 = vperm.slane %v4296_v38, 2  ;;  %s922_s8 = sshra.s32 %s4364_s12, 3  ;;  %s885_s13 = scalar_lea.vmem [#allocation4], %s884_s1 }
 0x1c6   : > { %v835_v26 = vsel %vm496_vm0, %v780_v57, %v787_v7  ;;  %s906_s21 = sadd.s32 %s3067_s20, %s903_s9  ;;  %s917_s2 = sadd.s32 %s3068_s11, %s914_s22 }
 0x1c7   : > { %s3069_s18 = smul.u32 24, %s922_s8  ;;  %s933_s5 = sshra.s32 %s4369_s6, 3 }
 0x1c8   : > { %s896_s10 = scalar_lea.vmem [#allocation4], %s895_s14  ;;  %s925_s26 = sand.u32 7, %s4364_s12 }
 0x1c9   : > { %v3420_v49 = vpop.eup %3419  ;;  %s936_s16 = sand.u32 7, %s4369_s6  ;;  %s3070_s7 = smul.u32 24, %s933_s5 }
 0x1ca   : > { %v2017_v34 = vmul.f32 %v3420_v49, %v2016_v29  ;;  %v827_v29 = vperm.slane %v4296_v38, 0  ;;  %v828_v49 = vperm.slane %v4296_v38, 1  ;;  %s907_s17 = scalar_lea.vmem [#allocation4], %s906_s21  ;;  %s928_s9 = sadd.s32 %s3069_s18, %s925_s26 }
 0x1cb   : > { %s918_s27 = scalar_lea.vmem [#allocation4], %s917_s2  ;;  %s939_s12 = sadd.s32 %s3070_s7, %s936_s16 }
 0x1cc   : > { %v4212_v28 = vadd.f32 %v2018_v35, %v2017_v34  ;;  %v848_v35 = vsel %vm516_vm5, %v845_v23, %v820_v18  ;;  %v838_v18 = vsel %vm500_vm1, %v835_v26, %v794_v22  ;;  %v815_v23 = vperm.slane %v754_v59, 2  ;;  %s929_s1 = scalar_lea.vmem [#allocation4], %s928_s9  ;;  %s940_s4 = scalar_lea.vmem [#allocation4], %s939_s12 }
 0x1cd   : > { %v851_v62 = vsel %vm520_vm6, %v848_v35, %v827_v29  ;;  %v841_v56 = vsel %vm504_vm2, %v838_v18, %v801_v2  ;;  %v822_v35 = vperm.slane %v765_v6, 2  ;;  %s4988_s6 = sld [smem:[#allocation32_spill]]  ;;  %s1041_s8 = sadd.s32 4, %s3989_s30 }
 0x1ce   : > { %v2020_v46 = vpack.c.bf16 %v4212_v28, %v4212_v28  ;;  %v844_v41 = vsel %vm508_vm3, %v841_v56, %v808_v36  ;;  %v4374_v56 = vld [vmem:[%s874_s3] ss:$8 sm:$0x7]  ;;  %s4989_s20 = sld [smem:[#allocation27_spill]]  ;;  %s1030_s3 = sadd.s32 4, %s3983_s25 }
 0x1cf   : > { %s4990_s11 = sld [smem:[#allocation28_spill]]  ;;  %s1085_s28 = sadd.s32 4, %s4987_s0 }
 0x1d0   : > { %2029 = vmatmul.bf16.vlgmr.msra.gmra.mxu2 %v2020_v46  ;;  %2042 = vmatmul.bf16.vlgmr.msrb.gmra.mxu3 %v2020_v46  ;;  %s1031_s22 = sld [smem:[#allocation3 + %s1030_s3]] }
 0x1d1   : > { %2055 = vmatmul.bf16.vlgmr.msra.gmra.mxu0 %v2020_v46  ;;  %2223 = vmatpush.bf16.msra.mxu2 %v3844_v10  ;;  %v849_v46 = vsel %vm516_vm5, %v846_v24, %v821_v20  ;;  %s1042_s2 = sld [smem:[#allocation3 + %s1041_s8]] }
 0x1d2   : > { %2285 = vmatpush.bf16.msrb.mxu3 %v3838_v3  ;;  %2298 = vmatpush.bf16.msra.mxu0 %v3899_v48  ;;  %v852_v42 = vsel %vm520_vm6, %v849_v46, %v828_v49 }
 0x1d4   : > { %s1063_s5 = sadd.s32 4, %s4989_s20 }
 0x1d5   : > { %2224 = vmatpush.bf16.msra.mxu2 %v3850_v15  ;;  %s1074_s7 = sadd.s32 4, %s4990_s11  ;;  %s1064_s9 = sld [smem:[#allocation3 + %s1063_s5]] }
 0x1d6   : > { %2286 = vmatpush.bf16.msrb.mxu3 %v3841_v5  ;;  %2299 = vmatpush.bf16.msra.mxu0 %v3910_v55  ;;  %s1032_s18 = sshra.s32 %s1031_s22, 3 }
 0x1d9   : > { %2225 = vmatpush.bf16.msra.mxu2 %v3858_v21 }
 0x1da   : > { %2287 = vmatpush.bf16.msrb.mxu3 %v3847_v13  ;;  %2300 = vmatpush.bf16.msra.mxu0 %v3917_v58 }
 0x1dd   : > { %2226 = vmatpush.bf16.msra.mxu2 %v3867_v27 }
 0x1de   : > { %2288 = vmatpush.bf16.msrb.mxu3 %v3855_v19  ;;  %2301 = vmatpush.bf16.msra.mxu0 %v3924_v61 }
 0x1e1   : > { %2227 = vmatpush.bf16.msra.mxu2 %v3876_v33 }
 0x1e2   : > { %2289 = vmatpush.bf16.msrb.mxu3 %v3864_v25  ;;  %2302 = vmatpush.bf16.msra.mxu0 %v3930_v0 }
 0x1e5   : > { %2228 = vmatpush.bf16.msra.mxu2 %v3884_v39 }
 0x1e6   : > { %2290 = vmatpush.bf16.msrb.mxu3 %v3873_v31  ;;  %2303 = vmatpush.bf16.msra.mxu0 %v3936_v4 }
 0x1e9   : > { %2229 = vmatpush.bf16.msra.mxu2 %v3897_v47 }
 0x1ea   : > { %2291 = vmatpush.bf16.msrb.mxu3 %v3881_v37  ;;  %2304 = vmatpush.bf16.msra.mxu0 %v3942_v8 }
 0x1ed   : > { %2230 = vmatpush.bf16.msra.mxu2 %v3907_v54 }
 0x1ee   : > { %2292 = vmatpush.bf16.msrb.mxu3 %v3892_v45  ;;  %2305 = vmatpush.bf16.msra.mxu0 %v3948_v12 }
 0x24e   : > { %v2056_v34 = vpop.f32.mrf.mxu0 }
 0x253   : > { %v2030_v14 = vpop.f32.mrf.mxu2  ;;  %v2043_v40 = vpop.f32.mrf.mxu3 }
 0x254   : > { %v2060_v44 = vadd.f32 %v2030_v14, %v851_v62  ;;  %v2061_v50 = vadd.f32 %v2043_v40, %v852_v42  ;;  %v847_v62 = vsel %vm512_vm4, %v844_v41, %v815_v23  ;;  %v4383_v41 = vld [vmem:[%s896_s10] ss:$8 sm:$0x7] }
 0x256   : > { %v3203_v51 = vmul.f32 -1.442695, %v2060_v44  ;;  %v3204_v60 = vmul.f32 -1.442695, %v2061_v50  ;;  %v2058_v16 = vpop.f32.mrf.mxu0  ;;  %v850_v50 = vsel %vm516_vm5, %v847_v62, %v822_v35 }
 0x257   : > { %v853_v16 = vsel %vm520_vm6, %v850_v50, %v829_v53  ;;  %v4389_v35 = vld [vmem:[%s907_s17] ss:$8 sm:$0x7]  ;;  %s3072_s17 = smul.u32 24, %s1032_s18 }
 0x258   : > { %3421 = vpow2.f32 %v3203_v51 }
 0x259   : > { %3423 = vpow2.f32 %v3204_v60  ;;  %v2100_v60 = vadd.f32 %v4094_v1, %v2056_v34 }
 0x25b   : > { %v2032_v17 = vpop.f32.mrf.mxu2  ;;  %v2045_v30 = vpop.f32.mrf.mxu3 }
 0x25e   : > { %v3422_v63 = vpop.eup %3421 }
 0x25f   : > { %v3424_v32 = vpop.eup %3423  ;;  %v2068_v9 = vadd.f32 1.0, %v3422_v63 }
 0x260   : > { %v2069_v11 = vadd.f32 1.0, %v3424_v32 }
 0x261   : > { %3425 = vrcp.f32 %v2068_v9  ;;  %v2081_v43 = vand.u32 2147483648, %v2068_v9  ;;  %v2079_v40 = vand.u32 2147483647, %v2068_v9  ;;  %vm2075_vm15 = vweird.f32 %v2068_v9 }
 0x262   : > { %3427 = vrcp.f32 %v2069_v11  ;;  %v2096_v30 = vand.u32 2147483648, %v2069_v11  ;;  %vm2090_vm10 = vweird.f32 %v2069_v11  ;;  %v2094_v38 = vand.u32 2147483647, %v2069_v11 }
 0x263   : > { %v2082_v51 = vor.u32 1.1754944e-38, %v2081_v43  ;;  %vm2080_vm8 = vcmp.eq.f32.partialorder %v2079_v40, 8.507059e+37  ;;  %v951_v43 = vperm.slane %v4374_v56, 1  ;;  %v971_v40 = vperm.slane %v4389_v35, 0 }
 0x264   : > { %v2097_v32 = vor.u32 1.1754944e-38, %v2096_v30  ;;  %vm2095_vm12 = vcmp.eq.f32.partialorder %v2094_v38, 8.507059e+37 }
 0x267   : > { %v3426_v20 = vpop.eup %3425 }
 0x268   : > { %v3428_v24 = vpop.eup %3427  ;;  %v2071_v29 = vmul.f32 %v3426_v20, %v2068_v9  ;;  %vm2076_vm14 = vweird.f32 %v3426_v20 }
 0x269   : > { %v2086_v49 = vmul.f32 %v3428_v24, %v2069_v11  ;;  %vm2077_vm7 = vmor %vm2075_vm15, %vm2076_vm14  ;;  %vm2091_vm9 = vweird.f32 %v3428_v24  ;;  %v4372_v11 = vld [vmem:[%s863_s24] ss:$8 sm:$0x7]  ;;  %s1019_s24 = sadd.s32 4, %s3979_s23 }
 0x26a   : > { %v2072_v46 = vsub.f32 1.0, %v2071_v29  ;;  %vm2092_vm11 = vmor %vm2090_vm10, %vm2091_vm9  ;;  %v943_v23 = vperm.slane %v4372_v11, 0  ;;  %v944_v62 = vperm.slane %v4372_v11, 1  ;;  %s1020_s14 = sld [smem:[#allocation3 + %s1019_s24]]  ;;  %s1096_s24 = sadd.s32 4, %s4021_s29 }
 0x26b   : > { %v2087_v42 = vsub.f32 1.0, %v2086_v49 }
 0x26c   : > { %v2073_v14 = vmul.f32 %v3426_v20, %v2072_v46  ;;  %v964_v46 = vperm.slane %v4383_v41, 0  ;;  %v999_v50 = vsel %vm496_vm0, %v944_v62, %v951_v43 }
 0x26d   : > { %v2088_v44 = vmul.f32 %v3428_v24, %v2087_v42 }
 0x26e   : > { %v2074_v59 = vadd.f32 %v3426_v20, %v2073_v14  ;;  %v919_v14 = vld [vmem:[%s918_s27] ss:$8 sm:$0x7]  ;;  %s1035_s27 = sand.u32 7, %s1031_s22 }
 0x26f   : > { %v2089_v7 = vadd.f32 %v3428_v24, %v2088_v44  ;;  %s1038_s19 = sadd.s32 %s3072_s17, %s1035_s27 }
 0x270   : > { %v2078_v6 = vsel %vm2077_vm7, %v3426_v20, %v2074_v59  ;;  %v4378_v20 = vld [vmem:[%s885_s13] ss:$8 sm:$0x7]  ;;  %s1052_s13 = sadd.s32 4, %s3994_s15  ;;  %s1021_s21 = sshra.s32 %s1020_s14, 3 }
 0x271   : > { %v2083_v57 = vsel %vm2080_vm8, %v2082_v51, %v2078_v6  ;;  %v2093_v22 = vsel %vm2092_vm11, %v3428_v24, %v2089_v7  ;;  %v950_v24 = vperm.slane %v4374_v56, 0  ;;  %v957_v29 = vperm.slane %v4378_v20, 0  ;;  %v4399_v59 = vld [vmem:[%s929_s1] ss:$8 sm:$0x7]  ;;  %s3071_s10 = smul.u32 24, %s1021_s21 }
 0x272   : > { %v2101_v17 = vmul.f32 %v2100_v60, %v2083_v57  ;;  %v2098_v26 = vsel %vm2095_vm12, %v2097_v32, %v2093_v22  ;;  %v958_v53 = vperm.slane %v4378_v20, 1  ;;  %v978_v51 = vperm.slane %v919_v14, 0  ;;  %v4404_v57 = vld [vmem:[%s940_s4] ss:$8 sm:$0x7]  ;;  %s4473_s26 = sld [smem:[#allocation3 + %s1052_s13]] }
 0x273   : > { %v2104_v9 = vsub.f32 1.0, %v2098_v26  ;;  %v2106_v2 = vmul.f32 %v2098_v26, %v4212_v28  ;;  %v998_v49 = vsel %vm496_vm0, %v943_v23, %v950_v24  ;;  %v965_v60 = vperm.slane %v4383_v41, 1  ;;  %s1024_s16 = sand.u32 7, %s1020_s14  ;;  %s4476_s1 = sld [smem:[#allocation3 + %s1074_s7]] }
 0x274   : > { %v2102_v63 = vadd.f32 %v2101_v17, %v853_v16  ;;  %v1001_v42 = vsel %vm500_vm1, %v998_v49, %v957_v29  ;;  %v1002_v16 = vsel %vm500_vm1, %v999_v50, %v958_v53  ;;  %v985_v7 = vperm.slane %v4399_v59, 0  ;;  %s1027_s12 = sadd.s32 %s3071_s10, %s1024_s16  ;;  %s1043_s4 = sshra.s32 %s1042_s2, 3 }
 0x275   : > { %v1004_v44 = vsel %vm504_vm2, %v1001_v42, %v964_v46  ;;  %v972_v17 = vperm.slane %v4389_v35, 1  ;;  %v1005_v38 = vsel %vm504_vm2, %v1002_v16, %v965_v60  ;;  %v979_v22 = vperm.slane %v919_v14, 1  ;;  %s3073_s3 = smul.u32 24, %s1043_s4  ;;  %s1046_s21 = sand.u32 7, %s1042_s2 }
 0x276   : > { %3429 = vtanh.f32 %v2102_v63  ;;  %v1007_v6 = vsel %vm508_vm3, %v1004_v44, %v971_v40  ;;  %v992_v63 = vperm.slane %v4404_v57, 0  ;;  %v945_v42 = vperm.slane %v4372_v11, 2  ;;  %s1065_s13 = sshra.s32 %s1064_s9, 3  ;;  %s4485_s10 = sld [smem:[#allocation3 + %s1096_s24]] }
 0x277   : > { %v1010_v30 = vsel %vm512_vm4, %v1007_v6, %v978_v51  ;;  %v1008_v26 = vsel %vm508_vm3, %v1005_v38, %v972_v17  ;;  %v952_v40 = vperm.slane %v4374_v56, 2  ;;  %v959_v51 = vperm.slane %v4378_v20, 2  ;;  %s1049_s18 = sadd.s32 %s3073_s3, %s1046_s21  ;;  %s3075_s5 = smul.u32 24, %s1065_s13 }
 0x278   : > { %v1013_v32 = vsel %vm516_vm5, %v1010_v30, %v985_v7  ;;  %v966_v16 = vperm.slane %v4383_v41, 2  ;;  %v973_v11 = vperm.slane %v4389_v35, 2  ;;  %v994_v35 = vperm.slane %v4404_v57, 2  ;;  %s1054_s8 = sshra.s32 %s4473_s26, 3  ;;  %s1057_s14 = sand.u32 7, %s4473_s26 }
 0x279   : > { %v1000_v6 = vsel %vm496_vm0, %v945_v42, %v952_v40  ;;  %s3074_s11 = smul.u32 24, %s1054_s8  ;;  %s1076_s22 = sshra.s32 %s4476_s1, 3 }
 0x27a   : > { %v1003_v17 = vsel %vm500_vm1, %v1000_v6, %v959_v51  ;;  %s1068_s16 = sand.u32 7, %s1064_s9  ;;  %s3076_s7 = smul.u32 24, %s1076_s22 }
 0x27b   : > { %s1028_s17 = scalar_lea.vmem [#allocation4], %s1027_s12  ;;  %s1039_s27 = scalar_lea.vmem [#allocation4], %s1038_s19 }
 0x27c   : > { %v3430_v1 = vpop.eup %3429  ;;  %s1060_s2 = sadd.s32 %s3074_s11, %s1057_s14  ;;  %s1071_s4 = sadd.s32 %s3075_s5, %s1068_s16 }
 0x27d   : > { %v2105_v34 = vmul.f32 %v3430_v1, %v2104_v9  ;;  %v986_v9 = vperm.slane %v4399_v59, 1  ;;  %v1016_v1 = vsel %vm520_vm6, %v1013_v32, %v992_v63  ;;  %v1006_v63 = vsel %vm504_vm2, %v1003_v17, %v966_v16  ;;  %s1079_s26 = sand.u32 7, %s4476_s1  ;;  %s1098_s19 = sshra.s32 %s4485_s10, 3 }
 0x27e   : > { %v980_v32 = vperm.slane %v919_v14, 2  ;;  %v1009_v20 = vsel %vm508_vm3, %v1006_v63, %v973_v11  ;;  %s1082_s9 = sadd.s32 %s3076_s7, %s1079_s26  ;;  %s1061_s24 = scalar_lea.vmem [#allocation4], %s1060_s2 }
 0x27f   : > { %v4321_v18 = vadd.f32 %v2106_v2, %v2105_v34  ;;  %v1011_v34 = vsel %vm512_vm4, %v1008_v26, %v979_v22  ;;  %s3078_s1 = smul.u32 24, %s1098_s19  ;;  %s1072_s8 = scalar_lea.vmem [#allocation4], %s1071_s4 }
 0x280   : > { %v1014_v24 = vsel %vm516_vm5, %v1011_v34, %v986_v9  ;;  %v987_v9 = vperm.slane %v4399_v59, 2  ;;  %v1012_v41 = vsel %vm512_vm4, %v1009_v20, %v980_v32  ;;  %v4435_v59 = vld [vmem:[%s4988_s6] ss:$0 sm:$0xff]  ;;  %s4481_s6 = sld [smem:[#allocation3 + %s1085_s28]]  ;;  %s1050_s28 = scalar_lea.vmem [#allocation4], %s1049_s18 }
 0x281   : > { %v2108_v36 = vpack.c.bf16 %v4321_v18, %v4321_v18  ;;  %s1101_s13 = sand.u32 7, %s4485_s10  ;;  %s4991_s5 = sld [smem:[#allocation28_spill]] }
 0x282   : > { %s1104_s14 = sadd.s32 %s3078_s1, %s1101_s13  ;;  %s1184_s10 = sadd.s32 5, %s3979_s23 }
 0x283   : > { %2117 = vmatmul.bf16.vlgmr.msrb.gmra.mxu1 %v2108_v36  ;;  %2130 = vmatmul.bf16.vlgmr.msrb.gmra.mxu2 %v2108_v36  ;;  %s1105_s22 = scalar_lea.vmem [#allocation4], %s1104_s14  ;;  %s1195_s16 = sadd.s32 5, %s3983_s25 }
 0x284   : > { %2143 = vmatmul.bf16.vlgmr.msra.gmra.mxu3 %v2108_v36  ;;  %2311 = vmatpush.bf16.msrb.mxu1 %v3844_v10  ;;  %v993_v36 = vperm.slane %v4404_v57, 1  ;;  %s1185_s7 = sld [smem:[#allocation3 + %s1184_s10]]  ;;  %s1217_s4 = sadd.s32 5, %s3994_s15 }
 0x285   : > { %2373 = vmatpush.bf16.msrb.mxu2 %v3838_v3  ;;  %2386 = vmatpush.bf16.msra.mxu3 %v3899_v48  ;;  %s1228_s26 = sadd.s32 5, %s4989_s20  ;;  %s1250_s14 = sadd.s32 5, %s4987_s0 }
 0x286   : > { %v1017_v49 = vsel %vm520_vm6, %v1014_v24, %v993_v36  ;;  %s1087_s3 = sshra.s32 %s4481_s6, 3  ;;  %s1090_s11 = sand.u32 7, %s4481_s6 }
 0x287   : > { %s3077_s12 = smul.u32 24, %s1087_s3  ;;  %s1083_s6 = scalar_lea.vmem [#allocation4], %s1082_s9 }
 0x288   : > { %2312 = vmatpush.bf16.msrb.mxu1 %v3850_v15  ;;  %v1084_v32 = vld [vmem:[%s1083_s6] ss:$8 sm:$0x7]  ;;  %s1239_s3 = sadd.s32 5, %s4991_s5  ;;  %s4565_s19 = sld [smem:[#allocation3 + %s1228_s26]] }
 0x289   : > { %2374 = vmatpush.bf16.msrb.mxu2 %v3841_v5  ;;  %2387 = vmatpush.bf16.msra.mxu3 %v3910_v55  ;;  %s1093_s21 = sadd.s32 %s3077_s12, %s1090_s11  ;;  %s4563_s12 = sld [smem:[#allocation3 + %s1217_s4]] }
 0x28a   : > { %s1094_s18 = scalar_lea.vmem [#allocation4], %s1093_s21  ;;  %s4567_s11 = sld [smem:[#allocation3 + %s1239_s3]] }
 0x28b   : > { %s1189_s1 = sand.u32 7, %s1185_s7  ;;  %s4572_s4 = sld [smem:[#allocation3 + %s1250_s14]] }
 0x28c   : > { %2313 = vmatpush.bf16.msrb.mxu1 %v3858_v21 }
 0x28d   : > { %2375 = vmatpush.bf16.msrb.mxu2 %v3847_v13  ;;  %2388 = vmatpush.bf16.msra.mxu3 %v3917_v58 }
 0x28e   : > { %s1233_s20 = sand.u32 7, %s4565_s19 }
 0x28f   : > { %s1222_s5 = sand.u32 7, %s4563_s12 }
 0x290   : > { %2314 = vmatpush.bf16.msrb.mxu1 %v3867_v27 }
 0x291   : > { %2376 = vmatpush.bf16.msrb.mxu2 %v3855_v19  ;;  %2389 = vmatpush.bf16.msra.mxu3 %v3924_v61 }
 0x294   : > { %2315 = vmatpush.bf16.msrb.mxu1 %v3876_v33 }
 0x295   : > { %2377 = vmatpush.bf16.msrb.mxu2 %v3864_v25  ;;  %2390 = vmatpush.bf16.msra.mxu3 %v3930_v0 }
 0x298   : > { %2316 = vmatpush.bf16.msrb.mxu1 %v3884_v39 }
 0x299   : > { %2378 = vmatpush.bf16.msrb.mxu2 %v3873_v31  ;;  %2391 = vmatpush.bf16.msra.mxu3 %v3936_v4 }
 0x29c   : > { %2317 = vmatpush.bf16.msrb.mxu1 %v3897_v47 }
 0x29d   : > { %2379 = vmatpush.bf16.msrb.mxu2 %v3881_v37  ;;  %2392 = vmatpush.bf16.msra.mxu3 %v3942_v8 }
 0x2a0   : > { %2318 = vmatpush.bf16.msrb.mxu1 %v3907_v54 }
 0x2a1   : > { %2380 = vmatpush.bf16.msrb.mxu2 %v3892_v45  ;;  %2393 = vmatpush.bf16.msra.mxu3 %v3948_v12 }
 0x300   : > { %v2118_v2 = vpop.f32.mrf.mxu1 }
 0x301   : > { %v2148_v23 = vadd.f32 %v2118_v2, %v1016_v1 }
 0x303   : > { %v3205_v29 = vmul.f32 -1.442695, %v2148_v23 }
 0x305   : > { %3431 = vpow2.f32 %v3205_v29  ;;  %v1015_v29 = vsel %vm516_vm5, %v1012_v41, %v987_v9  ;;  %v1095_v41 = vld [vmem:[%s1094_s18] ss:$8 sm:$0x7] }
 0x306   : > { %v2131_v46 = vpop.f32.mrf.mxu2  ;;  %v1018_v40 = vsel %vm520_vm6, %v1015_v29, %v994_v35  ;;  %v4520_v35 = vld [vmem:[%s1105_s22] ss:$8 sm:$0x7]  ;;  %v1151_v29 = vperm.slane %v1095_v41, 1 }
 0x307   : > { %v2149_v62 = vadd.f32 %v2131_v46, %v1017_v49  ;;  %v2144_v43 = vpop.f32.mrf.mxu3 }
 0x308   : > { %v2120_v53 = vpop.f32.mrf.mxu1  ;;  %v2188_v42 = vadd.f32 %v4435_v59, %v2144_v43 }
 0x309   : > { %v3206_v44 = vmul.f32 -1.442695, %v2149_v62 }
 0x30b   : > { %v3432_v50 = vpop.eup %3431  ;;  %3433 = vpow2.f32 %v3206_v44 }
 0x30c   : > { %v2156_v60 = vadd.f32 1.0, %v3432_v50 }
 0x30e   : > { %3435 = vrcp.f32 %v2156_v60  ;;  %v2133_v7 = vpop.f32.mrf.mxu2  ;;  %v2169_v34 = vand.u32 2147483648, %v2156_v60  ;;  %v2167_v36 = vand.u32 2147483647, %v2156_v60  ;;  %vm2163_vm14 = vweird.f32 %v2156_v60 }
 0x30f   : > { %v2146_v30 = vpop.f32.mrf.mxu3 }
 0x310   : > { %v2170_v14 = vor.u32 1.1754944e-38, %v2169_v34  ;;  %vm2168_vm7 = vcmp.eq.f32.partialorder %v2167_v36, 8.507059e+37  ;;  %v1143_v34 = vperm.slane %v1084_v32, 0 }
 0x311   : > { %v3434_v38 = vpop.eup %3433 }
 0x312   : > { %v2157_v56 = vadd.f32 1.0, %v3434_v38 }
 0x314   : > { %v3436_v22 = vpop.eup %3435  ;;  %3437 = vrcp.f32 %v2157_v56  ;;  %v2184_v44 = vand.u32 2147483648, %v2157_v56  ;;  %v2182_v51 = vand.u32 2147483647, %v2157_v56  ;;  %vm2178_vm9 = vweird.f32 %v2157_v56 }
 0x315   : > { %v2159_v26 = vmul.f32 %v3436_v22, %v2156_v60  ;;  %vm2164_vm13 = vweird.f32 %v3436_v22 }
 0x316   : > { %vm2165_vm15 = vmor %vm2163_vm14, %vm2164_vm13  ;;  %v2185_v7 = vor.u32 1.1754944e-38, %v2184_v44  ;;  %vm2183_vm11 = vcmp.eq.f32.partialorder %v2182_v51, 8.507059e+37 }
 0x317   : > { %v2160_v1 = vsub.f32 1.0, %v2159_v26 }
 0x319   : > { %v2161_v2 = vmul.f32 %v3436_v22, %v2160_v1 }
 0x31a   : > { %v3438_v23 = vpop.eup %3437 }
 0x31b   : > { %v2174_v24 = vmul.f32 %v3438_v23, %v2157_v56  ;;  %v2162_v49 = vadd.f32 %v3436_v22, %v2161_v2  ;;  %vm2179_vm8 = vweird.f32 %v3438_v23  ;;  %v1144_v2 = vperm.slane %v1084_v32, 1 }
 0x31c   : > { %vm2180_vm10 = vmor %vm2178_vm9, %vm2179_vm8 }
 0x31d   : > { %v2175_v46 = vsub.f32 1.0, %v2174_v24  ;;  %v2166_v62 = vsel %vm2165_vm15, %v3436_v22, %v2162_v49  ;;  %v1150_v24 = vperm.slane %v1095_v41, 0 }
 0x31e   : > { %v2171_v57 = vsel %vm2168_vm7, %v2170_v14, %v2166_v62  ;;  %v1158_v62 = vperm.slane %v4520_v35, 1 }
 0x31f   : > { %v2176_v53 = vmul.f32 %v3438_v23, %v2175_v46  ;;  %v2189_v50 = vmul.f32 %v2188_v42, %v2171_v57  ;;  %v1157_v46 = vperm.slane %v4520_v35, 0 }
 0x321   : > { %v2190_v60 = vadd.f32 %v2189_v50, %v1018_v40  ;;  %v2177_v6 = vadd.f32 %v3438_v23, %v2176_v53 }
 0x323   : > { %3439 = vtanh.f32 %v2190_v60  ;;  %v2181_v16 = vsel %vm2180_vm10, %v3438_v23, %v2177_v6 }
 0x324   : > { %v2186_v17 = vsel %vm2183_vm11, %v2185_v7, %v2181_v16 }
 0x325   : > { %v2192_v30 = vsub.f32 1.0, %v2186_v17  ;;  %v2194_v11 = vmul.f32 %v2186_v17, %v4321_v18 }
 0x329   : > { %v3440_v38 = vpop.eup %3439 }
 0x32a   : > { %v2193_v43 = vmul.f32 %v3440_v38, %v2192_v30 }
 0x32c   : > { %v4440_v63 = vadd.f32 %v2194_v11, %v2193_v43 }
 0x32e   : > { %v2196_v22 = vpack.c.bf16 %v4440_v63, %v4440_v63 }
 0x330   : > { %2205 = vmatmul.bf16.vlgmr.msrb.gmra.mxu0 %v2196_v22  ;;  %2218 = vmatmul.bf16.vlgmr.msra.gmra.mxu1 %v2196_v22 }
 0x331   : > { %2231 = vmatmul.bf16.vlgmr.msra.gmra.mxu2 %v2196_v22  ;;  %2399 = vmatpush.bf16.msrb.mxu0 %v3844_v10 }
 0x332   : > { %2461 = vmatpush.bf16.msra.mxu1 %v3838_v3  ;;  %2474 = vmatpush.bf16.msra.mxu2 %v3899_v48  ;;  %v4487_v3 = vld [vmem:[%s1028_s17] ss:$8 sm:$0x7]  ;;  %s1196_s17 = sld [smem:[#allocation3 + %s1195_s16]]  ;;  %s1261_s16 = sadd.s32 5, %s4021_s29 }
 0x333   : > { %v1110_v17 = vperm.slane %v4487_v3, 2 }
 0x335   : > { %2400 = vmatpush.bf16.msrb.mxu0 %v3850_v15 }
 0x336   : > { %2462 = vmatpush.bf16.msra.mxu1 %v3841_v5  ;;  %2475 = vmatpush.bf16.msra.mxu2 %v3910_v55  ;;  %v4489_v5 = vld [vmem:[%s1039_s27] ss:$8 sm:$0x7]  ;;  %s1206_s27 = sadd.s32 5, %s3989_s30 }
 0x337   : > { %v1117_v30 = vperm.slane %v4489_v5, 2  ;;  %s1207_s2 = sld [smem:[#allocation3 + %s1206_s27]]  ;;  %s1219_s27 = sshra.s32 %s4563_s12, 3 }
 0x338   : > { %s1197_s9 = sshra.s32 %s1196_s17, 3  ;;  %s1200_s21 = sand.u32 7, %s1196_s17 }
 0x339   : > { %2401 = vmatpush.bf16.msrb.mxu0 %v3858_v21  ;;  %s3082_s3 = smul.u32 24, %s1219_s27 }
 0x33a   : > { %2463 = vmatpush.bf16.msra.mxu1 %v3847_v13  ;;  %2476 = vmatpush.bf16.msra.mxu2 %v3917_v58  ;;  %v4492_v13 = vld [vmem:[%s1050_s28] ss:$8 sm:$0x7]  ;;  %s1186_s28 = sshra.s32 %s1185_s7, 3  ;;  %s1241_s7 = sshra.s32 %s4567_s11, 3 }
 0x33b   : > { %v1122_v48 = vperm.slane %v4492_v13, 0  ;;  %v1123_v55 = vperm.slane %v4492_v13, 1  ;;  %v1124_v22 = vperm.slane %v4492_v13, 2 }
 0x33d   : > { %2402 = vmatpush.bf16.msrb.mxu0 %v3867_v27  ;;  %s1208_s13 = sshra.s32 %s1207_s2, 3  ;;  %s1211_s10 = sand.u32 7, %s1207_s2 }
 0x33e   : > { %2464 = vmatpush.bf16.msra.mxu1 %v3855_v19  ;;  %2477 = vmatpush.bf16.msra.mxu2 %v3924_v61  ;;  %v1108_v19 = vperm.slane %v4487_v3, 0  ;;  %s3081_s22 = smul.u32 24, %s1208_s13  ;;  %s1252_s13 = sshra.s32 %s4572_s4, 3 }
 0x340   : > { %s1214_s26 = sadd.s32 %s3081_s22, %s1211_s10 }
 0x341   : > { %2403 = vmatpush.bf16.msrb.mxu0 %v3876_v33  ;;  %s1215_s14 = scalar_lea.vmem [#allocation4], %s1214_s26 }
 0x342   : > { %2465 = vmatpush.bf16.msra.mxu1 %v3864_v25  ;;  %2478 = vmatpush.bf16.msra.mxu2 %v3930_v0  ;;  %v1115_v25 = vperm.slane %v4489_v5, 0  ;;  %v4507_v0 = vld [vmem:[%s1072_s8] ss:$8 sm:$0x7]  ;;  %s3080_s8 = smul.u32 24, %s1197_s9  ;;  %s4577_s9 = sld [smem:[#allocation3 + %s1261_s16]] }
 0x343   : > { %v1136_v20 = vperm.slane %v4507_v0, 0  ;;  %v1137_v26 = vperm.slane %v4507_v0, 1 }
 0x344   : > { %v1163_v58 = vsel %vm496_vm0, %v1108_v19, %v1115_v25  ;;  %s1203_s18 = sadd.s32 %s3080_s8, %s1200_s21  ;;  %s1225_s8 = sadd.s32 %s3082_s3, %s1222_s5 }
 0x345   : > { %2404 = vmatpush.bf16.msrb.mxu0 %v3884_v39  ;;  %s1204_s2 = scalar_lea.vmem [#allocation4], %s1203_s18  ;;  %s1244_s21 = sand.u32 7, %s4567_s11 }
 0x346   : > { %2466 = vmatpush.bf16.msra.mxu1 %v3873_v31  ;;  %2479 = vmatpush.bf16.msra.mxu2 %v3936_v4  ;;  %v1109_v31 = vperm.slane %v4487_v3, 1  ;;  %v1138_v3 = vperm.slane %v4507_v0, 2  ;;  %v1159_v0 = vperm.slane %v4520_v35, 2  ;;  %s1226_s10 = scalar_lea.vmem [#allocation4], %s1225_s8  ;;  %s1255_s18 = sand.u32 7, %s4572_s4 }
 0x347   : > { %s4992_s3 = sld [smem:[#allocation27_spill]] }
 0x348   : > { %s1263_s22 = sshra.s32 %s4577_s9, 3  ;;  %s1266_s5 = sand.u32 7, %s4577_s9 }
 0x349   : > { %2405 = vmatpush.bf16.msrb.mxu0 %v3897_v47  ;;  %s3086_s11 = smul.u32 24, %s1263_s22  ;;  %s1349_s9 = sadd.s32 6, %s3979_s23 }
 0x34a   : > { %2467 = vmatpush.bf16.msra.mxu1 %v3881_v37  ;;  %2480 = vmatpush.bf16.msra.mxu2 %v3942_v8  ;;  %v1116_v37 = vperm.slane %v4489_v5, 1 }
 0x34b   : > { %s1269_s4 = sadd.s32 %s3086_s11, %s1266_s5 }
 0x34c   : > { %v1164_v61 = vsel %vm496_vm0, %v1109_v31, %v1116_v37  ;;  %v1165_v31 = vsel %vm496_vm0, %v1110_v17, %v1117_v30 }
 0x34d   : > { %2406 = vmatpush.bf16.msrb.mxu0 %v3907_v54  ;;  %v1167_v56 = vsel %vm500_vm1, %v1164_v61, %v1123_v55  ;;  %v1168_v55 = vsel %vm500_vm1, %v1165_v31, %v1124_v22 }
 0x34e   : > { %2468 = vmatpush.bf16.msra.mxu1 %v3892_v45  ;;  %2481 = vmatpush.bf16.msra.mxu2 %v3948_v12  ;;  %v4500_v45 = vld [vmem:[%s1061_s24] ss:$8 sm:$0x7]  ;;  %v1166_v12 = vsel %vm500_vm1, %v1163_v58, %v1122_v48  ;;  %s3079_s24 = smul.u32 24, %s1186_s28  ;;  %s1230_s28 = sshra.s32 %s4565_s19, 3 }
 0x34f   : > { %v1129_v4 = vperm.slane %v4500_v45, 0  ;;  %v1130_v8 = vperm.slane %v4500_v45, 1  ;;  %v1131_v48 = vperm.slane %v4500_v45, 2  ;;  %s3083_s17 = smul.u32 24, %s1230_s28  ;;  %s1270_s28 = scalar_lea.vmem [#allocation4], %s1269_s4 }
 0x350   : > { %s1192_s6 = sadd.s32 %s3079_s24, %s1189_s1  ;;  %s3084_s24 = smul.u32 24, %s1241_s7 }
 0x351   : > { %v1169_v9 = vsel %vm504_vm2, %v1166_v12, %v1129_v4  ;;  %v1170_v1 = vsel %vm504_vm2, %v1167_v56, %v1130_v8  ;;  %v1171_v5 = vsel %vm504_vm2, %v1168_v55, %v1131_v48  ;;  %v1145_v4 = vperm.slane %v1084_v32, 2  ;;  %s1193_s1 = scalar_lea.vmem [#allocation4], %s1192_s6  ;;  %s1236_s12 = sadd.s32 %s3083_s17, %s1233_s20 }
 0x352   : > { %v1172_v36 = vsel %vm508_vm3, %v1169_v9, %v1136_v20  ;;  %v1173_v23 = vsel %vm508_vm3, %v1170_v1, %v1137_v26  ;;  %v1174_v13 = vsel %vm508_vm3, %v1171_v5, %v1138_v3  ;;  %v1152_v20 = vperm.slane %v1095_v41, 2  ;;  %s1247_s19 = sadd.s32 %s3084_s24, %s1244_s21  ;;  %s3085_s6 = smul.u32 24, %s1252_s13 }
 0x353   : > { %v1175_v49 = vsel %vm512_vm4, %v1172_v36, %v1143_v34  ;;  %v1176_v14 = vsel %vm512_vm4, %v1173_v23, %v1144_v2  ;;  %v1177_v45 = vsel %vm512_vm4, %v1174_v13, %v1145_v4  ;;  %s1237_s16 = scalar_lea.vmem [#allocation4], %s1236_s12  ;;  %s1248_s27 = scalar_lea.vmem [#allocation4], %s1247_s19 }
 0x354   : > { %v1178_v42 = vsel %vm516_vm5, %v1175_v49, %v1150_v24  ;;  %v1179_v40 = vsel %vm516_vm5, %v1176_v14, %v1151_v29  ;;  %v1180_v23 = vsel %vm516_vm5, %v1177_v45, %v1152_v20  ;;  %v4597_v17 = vld [vmem:[%s1237_s16] ss:$8 sm:$0x7]  ;;  %s1258_s20 = sadd.s32 %s3085_s6, %s1255_s18  ;;  %s4993_s7 = sld [smem:[#allocation28_spill]] }
 0x355   : > { %v1181_v57 = vsel %vm520_vm6, %v1178_v42, %v1157_v46  ;;  %v1182_v53 = vsel %vm520_vm6, %v1179_v40, %v1158_v62  ;;  %v1183_v14 = vsel %vm520_vm6, %v1180_v23, %v1159_v0  ;;  %v4603_v22 = vld [vmem:[%s1248_s27] ss:$8 sm:$0x7]  ;;  %s1259_s26 = scalar_lea.vmem [#allocation4], %s1258_s20  ;;  %s1360_s17 = sadd.s32 6, %s3983_s25 }
 0x356   : > { %v4609_v48 = vld [vmem:[%s1259_s26] ss:$8 sm:$0x7]  ;;  %v1309_v55 = vperm.slane %v4603_v22, 1  ;;  %v1308_v20 = vperm.slane %v4603_v22, 0  ;;  %s1350_s24 = sld [smem:[#allocation3 + %s1349_s9]] }
 0x357   : > { %v1316_v4 = vperm.slane %v4609_v48, 1  ;;  %v1315_v45 = vperm.slane %v4609_v48, 0  ;;  %s1382_s21 = sadd.s32 6, %s3994_s15  ;;  %s1393_s13 = sadd.s32 6, %s4992_s3 }
 0x358   : > { %s4664_s6 = sld [smem:[#allocation3 + %s1382_s21]]  ;;  %s1415_s27 = sadd.s32 6, %s4987_s0 }
 0x359   : > { %s4666_s22 = sld [smem:[#allocation3 + %s1393_s13]]  ;;  %s1426_s26 = sadd.s32 6, %s4021_s29 }
 0x35a   : > { %s1404_s12 = sadd.s32 6, %s4993_s7 }
 0x35b   : > { %s4668_s18 = sld [smem:[#allocation3 + %s1404_s12]] }
 0x35c   : > { %s1354_s5 = sand.u32 7, %s1350_s24 }
 0x35e   : > { %s1384_s21 = sshra.s32 %s4664_s6, 3  ;;  %s1387_s12 = sand.u32 7, %s4664_s6 }
 0x35f   : > { %s1395_s13 = sshra.s32 %s4666_s22, 3  ;;  %s1398_s3 = sand.u32 7, %s4666_s22 }
 0x361   : > { %s1406_s7 = sshra.s32 %s4668_s18, 3 }
 0x362   : > { %s3092_s0 = smul.u32 24, %s1406_s7 }
 0x3ad   : > { %v2206_v44 = vpop.f32.mrf.mxu0  ;;  %v2219_v50 = vpop.f32.mrf.mxu1 }
 0x3ae   : > { %v2236_v51 = vadd.f32 %v2206_v44, %v1181_v57  ;;  %v2237_v60 = vadd.f32 %v2219_v50, %v1182_v53 }
 0x3b0   : > { %v3207_v6 = vmul.f32 -1.442695, %v2236_v51  ;;  %v3208_v16 = vmul.f32 -1.442695, %v2237_v60 }
 0x3b2   : > { %3441 = vpow2.f32 %v3207_v6 }
 0x3b3   : > { %3443 = vpow2.f32 %v3208_v16 }
 0x3b4   : > { %v2232_v7 = vpop.f32.mrf.mxu2 }
 0x3b5   : > { %v2208_v38 = vpop.f32.mrf.mxu0  ;;  %v2221_v43 = vpop.f32.mrf.mxu1  ;;  %v2276_v41 = vadd.f32 %v4435_v59, %v2232_v7 }
 0x3b8   : > { %v3442_v11 = vpop.eup %3441 }
 0x3b9   : > { %v3444_v19 = vpop.eup %3443  ;;  %v2244_v25 = vadd.f32 1.0, %v3442_v11 }
 0x3ba   : > { %v2245_v37 = vadd.f32 1.0, %v3444_v19  ;;  %v1302_v19 = vperm.slane %v4597_v17, 1 }
 0x3bb   : > { %3445 = vrcp.f32 %v2244_v25  ;;  %v2257_v1 = vand.u32 2147483648, %v2244_v25  ;;  %v2255_v2 = vand.u32 2147483647, %v2244_v25  ;;  %vm2251_vm13 = vweird.f32 %v2244_v25 }
 0x3bc   : > { %3447 = vrcp.f32 %v2245_v37  ;;  %v2234_v58 = vpop.f32.mrf.mxu2  ;;  %v2272_v62 = vand.u32 2147483648, %v2245_v37  ;;  %vm2266_vm8 = vweird.f32 %v2245_v37  ;;  %v2270_v40 = vand.u32 2147483647, %v2245_v37 }
 0x3bd   : > { %v2258_v24 = vor.u32 1.1754944e-38, %v2257_v1  ;;  %vm2256_vm15 = vcmp.eq.f32.partialorder %v2255_v2, 8.507059e+37 }
 0x3be   : > { %v2273_v53 = vor.u32 1.1754944e-38, %v2272_v62  ;;  %vm2271_vm10 = vcmp.eq.f32.partialorder %v2270_v40, 8.507059e+37 }
 0x3c1   : > { %v3446_v61 = vpop.eup %3445 }
 0x3c2   : > { %v3448_v8 = vpop.eup %3447  ;;  %v2247_v12 = vmul.f32 %v3446_v61, %v2244_v25  ;;  %vm2252_vm12 = vweird.f32 %v3446_v61 }
 0x3c3   : > { %v2262_v56 = vmul.f32 %v3448_v8, %v2245_v37  ;;  %vm2253_vm14 = vmor %vm2251_vm13, %vm2252_vm12  ;;  %vm2267_vm7 = vweird.f32 %v3448_v8 }
 0x3c4   : > { %v2248_v26 = vsub.f32 1.0, %v2247_v12  ;;  %vm2268_vm9 = vmor %vm2266_vm8, %vm2267_vm7 }
 0x3c5   : > { %v2263_v9 = vsub.f32 1.0, %v2262_v56 }
 0x3c6   : > { %v2249_v34 = vmul.f32 %v3446_v61, %v2248_v26 }
 0x3c7   : > { %v2264_v36 = vmul.f32 %v3448_v8, %v2263_v9 }
 0x3c8   : > { %v2250_v32 = vadd.f32 %v3446_v61, %v2249_v34 }
 0x3c9   : > { %v2265_v49 = vadd.f32 %v3448_v8, %v2264_v36 }
 0x3ca   : > { %v2254_v29 = vsel %vm2253_vm14, %v3446_v61, %v2250_v32  ;;  %v4615_v61 = vld [vmem:[%s1270_s28] ss:$8 sm:$0x7] }
 0x3cb   : > { %v2259_v46 = vsel %vm2256_vm15, %v2258_v24, %v2254_v29  ;;  %v2269_v57 = vsel %vm2268_vm9, %v3448_v8, %v2265_v49  ;;  %v1301_v8 = vperm.slane %v4597_v17, 0  ;;  %v1323_v56 = vperm.slane %v4615_v61, 1 }
 0x3cc   : > { %v2277_v42 = vmul.f32 %v2276_v41, %v2259_v46  ;;  %v2274_v44 = vsel %vm2271_vm10, %v2273_v53, %v2269_v57  ;;  %v1322_v36 = vperm.slane %v4615_v61, 0  ;;  %v3306_v41 = vld [vmem:[#allocation9 + $0x38] sm:$0xff]  ;;  %v3305_v46 = vld [vmem:[#allocation9 + $0x30] sm:$0xff]  ;;  %v3304_v57 = vld [vmem:[#allocation9 + $0x28] sm:$0xff] }
 0x3cd   : > { %v2280_v50 = vsub.f32 1.0, %v2274_v44  ;;  %v2282_v6 = vmul.f32 %v2274_v44, %v4440_v63 }
 0x3ce   : > { %v2278_v35 = vadd.f32 %v2277_v42, %v1183_v14 }
 0x3d0   : > { %3449 = vtanh.f32 %v2278_v35 }
 0x3d6   : > { %v3450_v51 = vpop.eup %3449 }
 0x3d7   : > { %v2281_v60 = vmul.f32 %v3450_v51, %v2280_v50 }
 0x3d9   : > { %v4545_v16 = vadd.f32 %v2282_v6, %v2281_v60  ;;  %v3303_v60 = vld [vmem:[#allocation9 + $0x20] sm:$0xff] }
 0x3db   : > { %v2284_v7 = vpack.c.bf16 %v4545_v16, %v4545_v16 }
 0x3dd   : > { %2293 = vmatmul.bf16.vlgmr.msrb.gmra.mxu3 %v2284_v7  ;;  %2306 = vmatmul.bf16.vlgmr.msra.gmra.mxu0 %v2284_v7 }
 0x3de   : > { %2319 = vmatmul.bf16.vlgmr.msrb.gmra.mxu1 %v2284_v7  ;;  %2487 = vmatpush.bf16.msrb.mxu3 %v3844_v10  ;;  %v4580_v10 = vld [vmem:[%s1193_s1] ss:$8 sm:$0x7]  ;;  %s1361_s1 = sld [smem:[#allocation3 + %s1360_s17]] }
 0x3df   : > { %v1273_v38 = vperm.slane %v4580_v10, 0  ;;  %2620 = vmatpush.bf16.msra.mxu0 %v3306_v41  ;;  %v1275_v44 = vperm.slane %v4580_v10, 2 }
 0x3e2   : > { %2488 = vmatpush.bf16.msrb.mxu3 %v3850_v15  ;;  %v4582_v15 = vld [vmem:[%s1204_s2] ss:$8 sm:$0x7]  ;;  %s1371_s2 = sadd.s32 6, %s3989_s30 }
 0x3e3   : > { %v1280_v43 = vperm.slane %v4582_v15, 0  ;;  %2621 = vmatpush.bf16.msra.mxu0 %v3305_v46  ;;  %v1282_v50 = vperm.slane %v4582_v15, 2  ;;  %v2564_v46 = vpack.c.bf16 %v4212_v28, %v4103_v52  ;;  %s1372_s8 = sld [smem:[#allocation3 + %s1371_s2]] }
 0x3e4   : > { %s1362_s19 = sshra.s32 %s1361_s1, 3  ;;  %s1365_s16 = sand.u32 7, %s1361_s1 }
 0x3e5   : > { %v1328_v37 = vsel %vm496_vm0, %v1273_v38, %v1280_v43  ;;  %s3088_s11 = smul.u32 24, %s1362_s19  ;;  %s4672_s2 = sld [smem:[#allocation3 + %s1415_s27]] }
 0x3e6   : > { %2489 = vmatpush.bf16.msrb.mxu3 %v3858_v21  ;;  %v4586_v21 = vld [vmem:[%s1215_s14] ss:$8 sm:$0x7]  ;;  %s1351_s14 = sshra.s32 %s1350_s24, 3  ;;  %s3090_s24 = smul.u32 24, %s1384_s21 }
 0x3e7   : > { %v1287_v25 = vperm.slane %v4586_v21, 0  ;;  %2622 = vmatpush.bf16.msra.mxu0 %v3304_v57  ;;  %v1289_v7 = vperm.slane %v4586_v21, 2  ;;  %s1368_s28 = sadd.s32 %s3088_s11, %s1365_s16  ;;  %s3091_s19 = smul.u32 24, %s1395_s13 }
 0x3e8   : > { %s4678_s1 = sld [smem:[#allocation3 + %s1426_s26]]  ;;  %s1409_s16 = sand.u32 7, %s4668_s18 }
 0x3e9   : > { %v1331_v5 = vsel %vm500_vm1, %v1328_v37, %v1287_v25  ;;  %s1373_s20 = sshra.s32 %s1372_s8, 3  ;;  %s1376_s17 = sand.u32 7, %s1372_s8 }
 0x3ea   : > { %2490 = vmatpush.bf16.msrb.mxu3 %v3867_v27  ;;  %v1274_v27 = vperm.slane %v4580_v10, 1  ;;  %v3302_v10 = vld [vmem:[#allocation9 + $0x18] sm:$0xff]  ;;  %s3089_s9 = smul.u32 24, %s1373_s20  ;;  %s1369_s8 = scalar_lea.vmem [#allocation4], %s1368_s28 }
 0x3eb   : > { %2623 = vmatpush.bf16.msra.mxu0 %v3303_v60  ;;  %v4683_v28 = vld [vmem:[%s1369_s8] ss:$8 sm:$0x7]  ;;  %s1401_s11 = sadd.s32 %s3091_s19, %s1398_s3  ;;  %s1417_s20 = sshra.s32 %s4672_s2, 3 }
 0x3ec   : > { %s1412_s7 = sadd.s32 %s3092_s0, %s1409_s16  ;;  %s3093_s22 = smul.u32 24, %s1417_s20 }
 0x3ed   : > { %s1420_s3 = sand.u32 7, %s4672_s2  ;;  %s1402_s26 = scalar_lea.vmem [#allocation4], %s1401_s11 }
 0x3ee   : > { %2491 = vmatpush.bf16.msrb.mxu3 %v3876_v33  ;;  %v1281_v33 = vperm.slane %v4582_v15, 1  ;;  %v1303_v15 = vperm.slane %v4597_v17, 2  ;;  %s1428_s27 = sshra.s32 %s4678_s1, 3  ;;  %v4701_v60 = vld [vmem:[%s1402_s26] ss:$8 sm:$0x7]  ;;  %s1423_s28 = sadd.s32 %s3093_s22, %s1420_s3 }
 0x3ef   : > { %2624 = vmatpush.bf16.msra.mxu0 %v3302_v10  ;;  %s3094_s18 = smul.u32 24, %s1428_s27  ;;  %s1431_s0 = sand.u32 7, %s4678_s1 }
 0x3f0   : > { %s1424_s2 = scalar_lea.vmem [#allocation4], %s1423_s28  ;;  %s4994_s13 = sld [smem:[#allocation19_spill]] }
 0x3f1   : > { %s4995_s1 = sld [smem:[#allocation34_spill]]  ;;  %s1514_s20 = sadd.s32 7, %s3979_s23 }
 0x3f2   : > { %2492 = vmatpush.bf16.msrb.mxu3 %v3884_v39  ;;  %v4591_v39 = vld [vmem:[%s1226_s10] ss:$8 sm:$0x7]  ;;  %s3087_s10 = smul.u32 24, %s1351_s14  ;;  %s1379_s14 = sadd.s32 %s3089_s9, %s1376_s17 }
 0x3f3   : > { %v1295_v30 = vperm.slane %v4591_v39, 1  ;;  %v1294_v58 = vperm.slane %v4591_v39, 0  ;;  %s1380_s6 = scalar_lea.vmem [#allocation4], %s1379_s14  ;;  %s1413_s9 = scalar_lea.vmem [#allocation4], %s1412_s7 }
 0x3f4   : > { %s1357_s4 = sadd.s32 %s3087_s10, %s1354_s5  ;;  %s1390_s5 = sadd.s32 %s3090_s24, %s1387_s12 }
 0x3f5   : > { %v1334_v12 = vsel %vm504_vm2, %v1331_v5, %v1294_v58  ;;  %s1358_s10 = scalar_lea.vmem [#allocation4], %s1357_s4  ;;  %s1391_s4 = scalar_lea.vmem [#allocation4], %s1390_s5 }
 0x3f6   : > { %2493 = vmatpush.bf16.msrb.mxu3 %v3897_v47  ;;  %v1288_v47 = vperm.slane %v4586_v21, 1  ;;  %v1337_v9 = vsel %vm508_vm3, %v1334_v12, %v1301_v8  ;;  %v1310_v21 = vperm.slane %v4603_v22, 2  ;;  %v1324_v8 = vperm.slane %v4615_v61, 2  ;;  %v3299_v22 = vld [vmem:[#allocation9] sm:$0xff]  ;;  %s1434_s17 = sadd.s32 %s3094_s18, %s1431_s0  ;;  %s4735_s14 = sand.u32 1, %s4994_s13  }
 0x3f7   : > { %v1340_v34 = vsel %vm512_vm4, %v1337_v9, %v1308_v20  ;;  %v4681_v52 = vld [vmem:[%s1358_s10] ss:$8 sm:$0x7]  ;;  %s1435_s21 = scalar_lea.vmem [#allocation4], %s1434_s17  ;;  %s3027_s12 = sshll.u32 %s4735_s14, 6 }
 0x3f8   : > { %v1343_v32 = vsel %vm516_vm5, %v1340_v34, %v1315_v45  ;;  %v4694_v57 = vld [vmem:[%s1391_s4] ss:$8 sm:$0x7]  ;;  %s4749_s10 = scalar_lea.vmem [#allocation10], %s3027_s12  ;;  %s4996_s11 = sld [smem:[#allocation32_spill]] }
 0x3f9   : > { %v1346_v29 = vsel %vm520_vm6, %v1343_v32, %v1322_v36  ;;  %s4997_s16 = sld [smem:[#allocation27_spill]]  ;;  %s1525_s7 = sadd.s32 7, %s3983_s25 }
 0x3fa   : > { %2494 = vmatpush.bf16.msrb.mxu3 %v3907_v54  ;;  %v1329_v54 = vsel %vm496_vm0, %v1274_v27, %v1281_v33  ;;  %v1330_v27 = vsel %vm496_vm0, %v1275_v44, %v1282_v50  ;;  %s1515_s22 = sld [smem:[#allocation3 + %s1514_s20]]  ;;  %s1536_s4 = sadd.s32 7, %s3989_s30 }
 0x3fb   : > { %v1332_v11 = vsel %vm500_vm1, %v1329_v54, %v1288_v47  ;;  %v1296_v47 = vperm.slane %v4591_v39, 2  ;;  %v3300_v39 = vld [vmem:[#allocation9 + $0x8] sm:$0xff]  ;;  %s1526_s27 = sld [smem:[#allocation3 + %s1525_s7]]  ;;  %s1547_s26 = sadd.s32 7, %s3994_s15 }
 0x3fc   : > { %v1335_v31 = vsel %vm504_vm2, %v1332_v11, %v1295_v30  ;;  %v1333_v30 = vsel %vm500_vm1, %v1330_v27, %v1289_v7  ;;  %v3301_v11 = vld [vmem:[#allocation9 + $0x10] sm:$0xff]  ;;  %v1460_v7 = vperm.slane %v4694_v57, 1  ;;  %s4999_s3 = sld [smem:[#allocation29_spill]] }
 0x3fd   : > { %v1338_v3 = vsel %vm508_vm3, %v1335_v31, %v1302_v19  ;;  %v1336_v38 = vsel %vm504_vm2, %v1333_v30, %v1296_v47  ;;  %2625 = vmatpush.bf16.msra.mxu0 %v3301_v11  ;;  %v4708_v47 = vld [vmem:[%s1413_s9] ss:$8 sm:$0x7]  ;;  %v1467_v30 = vperm.slane %v4701_v60, 1  ;;  %s1537_s18 = sld [smem:[#allocation3 + %s1536_s4]] }
 0x3fe   : > { %v1341_v13 = vsel %vm512_vm4, %v1338_v3, %v1309_v55  ;;  %v1339_v25 = vsel %vm508_vm3, %v1336_v38, %v1303_v15  ;;  %v1317_v55 = vperm.slane %v4609_v48, 2  ;;  %v4714_v38 = vld [vmem:[%s1424_s2] ss:$8 sm:$0x7]  ;;  %v1474_v11 = vperm.slane %v4708_v47, 1  ;;  %s4790_s2 = sld [smem:[#allocation3 + %s1547_s26]] }
 0x3ff   : > { %v1344_v26 = vsel %vm516_vm5, %v1341_v13, %v1316_v4  ;;  %v1342_v3 = vsel %vm512_vm4, %v1339_v25, %v1310_v21  ;;  %v4720_v25 = vld [vmem:[%s1435_s21] ss:$8 sm:$0x7]  ;;  %s1558_s28 = sadd.s32 7, %s4997_s16 }
 0x400   : > { %v1347_v1 = vsel %vm520_vm6, %v1344_v26, %v1323_v56  ;;  %v1345_v12 = vsel %vm516_vm5, %v1342_v3, %v1317_v55  ;;  %v1488_v3 = vperm.slane %v4720_v25, 1  ;;  %s1516_s0 = sshra.s32 %s1515_s22, 3  ;;  %s4792_s21 = sld [smem:[#allocation3 + %s1558_s28]] }
 0x401   : > { %2626 = vmatpush.bf16.msra.mxu0 %v3300_v39  ;;  %v1348_v9 = vsel %vm520_vm6, %v1345_v12, %v1324_v8  ;;  %s1527_s17 = sshra.s32 %s1526_s27, 3  ;;  %s3095_s13 = smul.u32 24, %s1516_s0 }
 0x402   : > { %s1519_s25 = sand.u32 7, %s1515_s22  ;;  %s3096_s30 = smul.u32 24, %s1527_s17 }
 0x403   : > { %s1530_s12 = sand.u32 7, %s1526_s27  ;;  %s1538_s15 = sshra.s32 %s1537_s18, 3 }
 0x404   : > { %s1522_s24 = sadd.s32 %s3095_s13, %s1519_s25  ;;  %s1580_s19 = sadd.s32 7, %s4999_s3 }
 0x405   : > { %2627 = vmatpush.bf16.msra.mxu0 %v3299_v22  ;;  %s3097_s8 = smul.u32 24, %s1538_s15  ;;  %s1541_s5 = sand.u32 7, %s1537_s18 }
 0x406   : > { %s1549_s16 = sshra.s32 %s4790_s2, 3  ;;  %s1560_s7 = sshra.s32 %s4792_s21, 3 }
 0x407   : > { %s1544_s20 = sadd.s32 %s3097_s8, %s1541_s5  ;;  %s3098_s4 = smul.u32 24, %s1549_s16 }
 0x408   : > { %s1552_s26 = sand.u32 7, %s4790_s2  ;;  %s3099_s27 = smul.u32 24, %s1560_s7 }
 0x409   : > { %s1563_s0 = sand.u32 7, %s4792_s21  ;;  %s1555_s18 = sadd.s32 %s3098_s4, %s1552_s26 }
 0x40a   : > { %s1545_s25 = scalar_lea.vmem [#allocation4], %s1544_s20  ;;  %s1566_s2 = sadd.s32 %s3099_s27, %s1563_s0 }
 0x40b   : > { %s1556_s15 = scalar_lea.vmem [#allocation4], %s1555_s18  ;;  %s5000_s20 = sld [smem:[#allocation22_spill]] }
 0x40c   : > { %s3028_s7 = sshll.u32 %s4735_s14, 3  ;;  %s5002_s0 = sld [smem:[#allocation37_spill]] }
 0x40d   : > { %s2671_s18 = scalar_lea.sflag [#allocation12], %s4735_s14 }
 0x411   : > { %s3256_s26 = sshll.u32 %s5000_s20, 3 }
 0x45a   : > { %v2307_v2 = vpop.f32.mrf.mxu0 }
 0x45b   : > { %v2325_v0 = vadd.f32 %v2307_v2, %v1347_v1  ;;  %v2320_v23 = vpop.f32.mrf.mxu1 }
 0x45c   : > { %v2364_v48 = vadd.f32 %v4435_v59, %v2320_v23 }
 0x45d   : > { %v3210_v24 = vmul.f32 -1.442695, %v2325_v0 }
 0x45f   : > { %3451 = vpow2.f32 %v3210_v24 }
 0x460   : > { %v2294_v49 = vpop.f32.mrf.mxu3 }
 0x461   : > { %v2324_v14 = vadd.f32 %v2294_v49, %v1346_v29 }
 0x462   : > { %v2309_v62 = vpop.f32.mrf.mxu0 }
 0x463   : > { %v3209_v42 = vmul.f32 -1.442695, %v2324_v14  ;;  %v2322_v40 = vpop.f32.mrf.mxu1  ;;  %v2565_v62 = vpack.c.bf16 %v4440_v63, %v4321_v18  ;;  %v4686_v18 = vld [vmem:[%s1380_s6] ss:$8 sm:$0x7]  ;;  %v1438_v63 = vperm.slane %v4681_v52, 0 }
 0x464   : > { %v1439_v40 = vperm.slane %v4681_v52, 1  ;;  %v1453_v44 = vperm.slane %v4686_v18, 1  ;;  %s4998_s6 = sld [smem:[#allocation28_spill]] }
 0x465   : > { %v3452_v35 = vpop.eup %3451  ;;  %3453 = vpow2.f32 %v3209_v42 }
 0x466   : > { %v2333_v53 = vadd.f32 1.0, %v3452_v35  ;;  %v1446_v35 = vperm.slane %v4683_v28, 1 }
 0x468   : > { %v2296_v51 = vpop.f32.mrf.mxu3  ;;  %3455 = vrcp.f32 %v2333_v53  ;;  %v2360_v61 = vand.u32 2147483648, %v2333_v53  ;;  %vm2354_vm7 = vweird.f32 %v2333_v53  ;;  %v2358_v2 = vand.u32 2147483647, %v2333_v53 }
 0x469   : > { %v1494_v51 = vsel %vm496_vm0, %v1439_v40, %v1446_v35 }
 0x46a   : > { %v2361_v32 = vor.u32 1.1754944e-38, %v2360_v61  ;;  %vm2359_vm9 = vcmp.eq.f32.partialorder %v2358_v2, 8.507059e+37  ;;  %v4743_v2 = vld [vmem:[%s4995_s1] ss:$0 sm:$0xff]  ;;  %s1569_s9 = sadd.s32 7, %s4998_s6  ;;  %s1533_s1 = sadd.s32 %s3096_s30, %s1530_s12 }
 0x46b   : > { %v3454_v6 = vpop.eup %3453  ;;  %s4794_s23 = sld [smem:[#allocation3 + %s1569_s9]]  ;;  %s1523_s9 = scalar_lea.vmem [#allocation4], %s1522_s24 }
 0x46c   : > { %v2332_v33 = vadd.f32 1.0, %v3454_v6  ;;  %v1459_v6 = vperm.slane %v4694_v57, 0  ;;  %s4799_s6 = sld [smem:[#allocation3 + %s1580_s19]] }
 0x46e   : > { %3457 = vrcp.f32 %v2332_v33  ;;  %v3456_v54 = vpop.eup %3455  ;;  %v2345_v17 = vand.u32 2147483648, %v2332_v33  ;;  %v2343_v4 = vand.u32 2147483647, %v2332_v33  ;;  %vm2339_vm12 = vweird.f32 %v2332_v33 }
 0x46f   : > { %v2350_v43 = vmul.f32 %v3456_v54, %v2333_v53  ;;  %vm2355_vm15 = vweird.f32 %v3456_v54  ;;  %v1452_v53 = vperm.slane %v4686_v18, 0 }
 0x470   : > { %v2346_v20 = vor.u32 1.1754944e-38, %v2345_v17  ;;  %vm2344_vm14 = vcmp.eq.f32.partialorder %v2343_v4, 8.507059e+37  ;;  %vm2356_vm8 = vmor %vm2354_vm7, %vm2355_vm15 }
 0x471   : > { %v2351_v37 = vsub.f32 1.0, %v2350_v43  ;;  %v1473_v43 = vperm.slane %v4708_v47, 0  ;;  %s1571_s22 = sshra.s32 %s4794_s23, 3  ;;  %s1574_s17 = sand.u32 7, %s4794_s23 }
 0x472   : > { %s3100_s3 = smul.u32 24, %s1571_s22  ;;  %s1582_s13 = sshra.s32 %s4799_s6, 3 }
 0x473   : > { %v2352_v13 = vmul.f32 %v3456_v54, %v2351_v37  ;;  %v1481_v37 = vperm.slane %v4714_v38, 1  ;;  %s3101_s30 = smul.u32 24, %s1582_s13  ;;  %s1585_s24 = sand.u32 7, %s4799_s6 }
 0x474   : > { %v3458_v19 = vpop.eup %3457  ;;  %s1577_s21 = sadd.s32 %s3100_s3, %s1574_s17  ;;  %s339_s22 = scalar_lea.vmem [#allocation11], %s3028_s7 }
 0x475   : > { %v2335_v31 = vmul.f32 %v3458_v19, %v2332_v33  ;;  %vm2340_vm11 = vweird.f32 %v3458_v19  ;;  %v2353_v45 = vadd.f32 %v3456_v54, %v2352_v13  ;;  %v1497_v33 = vsel %vm500_vm1, %v1494_v51, %v1453_v44  ;;  %s1588_s8 = sadd.s32 %s3101_s30, %s1585_s24  ;;  %s1578_s5 = scalar_lea.vmem [#allocation4], %s1577_s21 }
 0x476   : > { %vm2341_vm13 = vmor %vm2339_vm12, %vm2340_vm11  ;;  %v1500_v15 = vsel %vm504_vm2, %v1497_v33, %v1460_v7  ;;  %s1589_s16 = scalar_lea.vmem [#allocation4], %s1588_s8  ;;  %s2697_s3 = scalar_lea.hbm %s5002_s0, %s3256_s26 }
 0x477   : > { %v2336_v58 = vsub.f32 1.0, %v2335_v31  ;;  %v2357_v0 = vsel %vm2356_vm8, %v3456_v54, %v2353_v45  ;;  %v1466_v54 = vperm.slane %v4701_v60, 0  ;;  %v1503_v21 = vsel %vm508_vm3, %v1500_v15, %v1467_v30  ;;  %s3605_s21 = scalar_lea.hbm %s5002_s0, 16 }
 0x478   : > { %v2362_v24 = vsel %vm2359_vm9, %v2361_v32, %v2357_v0  ;;  %v1480_v31 = vperm.slane %v4714_v38, 0  ;;  %v1506_v55 = vsel %vm512_vm4, %v1503_v21, %v1474_v11  ;;  %v1440_v45 = vperm.slane %v4681_v52, 2 }
 0x479   : > { %v2337_v5 = vmul.f32 %v3458_v19, %v2336_v58  ;;  %v2368_v59 = vsub.f32 1.0, %v2362_v24  ;;  %v2370_v41 = vmul.f32 %v2362_v24, %v4545_v16  ;;  %v1487_v58 = vperm.slane %v4720_v25, 0 }
 0x47a   : > { %v1509_v4 = vsel %vm516_vm5, %v1506_v55, %v1481_v37  ;;  %v1454_v0 = vperm.slane %v4686_v18, 2  ;;  %v1475_v18 = vperm.slane %v4708_v47, 2 }
 0x47b   : > { %v2338_v56 = vadd.f32 %v3458_v19, %v2337_v5  ;;  %v1512_v13 = vsel %vm520_vm6, %v1509_v4, %v1488_v3 }
 0x47d   : > { %v2342_v26 = vsel %vm2341_vm13, %v3458_v19, %v2338_v56 }
 0x47e   : > { %v2347_v1 = vsel %vm2344_vm14, %v2346_v20, %v2342_v26 }
 0x47f   : > { %v2365_v34 = vmul.f32 %v2364_v48, %v2347_v1  ;;  %v1447_v1 = vperm.slane %v4683_v28, 2 }
 0x481   : > { %v2366_v36 = vadd.f32 %v2365_v34, %v1348_v9 }
 0x483   : > { %3459 = vtanh.f32 %v2366_v36 }
 0x489   : > { %v3460_v23 = vpop.eup %3459 }
 0x48a   : > { %v2369_v29 = vmul.f32 %v3460_v23, %v2368_v59  ;;  %v1495_v59 = vsel %vm496_vm0, %v1440_v45, %v1447_v1 }
 0x48c   : > { %v4648_v49 = vadd.f32 %v2370_v41, %v2369_v29 }
 0x48e   : > { %v2372_v14 = vpack.c.bf16 %v4648_v49, %v4648_v49  ;;  %v2566_v42 = vpack.c.bf16 %v4648_v49, %v4545_v16  ;;  %v1445_v16 = vperm.slane %v4683_v28, 0 }
 0x490   : > { %2381 = vmatmul.bf16.vlgmr.msrb.gmra.mxu2 %v2372_v14  ;;  %2394 = vmatmul.bf16.vlgmr.msra.gmra.mxu3 %v2372_v14  ;;  %v1493_v50 = vsel %vm496_vm0, %v1438_v63, %v1445_v16 }
 0x491   : > { %2407 = vmatmul.bf16.vlgmr.msrb.gmra.mxu0 %v2372_v14  ;;  %v1496_v27 = vsel %vm500_vm1, %v1493_v50, %v1452_v53  ;;  %v1461_v14 = vperm.slane %v4694_v57, 2  ;;  %v1482_v53 = vperm.slane %v4714_v38, 2  ;;  %v4767_v38 = vld [vmem:[%s4996_s11] ss:$0 sm:$0xff]  ;;  %s1591_s11 = sadd.s32 7, %s4021_s29  ;;  %s1534_s29 = scalar_lea.vmem [#allocation4], %s1533_s1 }
 0x492   : > { %v1499_v10 = vsel %vm504_vm2, %v1496_v27, %v1459_v6  ;;  %v1489_v27 = vperm.slane %v4720_v25, 2  ;;  %s4804_s28 = sld [smem:[#allocation3 + %s1591_s11]]  ;;  %v4809_v1 = vld [vmem:[%s1534_s29] ss:$8 sm:$0x7]  ;;  %s1567_s1 = scalar_lea.vmem [#allocation4], %s1566_s2 }
 0x493   : > { %v1502_v19 = vsel %vm508_vm3, %v1499_v10, %v1466_v54  ;;  %s2701_s29 = sshll.u32 %s2697_s3, 4  ;;  %s2702_s29 = int_to_ptr.hbm [resolvable:$true] %s2701_s29 }
 0x494   : > { %v1505_v39 = vsel %vm512_vm4, %v1502_v19, %v1473_v43  ;;  %s3599_s17 = sshra.s32 %s2702_s29, 4  ;;  %s3600_s17 = int_to_ptr.hbm [resolvable:$true] %s3599_s17 }
 0x495   : > { %v1508_v5 = vsel %vm516_vm5, %v1505_v39, %v1480_v31  ;;  %s3601_s13 = scalar_lea.hbm %s3600_s17, 8  ;;  %p3606_p3 = scmp.lt.s32.totalorder %s3600_s17, %s5002_s0 }
 0x496   : > { %v1511_v8 = vsel %vm520_vm6, %v1508_v5, %v1487_v58  ;;  %p3602_p0 = scmp.ne.s32.totalorder %s3600_s17, %s3601_s13  ;;  %p3607_p4 = scmp.lt.s32.totalorder %s3605_s21, %s3601_s13 }
 0x498   : > { %s1593_s12 = sshra.s32 %s4804_s28, 3  ;;  %s1596_s23 = sand.u32 7, %s4804_s28 }
 0x499   : > { %s3102_s19 = smul.u32 24, %s1593_s12  ;;  %p3603_p1 = pnand %p3602_p0, %p3790_p5 }
 0x49a   : > { %p3608_p7 = por %p3607_p4, %p3606_p3 }
 0x49b   : > { %s1599_s11 = sadd.s32 %s3102_s19, %s1596_s23  ;;  %p3604_p2 = pneg %p3603_p1 }
 0x49c   : > { %s1600_s6 = scalar_lea.vmem [#allocation4], %s1599_s11 }
 0x49d   : > { %p3609_p8 = pnand %p3608_p7, %p3604_p2 }
 0x4a1   : > { %2628 = vmatmul.bf16.vlgmr.msra.gmra.mxu0 %v2564_v46  ;;  %v1498_v46 = vsel %vm500_vm1, %v1495_v59, %v1454_v0  ;;  %v4818_v0 = vld [vmem:[%s1556_s15] ss:$8 sm:$0x7] }
 0x4a2   : > { %v4824_v59 = vld [vmem:[%s1567_s1] ss:$8 sm:$0x7] }
 0x4b1   : > { %2633 = vmatmul.bf16.gmra.mxu0 %v2565_v62  ;;  %v1468_v62 = vperm.slane %v4701_v60, 2 }
 0x4c1   : > { %2638 = vmatmul.bf16.gmra.mxu0 %v2566_v42  ;;  %v1501_v42 = vsel %vm504_vm2, %v1498_v46, %v1461_v14  ;;  %v1579_v46 = vld [vmem:[%s1578_s5] ss:$8 sm:$0x7] }
 0x4c2   : > { %v1504_v40 = vsel %vm508_vm3, %v1501_v42, %v1468_v62  ;;  %v1631_v62 = vperm.slane %v4824_v59, 0 }
 0x4c3   : > { %v1507_v50 = vsel %vm512_vm4, %v1504_v40, %v1475_v18  ;;  %v4834_v18 = vld [vmem:[%s1589_s16] ss:$8 sm:$0x7] }
 0x4c4   : > { %v1510_v47 = vsel %vm516_vm5, %v1507_v50, %v1482_v53  ;;  %v1645_v53 = vperm.slane %v4834_v18, 0 }
 0x4c5   : > { %v1513_v19 = vsel %vm520_vm6, %v1510_v47, %v1489_v27 }
 0x50e   : > { %v4728_v17 = vpop.f32.mrf.mxu0 }
 0x50f   : > { %v2452_v43 = vadd.f32 %v4767_v38, %v4728_v17 }
 0x513   : > { %v2382_v22 = vpop.f32.mrf.mxu2  ;;  %v2395_v12 = vpop.f32.mrf.mxu3 }
 0x514   : > { %v2412_v56 = vadd.f32 %v2382_v22, %v1511_v8  ;;  %v2413_v20 = vadd.f32 %v2395_v12, %v1512_v13 }
 0x516   : > { %v3211_v48 = vmul.f32 -1.442695, %v2412_v56  ;;  %v3212_v26 = vmul.f32 -1.442695, %v2413_v20  ;;  %v2410_v9 = vpop.f32.mrf.mxu0 }
 0x518   : > { %3461 = vpow2.f32 %v3211_v48 }
 0x519   : > { %3463 = vpow2.f32 %v3212_v26 }
 0x51b   : > { %v2384_v61 = vpop.f32.mrf.mxu2  ;;  %v2397_v34 = vpop.f32.mrf.mxu3 }
 0x51c   : > { %v4813_v61 = vld [vmem:[%s1545_s25] ss:$8 sm:$0x7] }
 0x51d   : > { %v1618_v42 = vperm.slane %v4813_v61, 1 }
 0x51e   : > { %v3462_v36 = vpop.eup %3461  ;;  %v2629_v32 = vpop.f32.mrf.mxu0 }
 0x51f   : > { %v3464_v24 = vpop.eup %3463  ;;  %v2420_v23 = vadd.f32 1.0, %v3462_v36  ;;  %v2630_v29 = vadd.f32 %v4743_v2, %v2629_v32  ;;  %v1610_v36 = vperm.slane %v4809_v1, 0  ;;  %v1617_v32 = vperm.slane %v4813_v61, 0 }
 0x520   : > { %v2421_v41 = vadd.f32 1.0, %v3464_v24 }
 0x521   : > { %3465 = vrcp.f32 %v2420_v23  ;;  %2649 = vst [vmem:[%s4749_s10] sm:$0xff] %v2630_v29  ;;  %v2433_v51 = vand.u32 2147483648, %v2420_v23  ;;  %v2431_v7 = vand.u32 2147483647, %v2420_v23  ;;  %vm2427_vm11 = vweird.f32 %v2420_v23 }
 0x522   : > { %3467 = vrcp.f32 %v2421_v41  ;;  %v2448_v37 = vand.u32 2147483648, %v2421_v41  ;;  %vm2442_vm15 = vweird.f32 %v2421_v41  ;;  %v2446_v39 = vand.u32 2147483647, %v2421_v41 }
 0x523   : > { %v2434_v10 = vor.u32 1.1754944e-38, %v2433_v51  ;;  %vm2432_vm13 = vcmp.eq.f32.partialorder %v2431_v7, 8.507059e+37 }
 0x524   : > { %v2449_v3 = vor.u32 1.1754944e-38, %v2448_v37  ;;  %vm2447_vm8 = vcmp.eq.f32.partialorder %v2446_v39, 8.507059e+37  ;;  %v1612_v39 = vperm.slane %v4809_v1, 2 }
 0x526   : > { %v2631_v52 = vpop.f32.mrf.mxu0 }
 0x527   : > { %v3466_v28 = vpop.eup %3465  ;;  %v2632_v63 = vadd.f32 %v4743_v2, %v2631_v52 }
 0x528   : > { %v3468_v16 = vpop.eup %3467  ;;  %v2423_v35 = vmul.f32 %v3466_v28, %v2420_v23  ;;  %vm2428_vm10 = vweird.f32 %v3466_v28  ;;  %v1624_v23 = vperm.slane %v4818_v0, 0 }
 0x529   : > { %v2438_v57 = vmul.f32 %v3468_v16, %v2421_v41  ;;  %3247 = vst [vmem:[%s4749_s10 + $0x8] sm:$0xff] %v2632_v63  ;;  %vm2429_vm12 = vmor %vm2427_vm11, %vm2428_vm10  ;;  %vm2443_vm14 = vweird.f32 %v3468_v16  ;;  %v1611_v41 = vperm.slane %v4809_v1, 1  ;;  %v1638_v63 = vperm.slane %v1579_v46, 0 }
 0x52a   : > { %v2424_v44 = vsub.f32 1.0, %v2423_v35  ;;  %vm2444_vm7 = vmor %vm2442_vm15, %vm2443_vm14 }
 0x52b   : > { %v2439_v60 = vsub.f32 1.0, %v2438_v57  ;;  %v4839_v57 = vld [vmem:[%s1600_s6] ss:$8 sm:$0x7] }
 0x52c   : > { %v2425_v6 = vmul.f32 %v3466_v28, %v2424_v44  ;;  %v1632_v44 = vperm.slane %v4824_v59, 1 }
 0x52d   : > { %v2440_v33 = vmul.f32 %v3468_v16, %v2439_v60  ;;  %v1652_v60 = vperm.slane %v4839_v57, 0 }
 0x52e   : > { %v2426_v54 = vadd.f32 %v3466_v28, %v2425_v6  ;;  %v2634_v30 = vpop.f32.mrf.mxu0  ;;  %v1639_v6 = vperm.slane %v1579_v46, 1 }
 0x52f   : > { %v2635_v15 = vadd.f32 %v4743_v2, %v2634_v30  ;;  %v2441_v25 = vadd.f32 %v3468_v16, %v2440_v33  ;;  %v1646_v33 = vperm.slane %v4834_v18, 1 }
 0x530   : > { %v2430_v11 = vsel %vm2429_vm12, %v3466_v28, %v2426_v54 }
 0x531   : > { %v2435_v21 = vsel %vm2432_vm13, %v2434_v10, %v2430_v11  ;;  %3248 = vst [vmem:[%s4749_s10 + $0x10] sm:$0xff] %v2635_v15  ;;  %v2445_v58 = vsel %vm2444_vm7, %v3468_v16, %v2441_v25  ;;  %v1625_v16 = vperm.slane %v4818_v0, 1  ;;  %v1653_v10 = vperm.slane %v4839_v57, 1 }
 0x532   : > { %v2453_v31 = vmul.f32 %v2452_v43, %v2435_v21  ;;  %v2450_v4 = vsel %vm2447_vm8, %v2449_v3, %v2445_v58 }
 0x533   : > { %v2456_v8 = vsub.f32 1.0, %v2450_v4  ;;  %v2458_v12 = vmul.f32 %v2450_v4, %v4648_v49  ;;  %v4807_v49 = vld [vmem:[%s1523_s9] ss:$8 sm:$0x7]  ;;  %s2699_s9 = sshll.u32 %s339_s22, 4  ;;  %s2700_s9 = int_to_ptr.vmem [resolvable:$true] %s2699_s9 }
 0x534   : > { %v2454_v55 = vadd.f32 %v2453_v31, %v1513_v19  ;;  %v1603_v34 = vperm.slane %v4807_v49, 0  ;;  %v1604_v29 = vperm.slane %v4807_v49, 1  ;;  %v1605_v37 = vperm.slane %v4807_v49, 2 }
 0x535   : > { %v1640_v49 = vperm.slane %v1579_v46, 2 }
 0x536   : > { %3469 = vtanh.f32 %v2454_v55  ;;  %v2636_v17 = vpop.f32.mrf.mxu0  ;;  %v1658_v24 = vsel %vm496_vm0, %v1603_v34, %v1610_v36  ;;  %v1659_v28 = vsel %vm496_vm0, %v1604_v29, %v1611_v41  ;;  %v1660_v4 = vsel %vm496_vm0, %v1605_v37, %v1612_v39 }
 0x537   : > { %v2637_v5 = vadd.f32 %v4743_v2, %v2636_v17  ;;  %v1661_v14 = vsel %vm500_vm1, %v1658_v24, %v1617_v32  ;;  %v1662_v35 = vsel %vm500_vm1, %v1659_v28, %v1618_v42  ;;  %v1619_v17 = vperm.slane %v4813_v61, 2 }
 0x538   : > { %v1664_v52 = vsel %vm504_vm2, %v1661_v14, %v1624_v23  ;;  %v1665_v51 = vsel %vm504_vm2, %v1662_v35, %v1625_v16  ;;  %v1647_v34 = vperm.slane %v4834_v18, 2 }
 0x539   : > { %3249 = vst [vmem:[%s4749_s10 + $0x18] sm:$0xff] %v2637_v5  ;;  %v1667_v40 = vsel %vm508_vm3, %v1664_v52, %v1631_v62  ;;  %v1668_v27 = vsel %vm508_vm3, %v1665_v51, %v1632_v44 }
 0x53a   : > { %v1670_v50 = vsel %vm512_vm4, %v1667_v40, %v1638_v63  ;;  %v1671_v54 = vsel %vm512_vm4, %v1668_v27, %v1639_v6 }
 0x53b   : > { %v1673_v7 = vsel %vm516_vm5, %v1670_v50, %v1645_v53  ;;  %v1674_v43 = vsel %vm516_vm5, %v1671_v54, %v1646_v33 }
 0x53c   : > { %v3470_v13 = vpop.eup %3469  ;;  %v1676_v47 = vsel %vm520_vm6, %v1673_v7, %v1652_v60  ;;  %v1677_v19 = vsel %vm520_vm6, %v1674_v43, %v1653_v10 }
 0x53d   : > { %v2457_v22 = vmul.f32 %v3470_v13, %v2456_v8  ;;  %v1626_v8 = vperm.slane %v4818_v0, 2 }
 0x53e   : > { %v2639_v56 = vpop.f32.mrf.mxu0 }
 0x53f   : > { %v2640_v20 = vadd.f32 %v4743_v2, %v2639_v56  ;;  %v4777_v48 = vadd.f32 %v2458_v12, %v2457_v22  ;;  %v1663_v22 = vsel %vm500_vm1, %v1660_v4, %v1619_v17 }
 0x541   : > { %3250 = vst [vmem:[%s4749_s10 + $0x20] sm:$0xff] %v2640_v20  ;;  %v2460_v26 = vpack.c.bf16 %v4777_v48, %v4777_v48  ;;  %v1633_v20 = vperm.slane %v4824_v59, 2  ;;  %v1654_v59 = vperm.slane %v4839_v57, 2 }
 0x543   : > { %2469 = vmatmul.bf16.vlgmr.msra.gmra.mxu1 %v2460_v26  ;;  %2482 = vmatmul.bf16.vlgmr.msra.gmra.mxu2 %v2460_v26 }
 0x544   : > { %2495 = vmatmul.bf16.vlgmr.msrb.gmra.mxu3 %v2460_v26 }
 0x546   : > { %v2641_v9 = vpop.f32.mrf.mxu0 }
 0x547   : > { %v2642_v45 = vadd.f32 %v4743_v2, %v2641_v9  ;;  %v1666_v9 = vsel %vm504_vm2, %v1663_v22, %v1626_v8 }
 0x548   : > { %v1669_v1 = vsel %vm508_vm3, %v1666_v9, %v1633_v20 }
 0x549   : > { %3251 = vst [vmem:[%s4749_s10 + $0x28] sm:$0xff] %v2642_v45  ;;  %v1672_v0 = vsel %vm512_vm4, %v1669_v1, %v1640_v49 }
 0x54a   : > { %v1675_v14 = vsel %vm516_vm5, %v1672_v0, %v1647_v34 }
 0x54b   : > { %v1678_v18 = vsel %vm520_vm6, %v1675_v14, %v1654_v59 }
 0x5c0   : > { %v2470_v30 = vpop.f32.mrf.mxu1 }
 0x5c1   : > { %v2500_v15 = vadd.f32 %v2470_v30, %v1676_v47 }
 0x5c3   : > { %v3213_v11 = vmul.f32 -1.442695, %v2500_v15 }
 0x5c5   : > { %3471 = vpow2.f32 %v3213_v11 }
 0x5c6   : > { %v2483_v21 = vpop.f32.mrf.mxu2 }
 0x5c7   : > { %v2501_v25 = vadd.f32 %v2483_v21, %v1677_v19  ;;  %v2496_v31 = vpop.f32.mrf.mxu3 }
 0x5c8   : > { %v2472_v55 = vpop.f32.mrf.mxu1  ;;  %v2540_v28 = vadd.f32 %v4767_v38, %v2496_v31 }
 0x5c9   : > { %v3214_v58 = vmul.f32 -1.442695, %v2501_v25 }
 0x5cb   : > { %v3472_v3 = vpop.eup %3471  ;;  %3473 = vpow2.f32 %v3214_v58 }
 0x5cc   : > { %v2508_v5 = vadd.f32 1.0, %v3472_v3 }
 0x5ce   : > { %3475 = vrcp.f32 %v2508_v5  ;;  %v2485_v13 = vpop.f32.mrf.mxu2  ;;  %v2521_v32 = vand.u32 2147483648, %v2508_v5  ;;  %v2519_v23 = vand.u32 2147483647, %v2508_v5  ;;  %vm2515_vm1 = vweird.f32 %v2508_v5 }
 0x5cf   : > { %v2498_v12 = vpop.f32.mrf.mxu3 }
 0x5d0   : > { %v2522_v46 = vor.u32 1.1754944e-38, %v2521_v32  ;;  %vm2520_vm3 = vcmp.eq.f32.partialorder %v2519_v23, 8.507059e+37 }
 0x5d1   : > { %v3474_v56 = vpop.eup %3473 }
 0x5d2   : > { %v2509_v26 = vadd.f32 1.0, %v3474_v56 }
 0x5d4   : > { %v3476_v45 = vpop.eup %3475  ;;  %3477 = vrcp.f32 %v2509_v26  ;;  %v2536_v35 = vand.u32 2147483648, %v2509_v26  ;;  %v2534_v57 = vand.u32 2147483647, %v2509_v26  ;;  %vm2530_vm5 = vweird.f32 %v2509_v26 }
 0x5d5   : > { %v2511_v61 = vmul.f32 %v3476_v45, %v2508_v5  ;;  %vm2516_vm0 = vweird.f32 %v3476_v45 }
 0x5d6   : > { %vm2517_vm2 = vmor %vm2515_vm1, %vm2516_vm0  ;;  %v2537_v51 = vor.u32 1.1754944e-38, %v2536_v35  ;;  %vm2535_vm10 = vcmp.eq.f32.partialorder %v2534_v57, 8.507059e+37 }
 0x5d7   : > { %v2512_v36 = vsub.f32 1.0, %v2511_v61 }
 0x5d9   : > { %v2513_v24 = vmul.f32 %v3476_v45, %v2512_v36 }
 0x5da   : > { %v3478_v29 = vpop.eup %3477 }
 0x5db   : > { %v2526_v41 = vmul.f32 %v3478_v29, %v2509_v26  ;;  %v2514_v62 = vadd.f32 %v3476_v45, %v2513_v24  ;;  %vm2531_vm4 = vweird.f32 %v3478_v29 }
 0x5dc   : > { %vm2532_vm9 = vmor %vm2530_vm5, %vm2531_vm4 }
 0x5dd   : > { %v2527_v42 = vsub.f32 1.0, %v2526_v41  ;;  %v2518_v52 = vsel %vm2517_vm2, %v3476_v45, %v2514_v62 }
 0x5de   : > { %v2523_v63 = vsel %vm2520_vm3, %v2522_v46, %v2518_v52 }
 0x5df   : > { %v2541_v16 = vmul.f32 %v2540_v28, %v2523_v63  ;;  %v2528_v40 = vmul.f32 %v3478_v29, %v2527_v42 }
 0x5e1   : > { %v2542_v53 = vadd.f32 %v2541_v16, %v1678_v18  ;;  %v2529_v44 = vadd.f32 %v3478_v29, %v2528_v40 }
 0x5e3   : > { %3479 = vtanh.f32 %v2542_v53  ;;  %v2533_v50 = vsel %vm2532_vm9, %v3478_v29, %v2529_v44 }
 0x5e4   : > { %v2538_v60 = vsel %vm2535_vm10, %v2537_v51, %v2533_v50 }
 0x5e5   : > { %v2544_v38 = vsub.f32 1.0, %v2538_v60  ;;  %v2546_v27 = vmul.f32 %v2538_v60, %v4777_v48 }
 0x5e9   : > { %v3480_v6 = vpop.eup %3479 }
 0x5ea   : > { %v2545_v7 = vmul.f32 %v3480_v6, %v2544_v38 }
 0x5ec   : > { %v2547_v33 = vadd.f32 %v2546_v27, %v2545_v7 }
 0x5ee   : > { %v2567_v47 = vpack.c.bf16 %v2547_v33, %v4777_v48  ;;  %2664 = vst [vmem:[%s339_s22] sm:$0xff] %v2547_v33 }
 0x5f0   : > { %2643 = vmatmul.bf16.gmra.mxu0 %v2567_v47 }
 0x5f1   : > { %3612 = shalt.err (!%p3609_p8)
}
 0x5f2   : > { %3327 = dma.vmem_to_hbm [thread:$0]  (%p3790_p5), %s2700_s9, 128, %s2702_s29, %s2671_s18  }
 0x5f3   : > { %s5003_s23 = sld [smem:[#allocation36_spill]]  ;;  %s2682_s1 = sshll.u32 %s4749_s10, 4  ;;  %s2683_s1 = int_to_ptr.vmem [resolvable:$true] %s2682_s1 }
 0x5f4   : > { %s2666_s5 = scalar_lea.sflag [#allocation6], %s4735_s14 }
 0x5f9   : > { %s2681_s19 = scalar_lea.hbm %s5003_s23, %s3256_s26  ;;  %s3633_s7 = scalar_lea.hbm %s5003_s23, 128 }
 0x5fa   : > { %s2684_s8 = sshll.u32 %s2681_s19, 4  ;;  %s2685_s8 = int_to_ptr.hbm [resolvable:$true] %s2684_s8 }
 0x5fb   : > { %s3627_s11 = sshra.s32 %s2685_s8, 4  ;;  %s3628_s11 = int_to_ptr.hbm [resolvable:$true] %s3627_s11 }
 0x5fc   : > { %s3629_s16 = scalar_lea.hbm %s3628_s11, 64  ;;  %p3634_p12 = scmp.lt.s32.totalorder %s3628_s11, %s5003_s23 }
 0x5fd   : > { %p3630_p9 = scmp.ne.s32.totalorder %s3628_s11, %s3629_s16  ;;  %p3635_p13 = scmp.lt.s32.totalorder %s3633_s7, %s3629_s16 }
 0x5ff   : > { %p3631_p10 = pnand %p3630_p9, %p3790_p5  ;;  %p3636_p0 = por %p3635_p13, %p3634_p12 }
 0x601   : > { %p3632_p11 = pneg %p3631_p10 }
 0x603   : > { %p3637_p1 = pnand %p3636_p0, %p3632_p11 }
 0x66d   : > { %v2644_v48 = vpop.f32.mrf.mxu0 }
 0x66e   : > { %v2645_v54 = vadd.f32 %v4743_v2, %v2644_v48 }
 0x670   : > { %3252 = vst [vmem:[%s4749_s10 + $0x30] sm:$0xff] %v2645_v54 }
 0x675   : > { %v2646_v30 = vpop.f32.mrf.mxu0 }
 0x676   : > { %v2647_v10 = vadd.f32 %v4743_v2, %v2646_v30 }
 0x678   : > { %3253 = vst [vmem:[%s4749_s10 + $0x38] sm:$0xff] %v2647_v10 }
 0x679   : > { %3640 = shalt.err (!%p3637_p1)
}
 0x67a   : > { %s3701_s14 = smov 128   ;;  %s3702_s10 = smov 256  }
 0x67b   : > { %s3703_s28 = smov 8  }
 0x67c   : > { %3326 = dma.vmem_to_hbm [thread:$0]  (%p3790_p5), %s2683_s1, 1024, %s2685_s8, %s2666_s5, %s3701_s14, %s3702_s10, %s3703_s28  }
 0x67d PF: > { %s5004_s27 = sld [smem:[#allocation21_spill]] }
 0x67e   : > { %s5005_s3 = sld [smem:[#allocation18_spill]] }
 0x683   : > { %p3353_p2 = scmp.ge.s32.totalorder %s5004_s27, 2 }
 0x684   : > { %s2713_s29 = sand.u32 1, %s5005_s3  }
 0x685   : > { %p3341_p3 = pnand %p3353_p2, %p3794_p6  ;;  %s2714_s18 = scalar_lea.sflag [#allocation6], %s2713_s29 }
 0x687   : > { %p3342_p4 = pneg %p3341_p3 }
 0x689   : > { %3668 = dma.done.wait (%p3342_p4), %s2714_s18, 1024  }
 0x68a   : > { %3670 = vsyncadd (%p3342_p4), %s2714_s18, 4294966272  ;;  %s2724_s17 = scalar_lea.sflag [#allocation12], %s2713_s29 }
 0x68b   : > { %3672 = dma.done.wait (%p3342_p4), %s2724_s17, 128  }
 0x68c   : > { %3674 = vsyncadd (%p3342_p4), %s2724_s17, 4294967168  ;;  %s5007_s12 = sld [smem:[#allocation23_spill]] }
 0x68d   : > { %s5008_s9 = sld [smem:[#allocation19_spill]] }
 0x68e   : > { %s5009_s10 = sld [smem:[#allocation20_spill]] }
 0x68f   : > { %s5010_s11 = sld [smem:[#allocation24_spill]] }
 0x692   : > { %p32_p5 = scmp.ge.s32.totalorder %s5007_s12, 4  }
 0x694   :  { %34 = sbr.rel (!%p32_p5) target bundleno = 20 (0x14), region = 180 }
 0x699   :  { %2730 = vsyncpa [#allocation5], 1 }
 0x69a   :  { %2732 = vsyncpa [#allocation5 + $0x1], 1 }
 0x69b   :  { %2733 = vsyncpa [#allocation8], 1 }
 0x69c   :  { %2734 = vsyncpa [#allocation6], 1 }
 0x69d   :  { %2736 = vsyncpa [#allocation6 + $0x1], 1 }
 0x69e   :  { %2737 = vsyncpa [#allocation12], 1 }
 0x69f   :  { %2739 = vsyncpa [#allocation12 + $0x1], 1 }

</bundles_post_ra>
